<compile_context>
chip_gen: v7x
topology: tpu7x:2x2x1
jax: 0.10.0
libtpu: 0.0.40
codegen_flags: <defaults>
</compile_context>

<pallas_src>
import math

import jax
import jax.numpy as jnp
import numpy as np
from jax.experimental import pallas as pl
from jax.experimental.pallas import tpu as pltpu

# ---------------- configuration (small, consistent with the module) ----------------
D_MODEL = 32      # hidden
NHEAD = 4         # attention heads (head_dim = 8)
DIM_FF = 64       # feed-forward width
NUM_LAYERS = 2
S_TGT = 8         # number of decoder queries (tgt length)
S_MEM = 16        # memory (encoder) length
BATCH = 2
EPS = 1e-5        # nn.LayerNorm default eps


# ---------------- kernel-side helpers (pure jnp, traced inside the kernel) ----------
def _layernorm_rows(x, gb):
    # x: (N, D); gb: (2, D) with row 0 = gamma, row 1 = beta
    mu = jnp.mean(x, axis=-1, keepdims=True)
    var = jnp.mean((x - mu) ** 2, axis=-1, keepdims=True)
    return (x - mu) * jax.lax.rsqrt(var + EPS) * gb[0:1, :] + gb[1:2, :]


def _same_batch_mask(nq, nk):
    # rows are seq-major flattened: row = s * BATCH + b  ->  batch id = row mod BATCH
    iq = jax.lax.broadcasted_iota(jnp.int32, (nq, nk), 0)
    ik = jax.lax.broadcasted_iota(jnp.int32, (nq, nk), 1)
    if BATCH & (BATCH - 1) == 0:            # power-of-two batch: cheap bitwise op
        return (iq & (BATCH - 1)) == (ik & (BATCH - 1))
    qf = iq.astype(jnp.float32)
    kf = ik.astype(jnp.float32)
    return (qf - jnp.floor(qf / BATCH) * BATCH) == (kf - jnp.floor(kf / BATCH) * BATCH)


def _mha_rows(q_in, k_in, v_in, wab, mask, qk_same=False):
    """Multi-head attention on batch-flattened rows.

    q_in: (nq, D); k_in/v_in: (nk, D)   (rows are seq-major, row = s*B + b)
    wab:  (D+1, 4D) = [[Wq^T | Wk^T | Wv^T | Wout^T], [bq | bk | bv | bout]]
    mask: (nq, nk) bool, True where query row and key row belong to the same batch.
    qk_same: static flag; when q_in is k_in, project Q and K with one fused matmul.
    """
    d = D_MODEL
    hd = d // NHEAD
    w = wab[0:d, :]              # (D, 4D)
    b = wab[d:d + 1, :]          # (1, 4D)

    if qk_same:
        qk = jnp.dot(q_in, w[:, 0:2 * d], preferred_element_type=jnp.float32) + b[:, 0:2 * d]
        q = qk[:, 0:d]
        k = qk[:, d:2 * d]
    else:
        q = jnp.dot(q_in, w[:, 0:d], preferred_element_type=jnp.float32) + b[:, 0:d]
        k = jnp.dot(k_in, w[:, d:2 * d], preferred_element_type=jnp.float32) + b[:, d:2 * d]
    v = jnp.dot(v_in, w[:, 2 * d:3 * d], preferred_element_type=jnp.float32) + b[:, 2 * d:3 * d]
    q = q * (1.0 / math.sqrt(hd))

    # split heads: (n, D) -> (NHEAD, n, hd) via static lane slices + stack
    qs = jnp.stack([q[:, h * hd:(h + 1) * hd] for h in range(NHEAD)], axis=0)
    ks = jnp.stack([k[:, h * hd:(h + 1) * hd] for h in range(NHEAD)], axis=0)
    vs = jnp.stack([v[:, h * hd:(h + 1) * hd] for h in range(NHEAD)], axis=0)

    s = jnp.einsum('hqd,hkd->hqk', qs, ks, preferred_element_type=jnp.float32)
    s = jnp.where(mask[None, :, :], s, -1e30)          # kill cross-batch entries
    s = s - jnp.max(s, axis=-1, keepdims=True)
    p = jnp.exp(s)
    p = p / jnp.sum(p, axis=-1, keepdims=True)
    o = jnp.einsum('hqk,hkd->hqd', p, vs, preferred_element_type=jnp.float32)

    o = jnp.concatenate([o[h] for h in range(NHEAD)], axis=-1)     # (nq, D)
    return jnp.dot(o, w[:, 3 * d:4 * d], preferred_element_type=jnp.float32) + b[:, 3 * d:4 * d]


# ---------------- fused Pallas kernel: all layers + final norm, whole batch ---------
def fused_decoder_kernel(tgt_ref, mem_ref, qpos_ref, pos_ref,
                         w_attn_ref, w_ffn1_ref, w_ffn2_ref, ln_ref, out_ref):
    x = tgt_ref[...]             # (S_TGT*B, D)   seq-major rows
    mem = mem_ref[...]           # (S_MEM*B, D)
    qpos = qpos_ref[...]         # (S_TGT*B, D)
    memk = mem + pos_ref[...]    # cross-attention keys = memory + pos  (hoisted)

    nq = x.shape[0]
    nk = mem.shape[0]
    mask_self = _same_batch_mask(nq, nq)     # hoisted, reused by all layers
    mask_cross = _same_batch_mask(nq, nk)

    for l in range(NUM_LAYERS):              # static unroll over layers
        # --- self-attention (q = k = x + query_pos, v = x), residual + LayerNorm ---
        qk = x + qpos
        sa = _mha_rows(qk, qk, x, w_attn_ref[2 * l], mask_self, qk_same=True)
        x = _layernorm_rows(x + sa, ln_ref[3 * l])

        # --- cross-attention (q = x + query_pos, k = memory + pos, v = memory) ---
        ca = _mha_rows(x + qpos, memk, mem, w_attn_ref[2 * l + 1], mask_cross)
        x = _layernorm_rows(x + ca, ln_ref[3 * l + 1])

        # --- feed-forward (ReLU), residual + LayerNorm ---
        w1 = w_ffn1_ref[l]                   # (D+1, DIM_FF): rows 0:D = W1^T, row D = b1
        w2 = w_ffn2_ref[l]                   # (DIM_FF+1, D): rows 0:FF = W2^T, row FF = b2
        h = jnp.maximum(
            jnp.dot(x, w1[0:D_MODEL, :], preferred_element_type=jnp.float32)
            + w1[D_MODEL:D_MODEL + 1, :], 0.0)
        ff = (jnp.dot(h, w2[0:DIM_FF, :], preferred_element_type=jnp.float32)
              + w2[DIM_FF:DIM_FF + 1, :])
        x = _layernorm_rows(x + ff, ln_ref[3 * l + 2])

    # final decoder norm (self.norm)
    x = _layernorm_rows(x, ln_ref[3 * NUM_LAYERS])
    out_ref[...] = x


# ---------------- pallas_call wrapper ----------------
def _full_spec(shape):
    nd = len(shape)
    return pl.BlockSpec(shape, lambda i, _n=nd: (0,) * _n)   # whole array, single grid step


def transformer_decoder_forward(tgt_sbd, memory_sbd, pos_sbd, query_pos_sbd, packed):
    S, B, D = tgt_sbd.shape
    Sm = memory_sbd.shape[0]
    # free, contiguous reshapes: (S, B, D) -> (S*B, D), row = s*B + b  (no transposes)
    tgt2 = tgt_sbd.reshape(S * B, D)
    mem2 = memory_sbd.reshape(Sm * B, D)
    pos2 = pos_sbd.reshape(Sm * B, D)
    qpos2 = query_pos_sbd.reshape(S * B, D)

    args = (tgt2, mem2, qpos2, pos2,
            packed["w_attn"], packed["w_ffn1"], packed["w_ffn2"], packed["ln"])

    out2 = pl.pallas_call(
        fused_decoder_kernel,
        out_shape=jax.ShapeDtypeStruct((S * B, D), jnp.float32),
        grid=(1,),
        in_specs=[_full_spec(a.shape) for a in args],
        out_specs=pl.BlockSpec((S * B, D), lambda i: (0, 0)),
        compiler_params=pltpu.CompilerParams(dimension_semantics=("arbitrary",)),
    )(*args)

    # rows are already (S, B, D) row-major -> free reshape, then unsqueeze(0)
    return out2.reshape(S, B, D)[None]


# ---------------- parameter packing: 38 tensors -> 4 VMEM slabs ----------------
def pack_params(layer_params, norm_g, norm_b):
    w_attn, w_ffn1, w_ffn2, ln_rows = [], [], [], []
    for p in layer_params:
        for pre in ("sa", "ca"):
            w = jnp.concatenate([p[f"{pre}_win"].T, p[f"{pre}_wout"].T], axis=1)   # (D, 4D)
            b = jnp.concatenate([p[f"{pre}_bin"].reshape(1, -1),
                                 p[f"{pre}_bout"].reshape(1, -1)], axis=1)         # (1, 4D)
            w_attn.append(jnp.concatenate([w, b], axis=0))                          # (D+1, 4D)
        w_ffn1.append(jnp.concatenate([p["l1_w"].T, p["l1_b"].reshape(1, -1)], axis=0))
        w_ffn2.append(jnp.concatenate([p["l2_w"].T, p["l2_b"].reshape(1, -1)], axis=0))
        for i in (1, 2, 3):
            ln_rows.append(jnp.concatenate([p[f"n{i}_g"].reshape(1, -1),
                                            p[f"n{i}_b"].reshape(1, -1)], axis=0))  # (2, D)
    ln_rows.append(jnp.concatenate([norm_g.reshape(1, -1), norm_b.reshape(1, -1)], axis=0))
    return {
        "w_attn": jnp.stack(w_attn, axis=0),   # (2*L, D+1, 4D)   = (4, 33, 128)
        "w_ffn1": jnp.stack(w_ffn1, axis=0),   # (L, D+1, FF)     = (2, 33, 64)
        "w_ffn2": jnp.stack(w_ffn2, axis=0),   # (L, FF+1, D)     = (2, 65, 32)
        "ln": jnp.stack(ln_rows, axis=0),      # (3*L+1, 2, D)    = (7, 2, 32)
    }


# ---------------- pure-JAX reference (PyTorch-faithful, no Pallas) ----------------
def _matmul_t(x, w):
    return jax.lax.dot_general(x, w, (((1,), (1,)), ((), ())),
                               preferred_element_type=jnp.float32)


def _ref_layernorm(x, g, b):
    mu = jnp.mean(x, axis=-1, keepdims=True)
    var = jnp.mean((x - mu) ** 2, axis=-1, keepdims=True)
    return (x - mu) * jax.lax.rsqrt(var + EPS) * g + b


def _ref_mha(q_in, k_in, v_in, w_in, b_in, w_out, b_out):
    d = q_in.shape[-1]
    hd = d // NHEAD
    q = _matmul_t(q_in, w_in[0:d]) + b_in[:, 0:d]
    k = _matmul_t(k_in, w_in[d:2 * d]) + b_in[:, d:2 * d]
    v = _matmul_t(v_in, w_in[2 * d:3 * d]) + b_in[:, 2 * d:3 * d]
    scale = 1.0 / math.sqrt(hd)
    heads = []
    for h in range(NHEAD):
        qh = q[:, h * hd:(h + 1) * hd] * scale
        kh = k[:, h * hd:(h + 1) * hd]
        vh = v[:, h * hd:(h + 1) * hd]
        s = jax.lax.dot_general(qh, kh, (((1,), (1,)), ((), ())),
                                preferred_element_type=jnp.float32)
        s = s - jnp.max(s, axis=-1, keepdims=True)
        p = jnp.exp(s)
        p = p / jnp.sum(p, axis=-1, keepdims=True)
        heads.append(jnp.dot(p, vh, preferred_element_type=jnp.float32))
    o = jnp.concatenate(heads, axis=-1)
    return _matmul_t(o, w_out) + b_out


def ref_forward(tgt_sbd, memory_sbd, pos_sbd, query_pos_sbd, layer_params, ng, nb):
    x = jnp.transpose(tgt_sbd, (1, 0, 2))
    mem = jnp.transpose(memory_sbd, (1, 0, 2))
    pos = jnp.transpose(pos_sbd, (1, 0, 2))
    qpos = jnp.transpose(query_pos_sbd, (1, 0, 2))
    outs = []
    for b in range(x.shape[0]):
        xb = x[b]
        for p in layer_params:
            qk = xb + qpos[b]
            sa = _ref_mha(qk, qk, xb, p["sa_win"], p["sa_bin"], p["sa_wout"], p["sa_bout"])
            xb = _ref_layernorm(xb + sa, p["n1_g"], p["n1_b"])
            ca = _ref_mha(xb + qpos[b], mem[b] + pos[b], mem[b],
                          p["ca_win"], p["ca_bin"], p["ca_wout"], p["ca_bout"])
            xb = _ref_layernorm(xb + ca, p["n2_g"], p["n2_b"])
            h = jnp.maximum(_matmul_t(xb, p["l1_w"]) + p["l1_b"], 0.0)
            ff = _matmul_t(h, p["l2_w"]) + p["l2_b"]
            xb = _ref_layernorm(xb + ff, p["n3_g"], p["n3_b"])
        xb = _ref_layernorm(xb, ng, nb)
        outs.append(xb)
    y = jnp.stack(outs, axis=0)
    return jnp.transpose(y, (1, 0, 2))[None]


# ---------------- deterministic parameter init (PyTorch-like layouts) ----------------
def init_layer_params(key):
    ks = jax.random.split(key, 8)

    def u(k, shape, fan_in):
        bound = 1.0 / math.sqrt(fan_in)
        return jax.random.uniform(k, shape, jnp.float32, -bound, bound)

    p = {}
    p["sa_win"] = u(ks[0], (3 * D_MODEL, D_MODEL), D_MODEL)
    p["sa_bin"] = jnp.zeros((1, 3 * D_MODEL), jnp.float32)
    p["sa_wout"] = u(ks[1], (D_MODEL, D_MODEL), D_MODEL)
    p["sa_bout"] = jnp.zeros((1, D_MODEL), jnp.float32)
    p["ca_win"] = u(ks[2], (3 * D_MODEL, D_MODEL), D_MODEL)
    p["ca_bin"] = jnp.zeros((1, 3 * D_MODEL), jnp.float32)
    p["ca_wout"] = u(ks[3], (D_MODEL, D_MODEL), D_MODEL)
    p["ca_bout"] = jnp.zeros((1, D_MODEL), jnp.float32)
    p["l1_w"] = u(ks[4], (DIM_FF, D_MODEL), D_MODEL)
    p["l1_b"] = u(ks[5], (1, DIM_FF), D_MODEL)
    p["l2_w"] = u(ks[6], (D_MODEL, DIM_FF), DIM_FF)
    p["l2_b"] = u(ks[7], (1, D_MODEL), DIM_FF)
    for i in (1, 2, 3):
        p[f"n{i}_g"] = jnp.ones((1, D_MODEL), jnp.float32)
        p[f"n{i}_b"] = jnp.zeros((1, D_MODEL), jnp.float32)
    return p


if __name__ == "__main__":
    key = jax.random.PRNGKey(0)
    k1, k2, k3, k4, kp = jax.random.split(key, 5)

    # PyTorch-layout inputs: (seq, batch, d_model)
    tgt = jax.random.normal(k1, (S_TGT, BATCH, D_MODEL), jnp.float32)
    memory = jax.random.normal(k2, (S_MEM, BATCH, D_MODEL), jnp.float32)
    pos = jax.random.normal(k3, (S_MEM, BATCH, D_MODEL), jnp.float32)
    query_pos = jax.random.normal(k4, (S_TGT, BATCH, D_MODEL), jnp.float32)

    # _get_clones uses copy.deepcopy => all layers start with identical weights.
    layer_p = init_layer_params(kp)
    layer_params = [layer_p] * NUM_LAYERS
    norm_g = jnp.ones((1, D_MODEL), jnp.float32)   # final nn.LayerNorm
    norm_b = jnp.zeros((1, D_MODEL), jnp.float32)

    packed = pack_params(layer_params, norm_g, norm_b)   # one-time weight packing

    fwd = jax.jit(transformer_decoder_forward)
    out = jax.block_until_ready(fwd(tgt, memory, pos, query_pos, packed))
    assert out.shape == (1, S_TGT, BATCH, D_MODEL)

    ref = ref_forward(tgt, memory, pos, query_pos, layer_params, norm_g, norm_b)
    np.testing.assert_allclose(np.asarray(out), np.asarray(ref), atol=2e-4, rtol=2e-4)

    # TODO(synk): attn_mask / key_padding_mask branches, dropout (train mode) and the
    # return_intermediate=True path are not exercised (None / identity / False here).
    print("KERNEL_OK")
</pallas_src>

<mosaic_0001>
module attributes {stable_mosaic.version = 11 : i64} {
  func.func @fused_decoder_kernel(%arg0: i32, %arg1: memref<16x32xf32, #tpu.memory_space<vmem>>, %arg2: memref<32x32xf32, #tpu.memory_space<vmem>>, %arg3: memref<16x32xf32, #tpu.memory_space<vmem>>, %arg4: memref<32x32xf32, #tpu.memory_space<vmem>>, %arg5: memref<4x33x128xf32, #tpu.memory_space<vmem>>, %arg6: memref<2x33x64xf32, #tpu.memory_space<vmem>>, %arg7: memref<2x65x32xf32, #tpu.memory_space<vmem>>, %arg8: memref<7x2x32xf32, #tpu.memory_space<vmem>>, %arg9: memref<16x32xf32, #tpu.memory_space<vmem>>) attributes {dimension_semantics = [#tpu.dimension_semantics<arbitrary>], iteration_bounds = array<i64: 1>, scalar_prefetch = 0 : i64, scratch_operands = 0 : i64, tpu.core_type = #tpu.core_type<tc>, window_params = [{pipeline_mode = #tpu.pipeline_mode<synchronous>, transform_indices = @transform_0, window_bounds = array<i64: 16, 32>}, {pipeline_mode = #tpu.pipeline_mode<synchronous>, transform_indices = @transform_1, window_bounds = array<i64: 32, 32>}, {pipeline_mode = #tpu.pipeline_mode<synchronous>, transform_indices = @transform_2, window_bounds = array<i64: 16, 32>}, {pipeline_mode = #tpu.pipeline_mode<synchronous>, transform_indices = @transform_3, window_bounds = array<i64: 32, 32>}, {pipeline_mode = #tpu.pipeline_mode<synchronous>, transform_indices = @transform_4, window_bounds = array<i64: 4, 33, 128>}, {pipeline_mode = #tpu.pipeline_mode<synchronous>, transform_indices = @transform_5, window_bounds = array<i64: 2, 33, 64>}, {pipeline_mode = #tpu.pipeline_mode<synchronous>, transform_indices = @transform_6, window_bounds = array<i64: 2, 65, 32>}, {pipeline_mode = #tpu.pipeline_mode<synchronous>, transform_indices = @transform_7, window_bounds = array<i64: 7, 2, 32>}, {pipeline_mode = #tpu.pipeline_mode<synchronous>, transform_indices = @transform_8, window_bounds = array<i64: 16, 32>}]} {
    %c0 = arith.constant 0 : index
    %c0_0 = arith.constant 0 : index
    %0 = vector.load %arg1[%c0, %c0_0] : memref<16x32xf32, #tpu.memory_space<vmem>>, vector<16x32xf32>
    %c0_1 = arith.constant 0 : index
    %c0_2 = arith.constant 0 : index
    %1 = vector.load %arg2[%c0_1, %c0_2] : memref<32x32xf32, #tpu.memory_space<vmem>>, vector<32x32xf32>
    %c0_3 = arith.constant 0 : index
    %c0_4 = arith.constant 0 : index
    %2 = vector.load %arg3[%c0_3, %c0_4] : memref<16x32xf32, #tpu.memory_space<vmem>>, vector<16x32xf32>
    %c0_5 = arith.constant 0 : index
    %c0_6 = arith.constant 0 : index
    %3 = vector.load %arg4[%c0_5, %c0_6] : memref<32x32xf32, #tpu.memory_space<vmem>>, vector<32x32xf32>
    %4 = arith.addf %1, %3 : vector<32x32xf32>
    %5 = tpu.iota {dimensions = array<i32: 0>} : vector<16x16xi32>
    %6 = tpu.iota {dimensions = array<i32: 1>} : vector<16x16xi32>
    %c1_i32 = arith.constant 1 : i32
    %7 = vector.broadcast %c1_i32 : i32 to vector<16x16xi32>
    %8 = arith.andi %5, %7 : vector<16x16xi32>
    %c1_i32_7 = arith.constant 1 : i32
    %9 = vector.broadcast %c1_i32_7 : i32 to vector<16x16xi32>
    %10 = arith.andi %6, %9 : vector<16x16xi32>
    %11 = arith.cmpi eq, %8, %10 : vector<16x16xi32>
    %12 = tpu.iota {dimensions = array<i32: 0>} : vector<16x32xi32>
    %13 = tpu.iota {dimensions = array<i32: 1>} : vector<16x32xi32>
    %c1_i32_8 = arith.constant 1 : i32
    %14 = vector.broadcast %c1_i32_8 : i32 to vector<16x32xi32>
    %15 = arith.andi %12, %14 : vector<16x32xi32>
    %c1_i32_9 = arith.constant 1 : i32
    %16 = vector.broadcast %c1_i32_9 : i32 to vector<16x32xi32>
    %17 = arith.andi %13, %16 : vector<16x32xi32>
    %18 = arith.cmpi eq, %15, %17 : vector<16x32xi32>
    %19 = arith.addf %0, %2 : vector<16x32xf32>
    %c0_10 = arith.constant 0 : index
    %c0_11 = arith.constant 0 : index
    %c0_12 = arith.constant 0 : index
    %20 = vector.load %arg5[%c0_10, %c0_11, %c0_12] : memref<4x33x128xf32, #tpu.memory_space<vmem>>, vector<1x33x128xf32>
    %21 = vector.shape_cast %20 : vector<1x33x128xf32> to vector<33x128xf32>
    %22 = vector.extract_strided_slice %21 {offsets = [0, 0], sizes = [32, 128], strides = [1, 1]} : vector<33x128xf32> to vector<32x128xf32>
    %23 = vector.extract_strided_slice %21 {offsets = [32, 0], sizes = [1, 128], strides = [1, 1]} : vector<33x128xf32> to vector<1x128xf32>
    %24 = vector.extract_strided_slice %22 {offsets = [0, 0], sizes = [32, 64], strides = [1, 1]} : vector<32x128xf32> to vector<32x64xf32>
    %cst = arith.constant dense<0.000000e+00> : vector<16x64xf32>
    %25 = tpu.matmul %19, %24, %cst {dimension_numbers = #tpu.dot_dimension_numbers<[1], [0], [0], [1], [0, 0, 1, 1], [], []>} : vector<16x32xf32>, vector<32x64xf32>, vector<16x64xf32> -> vector<16x64xf32>
    %26 = vector.extract_strided_slice %23 {offsets = [0, 0], sizes = [1, 64], strides = [1, 1]} : vector<1x128xf32> to vector<1x64xf32>
    %27 = vector.broadcast %26 : vector<1x64xf32> to vector<16x64xf32>
    %28 = arith.addf %25, %27 : vector<16x64xf32>
    %29 = vector.extract_strided_slice %28 {offsets = [0, 0], sizes = [16, 32], strides = [1, 1]} : vector<16x64xf32> to vector<16x32xf32>
    %30 = vector.extract_strided_slice %28 {offsets = [0, 32], sizes = [16, 32], strides = [1, 1]} : vector<16x64xf32> to vector<16x32xf32>
    %31 = vector.extract_strided_slice %22 {offsets = [0, 64], sizes = [32, 32], strides = [1, 1]} : vector<32x128xf32> to vector<32x32xf32>
    %cst_13 = arith.constant dense<0.000000e+00> : vector<16x32xf32>
    %32 = tpu.matmul %0, %31, %cst_13 {dimension_numbers = #tpu.dot_dimension_numbers<[1], [0], [0], [1], [0, 0, 1, 1], [], []>} : vector<16x32xf32>, vector<32x32xf32>, vector<16x32xf32> -> vector<16x32xf32>
    %33 = vector.extract_strided_slice %23 {offsets = [0, 64], sizes = [1, 32], strides = [1, 1]} : vector<1x128xf32> to vector<1x32xf32>
    %34 = vector.broadcast %33 : vector<1x32xf32> to vector<16x32xf32>
    %35 = arith.addf %32, %34 : vector<16x32xf32>
    %cst_14 = arith.constant 0.353553385 : f32
    %36 = vector.broadcast %cst_14 : f32 to vector<16x32xf32>
    %37 = arith.mulf %29, %36 : vector<16x32xf32>
    %38 = vector.extract_strided_slice %37 {offsets = [0, 0], sizes = [16, 8], strides = [1, 1]} : vector<16x32xf32> to vector<16x8xf32>
    %39 = vector.extract_strided_slice %37 {offsets = [0, 8], sizes = [16, 8], strides = [1, 1]} : vector<16x32xf32> to vector<16x8xf32>
    %40 = vector.extract_strided_slice %37 {offsets = [0, 16], sizes = [16, 8], strides = [1, 1]} : vector<16x32xf32> to vector<16x8xf32>
    %41 = vector.extract_strided_slice %37 {offsets = [0, 24], sizes = [16, 8], strides = [1, 1]} : vector<16x32xf32> to vector<16x8xf32>
    %42 = vector.shape_cast %38 : vector<16x8xf32> to vector<1x16x8xf32>
    %43 = vector.shape_cast %39 : vector<16x8xf32> to vector<1x16x8xf32>
    %44 = vector.shape_cast %40 : vector<16x8xf32> to vector<1x16x8xf32>
    %45 = vector.shape_cast %41 : vector<16x8xf32> to vector<1x16x8xf32>
    %46 = tpu.concatenate %42, %43, %44, %45 in 0 : vector<1x16x8xf32>, vector<1x16x8xf32>, vector<1x16x8xf32>, vector<1x16x8xf32> -> vector<4x16x8xf32>
    %47 = vector.extract_strided_slice %30 {offsets = [0, 0], sizes = [16, 8], strides = [1, 1]} : vector<16x32xf32> to vector<16x8xf32>
    %48 = vector.extract_strided_slice %30 {offsets = [0, 8], sizes = [16, 8], strides = [1, 1]} : vector<16x32xf32> to vector<16x8xf32>
    %49 = vector.extract_strided_slice %30 {offsets = [0, 16], sizes = [16, 8], strides = [1, 1]} : vector<16x32xf32> to vector<16x8xf32>
    %50 = vector.extract_strided_slice %30 {offsets = [0, 24], sizes = [16, 8], strides = [1, 1]} : vector<16x32xf32> to vector<16x8xf32>
    %51 = vector.shape_cast %47 : vector<16x8xf32> to vector<1x16x8xf32>
    %52 = vector.shape_cast %48 : vector<16x8xf32> to vector<1x16x8xf32>
    %53 = vector.shape_cast %49 : vector<16x8xf32> to vector<1x16x8xf32>
    %54 = vector.shape_cast %50 : vector<16x8xf32> to vector<1x16x8xf32>
    %55 = tpu.concatenate %51, %52, %53, %54 in 0 : vector<1x16x8xf32>, vector<1x16x8xf32>, vector<1x16x8xf32>, vector<1x16x8xf32> -> vector<4x16x8xf32>
    %56 = vector.extract_strided_slice %35 {offsets = [0, 0], sizes = [16, 8], strides = [1, 1]} : vector<16x32xf32> to vector<16x8xf32>
    %57 = vector.extract_strided_slice %35 {offsets = [0, 8], sizes = [16, 8], strides = [1, 1]} : vector<16x32xf32> to vector<16x8xf32>
    %58 = vector.extract_strided_slice %35 {offsets = [0, 16], sizes = [16, 8], strides = [1, 1]} : vector<16x32xf32> to vector<16x8xf32>
    %59 = vector.extract_strided_slice %35 {offsets = [0, 24], sizes = [16, 8], strides = [1, 1]} : vector<16x32xf32> to vector<16x8xf32>
    %60 = vector.shape_cast %56 : vector<16x8xf32> to vector<1x16x8xf32>
    %61 = vector.shape_cast %57 : vector<16x8xf32> to vector<1x16x8xf32>
    %62 = vector.shape_cast %58 : vector<16x8xf32> to vector<1x16x8xf32>
    %63 = vector.shape_cast %59 : vector<16x8xf32> to vector<1x16x8xf32>
    %64 = tpu.concatenate %60, %61, %62, %63 in 0 : vector<1x16x8xf32>, vector<1x16x8xf32>, vector<1x16x8xf32>, vector<1x16x8xf32> -> vector<4x16x8xf32>
    "tpu.trace_start"() <{level = 10 : i32, message = "hqd,hkd->hqk"}> : () -> ()
    %cst_15 = arith.constant dense<0.000000e+00> : vector<4x16x16xf32>
    %65 = tpu.matmul %46, %55, %cst_15 {dimension_numbers = #tpu.dot_dimension_numbers<[2], [2], [1], [1], [0, 0, 0, 1, 1, 1], [0], [0]>} : vector<4x16x8xf32>, vector<4x16x8xf32>, vector<4x16x16xf32> -> vector<4x16x16xf32>
    "tpu.trace_stop"() : () -> ()
    %66 = vector.shape_cast %11 : vector<16x16xi1> to vector<1x16x16xi1>
    %cst_16 = arith.constant -1.000000e+30 : f32
    %67 = vector.shape_cast %66 : vector<1x16x16xi1> to vector<1x16x16xi1>
    %68 = vector.broadcast %67 : vector<1x16x16xi1> to vector<4x16x16xi1>
    %69 = vector.broadcast %cst_16 : f32 to vector<4x16x16xf32>
    %70 = arith.select %68, %65, %69 : vector<4x16x16xi1>, vector<4x16x16xf32>
    %cst_17 = arith.constant dense<0xFF800000> : vector<4x16xf32>
    %71 = vector.multi_reduction <maximumf>, %70, %cst_17 [2] : vector<4x16x16xf32> to vector<4x16xf32>
    %72 = vector.shape_cast %71 : vector<4x16xf32> to vector<4x16x1xf32>
    %73 = vector.broadcast %72 : vector<4x16x1xf32> to vector<4x16x16xf32>
    %74 = arith.subf %70, %73 : vector<4x16x16xf32>
    %75 = math.exp %74 : vector<4x16x16xf32>
    %cst_18 = arith.constant dense<0.000000e+00> : vector<4x16xf32>
    %76 = vector.multi_reduction <add>, %75, %cst_18 [2] : vector<4x16x16xf32> to vector<4x16xf32>
    %77 = vector.shape_cast %76 : vector<4x16xf32> to vector<4x16x1xf32>
    %78 = vector.broadcast %77 : vector<4x16x1xf32> to vector<4x16x16xf32>
    %79 = arith.divf %75, %78 : vector<4x16x16xf32>
    "tpu.trace_start"() <{level = 10 : i32, message = "hqk,hkd->hqd"}> : () -> ()
    %cst_19 = arith.constant dense<0.000000e+00> : vector<4x16x8xf32>
    %80 = tpu.matmul %79, %64, %cst_19 {dimension_numbers = #tpu.dot_dimension_numbers<[2], [1], [1], [2], [0, 0, 0, 1, 1, 2], [0], [0]>} : vector<4x16x16xf32>, vector<4x16x8xf32>, vector<4x16x8xf32> -> vector<4x16x8xf32>
    "tpu.trace_stop"() : () -> ()
    %81 = vector.extract_strided_slice %80 {offsets = [0, 0, 0], sizes = [1, 16, 8], strides = [1, 1, 1]} : vector<4x16x8xf32> to vector<1x16x8xf32>
    %82 = vector.shape_cast %81 : vector<1x16x8xf32> to vector<16x8xf32>
    %83 = vector.extract_strided_slice %80 {offsets = [1, 0, 0], sizes = [1, 16, 8], strides = [1, 1, 1]} : vector<4x16x8xf32> to vector<1x16x8xf32>
    %84 = vector.shape_cast %83 : vector<1x16x8xf32> to vector<16x8xf32>
    %85 = vector.extract_strided_slice %80 {offsets = [2, 0, 0], sizes = [1, 16, 8], strides = [1, 1, 1]} : vector<4x16x8xf32> to vector<1x16x8xf32>
    %86 = vector.shape_cast %85 : vector<1x16x8xf32> to vector<16x8xf32>
    %87 = vector.extract_strided_slice %80 {offsets = [3, 0, 0], sizes = [1, 16, 8], strides = [1, 1, 1]} : vector<4x16x8xf32> to vector<1x16x8xf32>
    %88 = vector.shape_cast %87 : vector<1x16x8xf32> to vector<16x8xf32>
    %89 = tpu.concatenate %82, %84, %86, %88 in 1 : vector<16x8xf32>, vector<16x8xf32>, vector<16x8xf32>, vector<16x8xf32> -> vector<16x32xf32>
    %90 = vector.extract_strided_slice %22 {offsets = [0, 96], sizes = [32, 32], strides = [1, 1]} : vector<32x128xf32> to vector<32x32xf32>
    %cst_20 = arith.constant dense<0.000000e+00> : vector<16x32xf32>
    %91 = tpu.matmul %89, %90, %cst_20 {dimension_numbers = #tpu.dot_dimension_numbers<[1], [0], [0], [1], [0, 0, 1, 1], [], []>} : vector<16x32xf32>, vector<32x32xf32>, vector<16x32xf32> -> vector<16x32xf32>
    %92 = vector.extract_strided_slice %23 {offsets = [0, 96], sizes = [1, 32], strides = [1, 1]} : vector<1x128xf32> to vector<1x32xf32>
    %93 = vector.broadcast %92 : vector<1x32xf32> to vector<16x32xf32>
    %94 = arith.addf %91, %93 : vector<16x32xf32>
    %95 = arith.addf %0, %94 : vector<16x32xf32>
    %c0_21 = arith.constant 0 : index
    %c0_22 = arith.constant 0 : index
    %c0_23 = arith.constant 0 : index
    %96 = vector.load %arg8[%c0_21, %c0_22, %c0_23] : memref<7x2x32xf32, #tpu.memory_space<vmem>>, vector<1x2x32xf32>
    %97 = vector.shape_cast %96 : vector<1x2x32xf32> to vector<2x32xf32>
    %cst_24 = arith.constant dense<0.000000e+00> : vector<16xf32>
    %98 = vector.multi_reduction <add>, %95, %cst_24 [1] : vector<16x32xf32> to vector<16xf32>
    %99 = vector.shape_cast %98 : vector<16xf32> to vector<16x1xf32>
    %cst_25 = arith.constant 3.200000e+01 : f32
    %100 = vector.broadcast %cst_25 : f32 to vector<16x1xf32>
    %101 = arith.divf %99, %100 : vector<16x1xf32>
    %102 = vector.broadcast %101 : vector<16x1xf32> to vector<16x32xf32>
    %103 = arith.subf %95, %102 : vector<16x32xf32>
    %104 = arith.mulf %103, %103 : vector<16x32xf32>
    %cst_26 = arith.constant dense<0.000000e+00> : vector<16xf32>
    %105 = vector.multi_reduction <add>, %104, %cst_26 [1] : vector<16x32xf32> to vector<16xf32>
    %106 = vector.shape_cast %105 : vector<16xf32> to vector<16x1xf32>
    %cst_27 = arith.constant 3.200000e+01 : f32
    %107 = vector.broadcast %cst_27 : f32 to vector<16x1xf32>
    %108 = arith.divf %106, %107 : vector<16x1xf32>
    %109 = vector.broadcast %101 : vector<16x1xf32> to vector<16x32xf32>
    %110 = arith.subf %95, %109 : vector<16x32xf32>
    %cst_28 = arith.constant 9.99999974E-6 : f32
    %111 = vector.broadcast %cst_28 : f32 to vector<16x1xf32>
    %112 = arith.addf %108, %111 : vector<16x1xf32>
    %113 = math.rsqrt %112 : vector<16x1xf32>
    %114 = vector.broadcast %113 : vector<16x1xf32> to vector<16x32xf32>
    %115 = arith.mulf %110, %114 : vector<16x32xf32>
    %116 = vector.extract_strided_slice %97 {offsets = [0, 0], sizes = [1, 32], strides = [1, 1]} : vector<2x32xf32> to vector<1x32xf32>
    %117 = vector.broadcast %116 : vector<1x32xf32> to vector<16x32xf32>
    %118 = arith.mulf %115, %117 : vector<16x32xf32>
    %119 = vector.extract_strided_slice %97 {offsets = [1, 0], sizes = [1, 32], strides = [1, 1]} : vector<2x32xf32> to vector<1x32xf32>
    %120 = vector.broadcast %119 : vector<1x32xf32> to vector<16x32xf32>
    %121 = arith.addf %118, %120 : vector<16x32xf32>
    %122 = arith.addf %121, %2 : vector<16x32xf32>
    %c1 = arith.constant 1 : index
    %c0_29 = arith.constant 0 : index
    %c0_30 = arith.constant 0 : index
    %123 = vector.load %arg5[%c1, %c0_29, %c0_30] : memref<4x33x128xf32, #tpu.memory_space<vmem>>, vector<1x33x128xf32>
    %124 = vector.shape_cast %123 : vector<1x33x128xf32> to vector<33x128xf32>
    %125 = vector.extract_strided_slice %124 {offsets = [0, 0], sizes = [32, 128], strides = [1, 1]} : vector<33x128xf32> to vector<32x128xf32>
    %126 = vector.extract_strided_slice %124 {offsets = [32, 0], sizes = [1, 128], strides = [1, 1]} : vector<33x128xf32> to vector<1x128xf32>
    %127 = vector.extract_strided_slice %125 {offsets = [0, 0], sizes = [32, 32], strides = [1, 1]} : vector<32x128xf32> to vector<32x32xf32>
    %cst_31 = arith.constant dense<0.000000e+00> : vector<16x32xf32>
    %128 = tpu.matmul %122, %127, %cst_31 {dimension_numbers = #tpu.dot_dimension_numbers<[1], [0], [0], [1], [0, 0, 1, 1], [], []>} : vector<16x32xf32>, vector<32x32xf32>, vector<16x32xf32> -> vector<16x32xf32>
    %129 = vector.extract_strided_slice %126 {offsets = [0, 0], sizes = [1, 32], strides = [1, 1]} : vector<1x128xf32> to vector<1x32xf32>
    %130 = vector.broadcast %129 : vector<1x32xf32> to vector<16x32xf32>
    %131 = arith.addf %128, %130 : vector<16x32xf32>
    %132 = vector.extract_strided_slice %125 {offsets = [0, 32], sizes = [32, 32], strides = [1, 1]} : vector<32x128xf32> to vector<32x32xf32>
    %cst_32 = arith.constant dense<0.000000e+00> : vector<32x32xf32>
    %133 = tpu.matmul %4, %132, %cst_32 {dimension_numbers = #tpu.dot_dimension_numbers<[1], [0], [0], [1], [0, 0, 1, 1], [], []>} : vector<32x32xf32>, vector<32x32xf32>, vector<32x32xf32> -> vector<32x32xf32>
    %134 = vector.extract_strided_slice %126 {offsets = [0, 32], sizes = [1, 32], strides = [1, 1]} : vector<1x128xf32> to vector<1x32xf32>
    %135 = vector.broadcast %134 : vector<1x32xf32> to vector<32x32xf32>
    %136 = arith.addf %133, %135 : vector<32x32xf32>
    %137 = vector.extract_strided_slice %125 {offsets = [0, 64], sizes = [32, 32], strides = [1, 1]} : vector<32x128xf32> to vector<32x32xf32>
    %cst_33 = arith.constant dense<0.000000e+00> : vector<32x32xf32>
    %138 = tpu.matmul %1, %137, %cst_33 {dimension_numbers = #tpu.dot_dimension_numbers<[1], [0], [0], [1], [0, 0, 1, 1], [], []>} : vector<32x32xf32>, vector<32x32xf32>, vector<32x32xf32> -> vector<32x32xf32>
    %139 = vector.extract_strided_slice %126 {offsets = [0, 64], sizes = [1, 32], strides = [1, 1]} : vector<1x128xf32> to vector<1x32xf32>
    %140 = vector.broadcast %139 : vector<1x32xf32> to vector<32x32xf32>
    %141 = arith.addf %138, %140 : vector<32x32xf32>
    %cst_34 = arith.constant 0.353553385 : f32
    %142 = vector.broadcast %cst_34 : f32 to vector<16x32xf32>
    %143 = arith.mulf %131, %142 : vector<16x32xf32>
    %144 = vector.extract_strided_slice %143 {offsets = [0, 0], sizes = [16, 8], strides = [1, 1]} : vector<16x32xf32> to vector<16x8xf32>
    %145 = vector.extract_strided_slice %143 {offsets = [0, 8], sizes = [16, 8], strides = [1, 1]} : vector<16x32xf32> to vector<16x8xf32>
    %146 = vector.extract_strided_slice %143 {offsets = [0, 16], sizes = [16, 8], strides = [1, 1]} : vector<16x32xf32> to vector<16x8xf32>
    %147 = vector.extract_strided_slice %143 {offsets = [0, 24], sizes = [16, 8], strides = [1, 1]} : vector<16x32xf32> to vector<16x8xf32>
    %148 = vector.shape_cast %144 : vector<16x8xf32> to vector<1x16x8xf32>
    %149 = vector.shape_cast %145 : vector<16x8xf32> to vector<1x16x8xf32>
    %150 = vector.shape_cast %146 : vector<16x8xf32> to vector<1x16x8xf32>
    %151 = vector.shape_cast %147 : vector<16x8xf32> to vector<1x16x8xf32>
    %152 = tpu.concatenate %148, %149, %150, %151 in 0 : vector<1x16x8xf32>, vector<1x16x8xf32>, vector<1x16x8xf32>, vector<1x16x8xf32> -> vector<4x16x8xf32>
    %153 = vector.extract_strided_slice %136 {offsets = [0, 0], sizes = [32, 8], strides = [1, 1]} : vector<32x32xf32> to vector<32x8xf32>
    %154 = vector.extract_strided_slice %136 {offsets = [0, 8], sizes = [32, 8], strides = [1, 1]} : vector<32x32xf32> to vector<32x8xf32>
    %155 = vector.extract_strided_slice %136 {offsets = [0, 16], sizes = [32, 8], strides = [1, 1]} : vector<32x32xf32> to vector<32x8xf32>
    %156 = vector.extract_strided_slice %136 {offsets = [0, 24], sizes = [32, 8], strides = [1, 1]} : vector<32x32xf32> to vector<32x8xf32>
    %157 = vector.shape_cast %153 : vector<32x8xf32> to vector<1x32x8xf32>
    %158 = vector.shape_cast %154 : vector<32x8xf32> to vector<1x32x8xf32>
    %159 = vector.shape_cast %155 : vector<32x8xf32> to vector<1x32x8xf32>
    %160 = vector.shape_cast %156 : vector<32x8xf32> to vector<1x32x8xf32>
    %161 = tpu.concatenate %157, %158, %159, %160 in 0 : vector<1x32x8xf32>, vector<1x32x8xf32>, vector<1x32x8xf32>, vector<1x32x8xf32> -> vector<4x32x8xf32>
    %162 = vector.extract_strided_slice %141 {offsets = [0, 0], sizes = [32, 8], strides = [1, 1]} : vector<32x32xf32> to vector<32x8xf32>
    %163 = vector.extract_strided_slice %141 {offsets = [0, 8], sizes = [32, 8], strides = [1, 1]} : vector<32x32xf32> to vector<32x8xf32>
    %164 = vector.extract_strided_slice %141 {offsets = [0, 16], sizes = [32, 8], strides = [1, 1]} : vector<32x32xf32> to vector<32x8xf32>
    %165 = vector.extract_strided_slice %141 {offsets = [0, 24], sizes = [32, 8], strides = [1, 1]} : vector<32x32xf32> to vector<32x8xf32>
    %166 = vector.shape_cast %162 : vector<32x8xf32> to vector<1x32x8xf32>
    %167 = vector.shape_cast %163 : vector<32x8xf32> to vector<1x32x8xf32>
    %168 = vector.shape_cast %164 : vector<32x8xf32> to vector<1x32x8xf32>
    %169 = vector.shape_cast %165 : vector<32x8xf32> to vector<1x32x8xf32>
    %170 = tpu.concatenate %166, %167, %168, %169 in 0 : vector<1x32x8xf32>, vector<1x32x8xf32>, vector<1x32x8xf32>, vector<1x32x8xf32> -> vector<4x32x8xf32>
    "tpu.trace_start"() <{level = 10 : i32, message = "hqd,hkd->hqk"}> : () -> ()
    %cst_35 = arith.constant dense<0.000000e+00> : vector<4x16x32xf32>
    %171 = tpu.matmul %152, %161, %cst_35 {dimension_numbers = #tpu.dot_dimension_numbers<[2], [2], [1], [1], [0, 0, 0, 1, 1, 1], [0], [0]>} : vector<4x16x8xf32>, vector<4x32x8xf32>, vector<4x16x32xf32> -> vector<4x16x32xf32>
    "tpu.trace_stop"() : () -> ()
    %172 = vector.shape_cast %18 : vector<16x32xi1> to vector<1x16x32xi1>
    %cst_36 = arith.constant -1.000000e+30 : f32
    %173 = vector.shape_cast %172 : vector<1x16x32xi1> to vector<1x16x32xi1>
    %174 = vector.broadcast %173 : vector<1x16x32xi1> to vector<4x16x32xi1>
    %175 = vector.broadcast %cst_36 : f32 to vector<4x16x32xf32>
    %176 = arith.select %174, %171, %175 : vector<4x16x32xi1>, vector<4x16x32xf32>
    %cst_37 = arith.constant dense<0xFF800000> : vector<4x16xf32>
    %177 = vector.multi_reduction <maximumf>, %176, %cst_37 [2] : vector<4x16x32xf32> to vector<4x16xf32>
    %178 = vector.shape_cast %177 : vector<4x16xf32> to vector<4x16x1xf32>
    %179 = vector.broadcast %178 : vector<4x16x1xf32> to vector<4x16x32xf32>
    %180 = arith.subf %176, %179 : vector<4x16x32xf32>
    %181 = math.exp %180 : vector<4x16x32xf32>
    %cst_38 = arith.constant dense<0.000000e+00> : vector<4x16xf32>
    %182 = vector.multi_reduction <add>, %181, %cst_38 [2] : vector<4x16x32xf32> to vector<4x16xf32>
    %183 = vector.shape_cast %182 : vector<4x16xf32> to vector<4x16x1xf32>
    %184 = vector.broadcast %183 : vector<4x16x1xf32> to vector<4x16x32xf32>
    %185 = arith.divf %181, %184 : vector<4x16x32xf32>
    "tpu.trace_start"() <{level = 10 : i32, message = "hqk,hkd->hqd"}> : () -> ()
    %cst_39 = arith.constant dense<0.000000e+00> : vector<4x16x8xf32>
    %186 = tpu.matmul %185, %170, %cst_39 {dimension_numbers = #tpu.dot_dimension_numbers<[2], [1], [1], [2], [0, 0, 0, 1, 1, 2], [0], [0]>} : vector<4x16x32xf32>, vector<4x32x8xf32>, vector<4x16x8xf32> -> vector<4x16x8xf32>
    "tpu.trace_stop"() : () -> ()
    %187 = vector.extract_strided_slice %186 {offsets = [0, 0, 0], sizes = [1, 16, 8], strides = [1, 1, 1]} : vector<4x16x8xf32> to vector<1x16x8xf32>
    %188 = vector.shape_cast %187 : vector<1x16x8xf32> to vector<16x8xf32>
    %189 = vector.extract_strided_slice %186 {offsets = [1, 0, 0], sizes = [1, 16, 8], strides = [1, 1, 1]} : vector<4x16x8xf32> to vector<1x16x8xf32>
    %190 = vector.shape_cast %189 : vector<1x16x8xf32> to vector<16x8xf32>
    %191 = vector.extract_strided_slice %186 {offsets = [2, 0, 0], sizes = [1, 16, 8], strides = [1, 1, 1]} : vector<4x16x8xf32> to vector<1x16x8xf32>
    %192 = vector.shape_cast %191 : vector<1x16x8xf32> to vector<16x8xf32>
    %193 = vector.extract_strided_slice %186 {offsets = [3, 0, 0], sizes = [1, 16, 8], strides = [1, 1, 1]} : vector<4x16x8xf32> to vector<1x16x8xf32>
    %194 = vector.shape_cast %193 : vector<1x16x8xf32> to vector<16x8xf32>
    %195 = tpu.concatenate %188, %190, %192, %194 in 1 : vector<16x8xf32>, vector<16x8xf32>, vector<16x8xf32>, vector<16x8xf32> -> vector<16x32xf32>
    %196 = vector.extract_strided_slice %125 {offsets = [0, 96], sizes = [32, 32], strides = [1, 1]} : vector<32x128xf32> to vector<32x32xf32>
    %cst_40 = arith.constant dense<0.000000e+00> : vector<16x32xf32>
    %197 = tpu.matmul %195, %196, %cst_40 {dimension_numbers = #tpu.dot_dimension_numbers<[1], [0], [0], [1], [0, 0, 1, 1], [], []>} : vector<16x32xf32>, vector<32x32xf32>, vector<16x32xf32> -> vector<16x32xf32>
    %198 = vector.extract_strided_slice %126 {offsets = [0, 96], sizes = [1, 32], strides = [1, 1]} : vector<1x128xf32> to vector<1x32xf32>
    %199 = vector.broadcast %198 : vector<1x32xf32> to vector<16x32xf32>
    %200 = arith.addf %197, %199 : vector<16x32xf32>
    %201 = arith.addf %121, %200 : vector<16x32xf32>
    %c1_41 = arith.constant 1 : index
    %c0_42 = arith.constant 0 : index
    %c0_43 = arith.constant 0 : index
    %202 = vector.load %arg8[%c1_41, %c0_42, %c0_43] : memref<7x2x32xf32, #tpu.memory_space<vmem>>, vector<1x2x32xf32>
    %203 = vector.shape_cast %202 : vector<1x2x32xf32> to vector<2x32xf32>
    %cst_44 = arith.constant dense<0.000000e+00> : vector<16xf32>
    %204 = vector.multi_reduction <add>, %201, %cst_44 [1] : vector<16x32xf32> to vector<16xf32>
    %205 = vector.shape_cast %204 : vector<16xf32> to vector<16x1xf32>
    %cst_45 = arith.constant 3.200000e+01 : f32
    %206 = vector.broadcast %cst_45 : f32 to vector<16x1xf32>
    %207 = arith.divf %205, %206 : vector<16x1xf32>
    %208 = vector.broadcast %207 : vector<16x1xf32> to vector<16x32xf32>
    %209 = arith.subf %201, %208 : vector<16x32xf32>
    %210 = arith.mulf %209, %209 : vector<16x32xf32>
    %cst_46 = arith.constant dense<0.000000e+00> : vector<16xf32>
    %211 = vector.multi_reduction <add>, %210, %cst_46 [1] : vector<16x32xf32> to vector<16xf32>
    %212 = vector.shape_cast %211 : vector<16xf32> to vector<16x1xf32>
    %cst_47 = arith.constant 3.200000e+01 : f32
    %213 = vector.broadcast %cst_47 : f32 to vector<16x1xf32>
    %214 = arith.divf %212, %213 : vector<16x1xf32>
    %215 = vector.broadcast %207 : vector<16x1xf32> to vector<16x32xf32>
    %216 = arith.subf %201, %215 : vector<16x32xf32>
    %cst_48 = arith.constant 9.99999974E-6 : f32
    %217 = vector.broadcast %cst_48 : f32 to vector<16x1xf32>
    %218 = arith.addf %214, %217 : vector<16x1xf32>
    %219 = math.rsqrt %218 : vector<16x1xf32>
    %220 = vector.broadcast %219 : vector<16x1xf32> to vector<16x32xf32>
    %221 = arith.mulf %216, %220 : vector<16x32xf32>
    %222 = vector.extract_strided_slice %203 {offsets = [0, 0], sizes = [1, 32], strides = [1, 1]} : vector<2x32xf32> to vector<1x32xf32>
    %223 = vector.broadcast %222 : vector<1x32xf32> to vector<16x32xf32>
    %224 = arith.mulf %221, %223 : vector<16x32xf32>
    %225 = vector.extract_strided_slice %203 {offsets = [1, 0], sizes = [1, 32], strides = [1, 1]} : vector<2x32xf32> to vector<1x32xf32>
    %226 = vector.broadcast %225 : vector<1x32xf32> to vector<16x32xf32>
    %227 = arith.addf %224, %226 : vector<16x32xf32>
    %c0_49 = arith.constant 0 : index
    %c0_50 = arith.constant 0 : index
    %c0_51 = arith.constant 0 : index
    %228 = vector.load %arg6[%c0_49, %c0_50, %c0_51] : memref<2x33x64xf32, #tpu.memory_space<vmem>>, vector<1x33x64xf32>
    %229 = vector.shape_cast %228 : vector<1x33x64xf32> to vector<33x64xf32>
    %c0_52 = arith.constant 0 : index
    %c0_53 = arith.constant 0 : index
    %c0_54 = arith.constant 0 : index
    %230 = vector.load %arg7[%c0_52, %c0_53, %c0_54] : memref<2x65x32xf32, #tpu.memory_space<vmem>>, vector<1x65x32xf32>
    %231 = vector.shape_cast %230 : vector<1x65x32xf32> to vector<65x32xf32>
    %232 = vector.extract_strided_slice %229 {offsets = [0, 0], sizes = [32, 64], strides = [1, 1]} : vector<33x64xf32> to vector<32x64xf32>
    %cst_55 = arith.constant dense<0.000000e+00> : vector<16x64xf32>
    %233 = tpu.matmul %227, %232, %cst_55 {dimension_numbers = #tpu.dot_dimension_numbers<[1], [0], [0], [1], [0, 0, 1, 1], [], []>} : vector<16x32xf32>, vector<32x64xf32>, vector<16x64xf32> -> vector<16x64xf32>
    %234 = vector.extract_strided_slice %229 {offsets = [32, 0], sizes = [1, 64], strides = [1, 1]} : vector<33x64xf32> to vector<1x64xf32>
    %235 = vector.broadcast %234 : vector<1x64xf32> to vector<16x64xf32>
    %236 = arith.addf %233, %235 : vector<16x64xf32>
    %cst_56 = arith.constant 0.000000e+00 : f32
    %237 = vector.broadcast %cst_56 : f32 to vector<16x64xf32>
    %238 = arith.maximumf %236, %237 : vector<16x64xf32>
    %239 = vector.extract_strided_slice %231 {offsets = [0, 0], sizes = [64, 32], strides = [1, 1]} : vector<65x32xf32> to vector<64x32xf32>
    %cst_57 = arith.constant dense<0.000000e+00> : vector<16x32xf32>
    %240 = tpu.matmul %238, %239, %cst_57 {dimension_numbers = #tpu.dot_dimension_numbers<[1], [0], [0], [1], [0, 0, 1, 1], [], []>} : vector<16x64xf32>, vector<64x32xf32>, vector<16x32xf32> -> vector<16x32xf32>
    %241 = vector.extract_strided_slice %231 {offsets = [64, 0], sizes = [1, 32], strides = [1, 1]} : vector<65x32xf32> to vector<1x32xf32>
    %242 = vector.broadcast %241 : vector<1x32xf32> to vector<16x32xf32>
    %243 = arith.addf %240, %242 : vector<16x32xf32>
    %244 = arith.addf %227, %243 : vector<16x32xf32>
    %c2 = arith.constant 2 : index
    %c0_58 = arith.constant 0 : index
    %c0_59 = arith.constant 0 : index
    %245 = vector.load %arg8[%c2, %c0_58, %c0_59] : memref<7x2x32xf32, #tpu.memory_space<vmem>>, vector<1x2x32xf32>
    %246 = vector.shape_cast %245 : vector<1x2x32xf32> to vector<2x32xf32>
    %cst_60 = arith.constant dense<0.000000e+00> : vector<16xf32>
    %247 = vector.multi_reduction <add>, %244, %cst_60 [1] : vector<16x32xf32> to vector<16xf32>
    %248 = vector.shape_cast %247 : vector<16xf32> to vector<16x1xf32>
    %cst_61 = arith.constant 3.200000e+01 : f32
    %249 = vector.broadcast %cst_61 : f32 to vector<16x1xf32>
    %250 = arith.divf %248, %249 : vector<16x1xf32>
    %251 = vector.broadcast %250 : vector<16x1xf32> to vector<16x32xf32>
    %252 = arith.subf %244, %251 : vector<16x32xf32>
    %253 = arith.mulf %252, %252 : vector<16x32xf32>
    %cst_62 = arith.constant dense<0.000000e+00> : vector<16xf32>
    %254 = vector.multi_reduction <add>, %253, %cst_62 [1] : vector<16x32xf32> to vector<16xf32>
    %255 = vector.shape_cast %254 : vector<16xf32> to vector<16x1xf32>
    %cst_63 = arith.constant 3.200000e+01 : f32
    %256 = vector.broadcast %cst_63 : f32 to vector<16x1xf32>
    %257 = arith.divf %255, %256 : vector<16x1xf32>
    %258 = vector.broadcast %250 : vector<16x1xf32> to vector<16x32xf32>
    %259 = arith.subf %244, %258 : vector<16x32xf32>
    %cst_64 = arith.constant 9.99999974E-6 : f32
    %260 = vector.broadcast %cst_64 : f32 to vector<16x1xf32>
    %261 = arith.addf %257, %260 : vector<16x1xf32>
    %262 = math.rsqrt %261 : vector<16x1xf32>
    %263 = vector.broadcast %262 : vector<16x1xf32> to vector<16x32xf32>
    %264 = arith.mulf %259, %263 : vector<16x32xf32>
    %265 = vector.extract_strided_slice %246 {offsets = [0, 0], sizes = [1, 32], strides = [1, 1]} : vector<2x32xf32> to vector<1x32xf32>
    %266 = vector.broadcast %265 : vector<1x32xf32> to vector<16x32xf32>
    %267 = arith.mulf %264, %266 : vector<16x32xf32>
    %268 = vector.extract_strided_slice %246 {offsets = [1, 0], sizes = [1, 32], strides = [1, 1]} : vector<2x32xf32> to vector<1x32xf32>
    %269 = vector.broadcast %268 : vector<1x32xf32> to vector<16x32xf32>
    %270 = arith.addf %267, %269 : vector<16x32xf32>
    %271 = arith.addf %270, %2 : vector<16x32xf32>
    %c2_65 = arith.constant 2 : index
    %c0_66 = arith.constant 0 : index
    %c0_67 = arith.constant 0 : index
    %272 = vector.load %arg5[%c2_65, %c0_66, %c0_67] : memref<4x33x128xf32, #tpu.memory_space<vmem>>, vector<1x33x128xf32>
    %273 = vector.shape_cast %272 : vector<1x33x128xf32> to vector<33x128xf32>
    %274 = vector.extract_strided_slice %273 {offsets = [0, 0], sizes = [32, 128], strides = [1, 1]} : vector<33x128xf32> to vector<32x128xf32>
    %275 = vector.extract_strided_slice %273 {offsets = [32, 0], sizes = [1, 128], strides = [1, 1]} : vector<33x128xf32> to vector<1x128xf32>
    %276 = vector.extract_strided_slice %274 {offsets = [0, 0], sizes = [32, 64], strides = [1, 1]} : vector<32x128xf32> to vector<32x64xf32>
    %cst_68 = arith.constant dense<0.000000e+00> : vector<16x64xf32>
    %277 = tpu.matmul %271, %276, %cst_68 {dimension_numbers = #tpu.dot_dimension_numbers<[1], [0], [0], [1], [0, 0, 1, 1], [], []>} : vector<16x32xf32>, vector<32x64xf32>, vector<16x64xf32> -> vector<16x64xf32>
    %278 = vector.extract_strided_slice %275 {offsets = [0, 0], sizes = [1, 64], strides = [1, 1]} : vector<1x128xf32> to vector<1x64xf32>
    %279 = vector.broadcast %278 : vector<1x64xf32> to vector<16x64xf32>
    %280 = arith.addf %277, %279 : vector<16x64xf32>
    %281 = vector.extract_strided_slice %280 {offsets = [0, 0], sizes = [16, 32], strides = [1, 1]} : vector<16x64xf32> to vector<16x32xf32>
    %282 = vector.extract_strided_slice %280 {offsets = [0, 32], sizes = [16, 32], strides = [1, 1]} : vector<16x64xf32> to vector<16x32xf32>
    %283 = vector.extract_strided_slice %274 {offsets = [0, 64], sizes = [32, 32], strides = [1, 1]} : vector<32x128xf32> to vector<32x32xf32>
    %cst_69 = arith.constant dense<0.000000e+00> : vector<16x32xf32>
    %284 = tpu.matmul %270, %283, %cst_69 {dimension_numbers = #tpu.dot_dimension_numbers<[1], [0], [0], [1], [0, 0, 1, 1], [], []>} : vector<16x32xf32>, vector<32x32xf32>, vector<16x32xf32> -> vector<16x32xf32>
    %285 = vector.extract_strided_slice %275 {offsets = [0, 64], sizes = [1, 32], strides = [1, 1]} : vector<1x128xf32> to vector<1x32xf32>
    %286 = vector.broadcast %285 : vector<1x32xf32> to vector<16x32xf32>
    %287 = arith.addf %284, %286 : vector<16x32xf32>
    %cst_70 = arith.constant 0.353553385 : f32
    %288 = vector.broadcast %cst_70 : f32 to vector<16x32xf32>
    %289 = arith.mulf %281, %288 : vector<16x32xf32>
    %290 = vector.extract_strided_slice %289 {offsets = [0, 0], sizes = [16, 8], strides = [1, 1]} : vector<16x32xf32> to vector<16x8xf32>
    %291 = vector.extract_strided_slice %289 {offsets = [0, 8], sizes = [16, 8], strides = [1, 1]} : vector<16x32xf32> to vector<16x8xf32>
    %292 = vector.extract_strided_slice %289 {offsets = [0, 16], sizes = [16, 8], strides = [1, 1]} : vector<16x32xf32> to vector<16x8xf32>
    %293 = vector.extract_strided_slice %289 {offsets = [0, 24], sizes = [16, 8], strides = [1, 1]} : vector<16x32xf32> to vector<16x8xf32>
    %294 = vector.shape_cast %290 : vector<16x8xf32> to vector<1x16x8xf32>
    %295 = vector.shape_cast %291 : vector<16x8xf32> to vector<1x16x8xf32>
    %296 = vector.shape_cast %292 : vector<16x8xf32> to vector<1x16x8xf32>
    %297 = vector.shape_cast %293 : vector<16x8xf32> to vector<1x16x8xf32>
    %298 = tpu.concatenate %294, %295, %296, %297 in 0 : vector<1x16x8xf32>, vector<1x16x8xf32>, vector<1x16x8xf32>, vector<1x16x8xf32> -> vector<4x16x8xf32>
    %299 = vector.extract_strided_slice %282 {offsets = [0, 0], sizes = [16, 8], strides = [1, 1]} : vector<16x32xf32> to vector<16x8xf32>
    %300 = vector.extract_strided_slice %282 {offsets = [0, 8], sizes = [16, 8], strides = [1, 1]} : vector<16x32xf32> to vector<16x8xf32>
    %301 = vector.extract_strided_slice %282 {offsets = [0, 16], sizes = [16, 8], strides = [1, 1]} : vector<16x32xf32> to vector<16x8xf32>
    %302 = vector.extract_strided_slice %282 {offsets = [0, 24], sizes = [16, 8], strides = [1, 1]} : vector<16x32xf32> to vector<16x8xf32>
    %303 = vector.shape_cast %299 : vector<16x8xf32> to vector<1x16x8xf32>
    %304 = vector.shape_cast %300 : vector<16x8xf32> to vector<1x16x8xf32>
    %305 = vector.shape_cast %301 : vector<16x8xf32> to vector<1x16x8xf32>
    %306 = vector.shape_cast %302 : vector<16x8xf32> to vector<1x16x8xf32>
    %307 = tpu.concatenate %303, %304, %305, %306 in 0 : vector<1x16x8xf32>, vector<1x16x8xf32>, vector<1x16x8xf32>, vector<1x16x8xf32> -> vector<4x16x8xf32>
    %308 = vector.extract_strided_slice %287 {offsets = [0, 0], sizes = [16, 8], strides = [1, 1]} : vector<16x32xf32> to vector<16x8xf32>
    %309 = vector.extract_strided_slice %287 {offsets = [0, 8], sizes = [16, 8], strides = [1, 1]} : vector<16x32xf32> to vector<16x8xf32>
    %310 = vector.extract_strided_slice %287 {offsets = [0, 16], sizes = [16, 8], strides = [1, 1]} : vector<16x32xf32> to vector<16x8xf32>
    %311 = vector.extract_strided_slice %287 {offsets = [0, 24], sizes = [16, 8], strides = [1, 1]} : vector<16x32xf32> to vector<16x8xf32>
    %312 = vector.shape_cast %308 : vector<16x8xf32> to vector<1x16x8xf32>
    %313 = vector.shape_cast %309 : vector<16x8xf32> to vector<1x16x8xf32>
    %314 = vector.shape_cast %310 : vector<16x8xf32> to vector<1x16x8xf32>
    %315 = vector.shape_cast %311 : vector<16x8xf32> to vector<1x16x8xf32>
    %316 = tpu.concatenate %312, %313, %314, %315 in 0 : vector<1x16x8xf32>, vector<1x16x8xf32>, vector<1x16x8xf32>, vector<1x16x8xf32> -> vector<4x16x8xf32>
    "tpu.trace_start"() <{level = 10 : i32, message = "hqd,hkd->hqk"}> : () -> ()
    %cst_71 = arith.constant dense<0.000000e+00> : vector<4x16x16xf32>
    %317 = tpu.matmul %298, %307, %cst_71 {dimension_numbers = #tpu.dot_dimension_numbers<[2], [2], [1], [1], [0, 0, 0, 1, 1, 1], [0], [0]>} : vector<4x16x8xf32>, vector<4x16x8xf32>, vector<4x16x16xf32> -> vector<4x16x16xf32>
    "tpu.trace_stop"() : () -> ()
    %318 = vector.shape_cast %11 : vector<16x16xi1> to vector<1x16x16xi1>
    %cst_72 = arith.constant -1.000000e+30 : f32
    %319 = vector.shape_cast %318 : vector<1x16x16xi1> to vector<1x16x16xi1>
    %320 = vector.broadcast %319 : vector<1x16x16xi1> to vector<4x16x16xi1>
    %321 = vector.broadcast %cst_72 : f32 to vector<4x16x16xf32>
    %322 = arith.select %320, %317, %321 : vector<4x16x16xi1>, vector<4x16x16xf32>
    %cst_73 = arith.constant dense<0xFF800000> : vector<4x16xf32>
    %323 = vector.multi_reduction <maximumf>, %322, %cst_73 [2] : vector<4x16x16xf32> to vector<4x16xf32>
    %324 = vector.shape_cast %323 : vector<4x16xf32> to vector<4x16x1xf32>
    %325 = vector.broadcast %324 : vector<4x16x1xf32> to vector<4x16x16xf32>
    %326 = arith.subf %322, %325 : vector<4x16x16xf32>
    %327 = math.exp %326 : vector<4x16x16xf32>
    %cst_74 = arith.constant dense<0.000000e+00> : vector<4x16xf32>
    %328 = vector.multi_reduction <add>, %327, %cst_74 [2] : vector<4x16x16xf32> to vector<4x16xf32>
    %329 = vector.shape_cast %328 : vector<4x16xf32> to vector<4x16x1xf32>
    %330 = vector.broadcast %329 : vector<4x16x1xf32> to vector<4x16x16xf32>
    %331 = arith.divf %327, %330 : vector<4x16x16xf32>
    "tpu.trace_start"() <{level = 10 : i32, message = "hqk,hkd->hqd"}> : () -> ()
    %cst_75 = arith.constant dense<0.000000e+00> : vector<4x16x8xf32>
    %332 = tpu.matmul %331, %316, %cst_75 {dimension_numbers = #tpu.dot_dimension_numbers<[2], [1], [1], [2], [0, 0, 0, 1, 1, 2], [0], [0]>} : vector<4x16x16xf32>, vector<4x16x8xf32>, vector<4x16x8xf32> -> vector<4x16x8xf32>
    "tpu.trace_stop"() : () -> ()
    %333 = vector.extract_strided_slice %332 {offsets = [0, 0, 0], sizes = [1, 16, 8], strides = [1, 1, 1]} : vector<4x16x8xf32> to vector<1x16x8xf32>
    %334 = vector.shape_cast %333 : vector<1x16x8xf32> to vector<16x8xf32>
    %335 = vector.extract_strided_slice %332 {offsets = [1, 0, 0], sizes = [1, 16, 8], strides = [1, 1, 1]} : vector<4x16x8xf32> to vector<1x16x8xf32>
    %336 = vector.shape_cast %335 : vector<1x16x8xf32> to vector<16x8xf32>
    %337 = vector.extract_strided_slice %332 {offsets = [2, 0, 0], sizes = [1, 16, 8], strides = [1, 1, 1]} : vector<4x16x8xf32> to vector<1x16x8xf32>
    %338 = vector.shape_cast %337 : vector<1x16x8xf32> to vector<16x8xf32>
    %339 = vector.extract_strided_slice %332 {offsets = [3, 0, 0], sizes = [1, 16, 8], strides = [1, 1, 1]} : vector<4x16x8xf32> to vector<1x16x8xf32>
    %340 = vector.shape_cast %339 : vector<1x16x8xf32> to vector<16x8xf32>
    %341 = tpu.concatenate %334, %336, %338, %340 in 1 : vector<16x8xf32>, vector<16x8xf32>, vector<16x8xf32>, vector<16x8xf32> -> vector<16x32xf32>
    %342 = vector.extract_strided_slice %274 {offsets = [0, 96], sizes = [32, 32], strides = [1, 1]} : vector<32x128xf32> to vector<32x32xf32>
    %cst_76 = arith.constant dense<0.000000e+00> : vector<16x32xf32>
    %343 = tpu.matmul %341, %342, %cst_76 {dimension_numbers = #tpu.dot_dimension_numbers<[1], [0], [0], [1], [0, 0, 1, 1], [], []>} : vector<16x32xf32>, vector<32x32xf32>, vector<16x32xf32> -> vector<16x32xf32>
    %344 = vector.extract_strided_slice %275 {offsets = [0, 96], sizes = [1, 32], strides = [1, 1]} : vector<1x128xf32> to vector<1x32xf32>
    %345 = vector.broadcast %344 : vector<1x32xf32> to vector<16x32xf32>
    %346 = arith.addf %343, %345 : vector<16x32xf32>
    %347 = arith.addf %270, %346 : vector<16x32xf32>
    %c3 = arith.constant 3 : index
    %c0_77 = arith.constant 0 : index
    %c0_78 = arith.constant 0 : index
    %348 = vector.load %arg8[%c3, %c0_77, %c0_78] : memref<7x2x32xf32, #tpu.memory_space<vmem>>, vector<1x2x32xf32>
    %349 = vector.shape_cast %348 : vector<1x2x32xf32> to vector<2x32xf32>
    %cst_79 = arith.constant dense<0.000000e+00> : vector<16xf32>
    %350 = vector.multi_reduction <add>, %347, %cst_79 [1] : vector<16x32xf32> to vector<16xf32>
    %351 = vector.shape_cast %350 : vector<16xf32> to vector<16x1xf32>
    %cst_80 = arith.constant 3.200000e+01 : f32
    %352 = vector.broadcast %cst_80 : f32 to vector<16x1xf32>
    %353 = arith.divf %351, %352 : vector<16x1xf32>
    %354 = vector.broadcast %353 : vector<16x1xf32> to vector<16x32xf32>
    %355 = arith.subf %347, %354 : vector<16x32xf32>
    %356 = arith.mulf %355, %355 : vector<16x32xf32>
    %cst_81 = arith.constant dense<0.000000e+00> : vector<16xf32>
    %357 = vector.multi_reduction <add>, %356, %cst_81 [1] : vector<16x32xf32> to vector<16xf32>
    %358 = vector.shape_cast %357 : vector<16xf32> to vector<16x1xf32>
    %cst_82 = arith.constant 3.200000e+01 : f32
    %359 = vector.broadcast %cst_82 : f32 to vector<16x1xf32>
    %360 = arith.divf %358, %359 : vector<16x1xf32>
    %361 = vector.broadcast %353 : vector<16x1xf32> to vector<16x32xf32>
    %362 = arith.subf %347, %361 : vector<16x32xf32>
    %cst_83 = arith.constant 9.99999974E-6 : f32
    %363 = vector.broadcast %cst_83 : f32 to vector<16x1xf32>
    %364 = arith.addf %360, %363 : vector<16x1xf32>
    %365 = math.rsqrt %364 : vector<16x1xf32>
    %366 = vector.broadcast %365 : vector<16x1xf32> to vector<16x32xf32>
    %367 = arith.mulf %362, %366 : vector<16x32xf32>
    %368 = vector.extract_strided_slice %349 {offsets = [0, 0], sizes = [1, 32], strides = [1, 1]} : vector<2x32xf32> to vector<1x32xf32>
    %369 = vector.broadcast %368 : vector<1x32xf32> to vector<16x32xf32>
    %370 = arith.mulf %367, %369 : vector<16x32xf32>
    %371 = vector.extract_strided_slice %349 {offsets = [1, 0], sizes = [1, 32], strides = [1, 1]} : vector<2x32xf32> to vector<1x32xf32>
    %372 = vector.broadcast %371 : vector<1x32xf32> to vector<16x32xf32>
    %373 = arith.addf %370, %372 : vector<16x32xf32>
    %374 = arith.addf %373, %2 : vector<16x32xf32>
    %c3_84 = arith.constant 3 : index
    %c0_85 = arith.constant 0 : index
    %c0_86 = arith.constant 0 : index
    %375 = vector.load %arg5[%c3_84, %c0_85, %c0_86] : memref<4x33x128xf32, #tpu.memory_space<vmem>>, vector<1x33x128xf32>
    %376 = vector.shape_cast %375 : vector<1x33x128xf32> to vector<33x128xf32>
    %377 = vector.extract_strided_slice %376 {offsets = [0, 0], sizes = [32, 128], strides = [1, 1]} : vector<33x128xf32> to vector<32x128xf32>
    %378 = vector.extract_strided_slice %376 {offsets = [32, 0], sizes = [1, 128], strides = [1, 1]} : vector<33x128xf32> to vector<1x128xf32>
    %379 = vector.extract_strided_slice %377 {offsets = [0, 0], sizes = [32, 32], strides = [1, 1]} : vector<32x128xf32> to vector<32x32xf32>
    %cst_87 = arith.constant dense<0.000000e+00> : vector<16x32xf32>
    %380 = tpu.matmul %374, %379, %cst_87 {dimension_numbers = #tpu.dot_dimension_numbers<[1], [0], [0], [1], [0, 0, 1, 1], [], []>} : vector<16x32xf32>, vector<32x32xf32>, vector<16x32xf32> -> vector<16x32xf32>
    %381 = vector.extract_strided_slice %378 {offsets = [0, 0], sizes = [1, 32], strides = [1, 1]} : vector<1x128xf32> to vector<1x32xf32>
    %382 = vector.broadcast %381 : vector<1x32xf32> to vector<16x32xf32>
    %383 = arith.addf %380, %382 : vector<16x32xf32>
    %384 = vector.extract_strided_slice %377 {offsets = [0, 32], sizes = [32, 32], strides = [1, 1]} : vector<32x128xf32> to vector<32x32xf32>
    %cst_88 = arith.constant dense<0.000000e+00> : vector<32x32xf32>
    %385 = tpu.matmul %4, %384, %cst_88 {dimension_numbers = #tpu.dot_dimension_numbers<[1], [0], [0], [1], [0, 0, 1, 1], [], []>} : vector<32x32xf32>, vector<32x32xf32>, vector<32x32xf32> -> vector<32x32xf32>
    %386 = vector.extract_strided_slice %378 {offsets = [0, 32], sizes = [1, 32], strides = [1, 1]} : vector<1x128xf32> to vector<1x32xf32>
    %387 = vector.broadcast %386 : vector<1x32xf32> to vector<32x32xf32>
    %388 = arith.addf %385, %387 : vector<32x32xf32>
    %389 = vector.extract_strided_slice %377 {offsets = [0, 64], sizes = [32, 32], strides = [1, 1]} : vector<32x128xf32> to vector<32x32xf32>
    %cst_89 = arith.constant dense<0.000000e+00> : vector<32x32xf32>
    %390 = tpu.matmul %1, %389, %cst_89 {dimension_numbers = #tpu.dot_dimension_numbers<[1], [0], [0], [1], [0, 0, 1, 1], [], []>} : vector<32x32xf32>, vector<32x32xf32>, vector<32x32xf32> -> vector<32x32xf32>
    %391 = vector.extract_strided_slice %378 {offsets = [0, 64], sizes = [1, 32], strides = [1, 1]} : vector<1x128xf32> to vector<1x32xf32>
    %392 = vector.broadcast %391 : vector<1x32xf32> to vector<32x32xf32>
    %393 = arith.addf %390, %392 : vector<32x32xf32>
    %cst_90 = arith.constant 0.353553385 : f32
    %394 = vector.broadcast %cst_90 : f32 to vector<16x32xf32>
    %395 = arith.mulf %383, %394 : vector<16x32xf32>
    %396 = vector.extract_strided_slice %395 {offsets = [0, 0], sizes = [16, 8], strides = [1, 1]} : vector<16x32xf32> to vector<16x8xf32>
    %397 = vector.extract_strided_slice %395 {offsets = [0, 8], sizes = [16, 8], strides = [1, 1]} : vector<16x32xf32> to vector<16x8xf32>
    %398 = vector.extract_strided_slice %395 {offsets = [0, 16], sizes = [16, 8], strides = [1, 1]} : vector<16x32xf32> to vector<16x8xf32>
    %399 = vector.extract_strided_slice %395 {offsets = [0, 24], sizes = [16, 8], strides = [1, 1]} : vector<16x32xf32> to vector<16x8xf32>
    %400 = vector.shape_cast %396 : vector<16x8xf32> to vector<1x16x8xf32>
    %401 = vector.shape_cast %397 : vector<16x8xf32> to vector<1x16x8xf32>
    %402 = vector.shape_cast %398 : vector<16x8xf32> to vector<1x16x8xf32>
    %403 = vector.shape_cast %399 : vector<16x8xf32> to vector<1x16x8xf32>
    %404 = tpu.concatenate %400, %401, %402, %403 in 0 : vector<1x16x8xf32>, vector<1x16x8xf32>, vector<1x16x8xf32>, vector<1x16x8xf32> -> vector<4x16x8xf32>
    %405 = vector.extract_strided_slice %388 {offsets = [0, 0], sizes = [32, 8], strides = [1, 1]} : vector<32x32xf32> to vector<32x8xf32>
    %406 = vector.extract_strided_slice %388 {offsets = [0, 8], sizes = [32, 8], strides = [1, 1]} : vector<32x32xf32> to vector<32x8xf32>
    %407 = vector.extract_strided_slice %388 {offsets = [0, 16], sizes = [32, 8], strides = [1, 1]} : vector<32x32xf32> to vector<32x8xf32>
    %408 = vector.extract_strided_slice %388 {offsets = [0, 24], sizes = [32, 8], strides = [1, 1]} : vector<32x32xf32> to vector<32x8xf32>
    %409 = vector.shape_cast %405 : vector<32x8xf32> to vector<1x32x8xf32>
    %410 = vector.shape_cast %406 : vector<32x8xf32> to vector<1x32x8xf32>
    %411 = vector.shape_cast %407 : vector<32x8xf32> to vector<1x32x8xf32>
    %412 = vector.shape_cast %408 : vector<32x8xf32> to vector<1x32x8xf32>
    %413 = tpu.concatenate %409, %410, %411, %412 in 0 : vector<1x32x8xf32>, vector<1x32x8xf32>, vector<1x32x8xf32>, vector<1x32x8xf32> -> vector<4x32x8xf32>
    %414 = vector.extract_strided_slice %393 {offsets = [0, 0], sizes = [32, 8], strides = [1, 1]} : vector<32x32xf32> to vector<32x8xf32>
    %415 = vector.extract_strided_slice %393 {offsets = [0, 8], sizes = [32, 8], strides = [1, 1]} : vector<32x32xf32> to vector<32x8xf32>
    %416 = vector.extract_strided_slice %393 {offsets = [0, 16], sizes = [32, 8], strides = [1, 1]} : vector<32x32xf32> to vector<32x8xf32>
    %417 = vector.extract_strided_slice %393 {offsets = [0, 24], sizes = [32, 8], strides = [1, 1]} : vector<32x32xf32> to vector<32x8xf32>
    %418 = vector.shape_cast %414 : vector<32x8xf32> to vector<1x32x8xf32>
    %419 = vector.shape_cast %415 : vector<32x8xf32> to vector<1x32x8xf32>
    %420 = vector.shape_cast %416 : vector<32x8xf32> to vector<1x32x8xf32>
    %421 = vector.shape_cast %417 : vector<32x8xf32> to vector<1x32x8xf32>
    %422 = tpu.concatenate %418, %419, %420, %421 in 0 : vector<1x32x8xf32>, vector<1x32x8xf32>, vector<1x32x8xf32>, vector<1x32x8xf32> -> vector<4x32x8xf32>
    "tpu.trace_start"() <{level = 10 : i32, message = "hqd,hkd->hqk"}> : () -> ()
    %cst_91 = arith.constant dense<0.000000e+00> : vector<4x16x32xf32>
    %423 = tpu.matmul %404, %413, %cst_91 {dimension_numbers = #tpu.dot_dimension_numbers<[2], [2], [1], [1], [0, 0, 0, 1, 1, 1], [0], [0]>} : vector<4x16x8xf32>, vector<4x32x8xf32>, vector<4x16x32xf32> -> vector<4x16x32xf32>
    "tpu.trace_stop"() : () -> ()
    %424 = vector.shape_cast %18 : vector<16x32xi1> to vector<1x16x32xi1>
    %cst_92 = arith.constant -1.000000e+30 : f32
    %425 = vector.shape_cast %424 : vector<1x16x32xi1> to vector<1x16x32xi1>
    %426 = vector.broadcast %425 : vector<1x16x32xi1> to vector<4x16x32xi1>
    %427 = vector.broadcast %cst_92 : f32 to vector<4x16x32xf32>
    %428 = arith.select %426, %423, %427 : vector<4x16x32xi1>, vector<4x16x32xf32>
    %cst_93 = arith.constant dense<0xFF800000> : vector<4x16xf32>
    %429 = vector.multi_reduction <maximumf>, %428, %cst_93 [2] : vector<4x16x32xf32> to vector<4x16xf32>
    %430 = vector.shape_cast %429 : vector<4x16xf32> to vector<4x16x1xf32>
    %431 = vector.broadcast %430 : vector<4x16x1xf32> to vector<4x16x32xf32>
    %432 = arith.subf %428, %431 : vector<4x16x32xf32>
    %433 = math.exp %432 : vector<4x16x32xf32>
    %cst_94 = arith.constant dense<0.000000e+00> : vector<4x16xf32>
    %434 = vector.multi_reduction <add>, %433, %cst_94 [2] : vector<4x16x32xf32> to vector<4x16xf32>
    %435 = vector.shape_cast %434 : vector<4x16xf32> to vector<4x16x1xf32>
    %436 = vector.broadcast %435 : vector<4x16x1xf32> to vector<4x16x32xf32>
    %437 = arith.divf %433, %436 : vector<4x16x32xf32>
    "tpu.trace_start"() <{level = 10 : i32, message = "hqk,hkd->hqd"}> : () -> ()
    %cst_95 = arith.constant dense<0.000000e+00> : vector<4x16x8xf32>
    %438 = tpu.matmul %437, %422, %cst_95 {dimension_numbers = #tpu.dot_dimension_numbers<[2], [1], [1], [2], [0, 0, 0, 1, 1, 2], [0], [0]>} : vector<4x16x32xf32>, vector<4x32x8xf32>, vector<4x16x8xf32> -> vector<4x16x8xf32>
    "tpu.trace_stop"() : () -> ()
    %439 = vector.extract_strided_slice %438 {offsets = [0, 0, 0], sizes = [1, 16, 8], strides = [1, 1, 1]} : vector<4x16x8xf32> to vector<1x16x8xf32>
    %440 = vector.shape_cast %439 : vector<1x16x8xf32> to vector<16x8xf32>
    %441 = vector.extract_strided_slice %438 {offsets = [1, 0, 0], sizes = [1, 16, 8], strides = [1, 1, 1]} : vector<4x16x8xf32> to vector<1x16x8xf32>
    %442 = vector.shape_cast %441 : vector<1x16x8xf32> to vector<16x8xf32>
    %443 = vector.extract_strided_slice %438 {offsets = [2, 0, 0], sizes = [1, 16, 8], strides = [1, 1, 1]} : vector<4x16x8xf32> to vector<1x16x8xf32>
    %444 = vector.shape_cast %443 : vector<1x16x8xf32> to vector<16x8xf32>
    %445 = vector.extract_strided_slice %438 {offsets = [3, 0, 0], sizes = [1, 16, 8], strides = [1, 1, 1]} : vector<4x16x8xf32> to vector<1x16x8xf32>
    %446 = vector.shape_cast %445 : vector<1x16x8xf32> to vector<16x8xf32>
    %447 = tpu.concatenate %440, %442, %444, %446 in 1 : vector<16x8xf32>, vector<16x8xf32>, vector<16x8xf32>, vector<16x8xf32> -> vector<16x32xf32>
    %448 = vector.extract_strided_slice %377 {offsets = [0, 96], sizes = [32, 32], strides = [1, 1]} : vector<32x128xf32> to vector<32x32xf32>
    %cst_96 = arith.constant dense<0.000000e+00> : vector<16x32xf32>
    %449 = tpu.matmul %447, %448, %cst_96 {dimension_numbers = #tpu.dot_dimension_numbers<[1], [0], [0], [1], [0, 0, 1, 1], [], []>} : vector<16x32xf32>, vector<32x32xf32>, vector<16x32xf32> -> vector<16x32xf32>
    %450 = vector.extract_strided_slice %378 {offsets = [0, 96], sizes = [1, 32], strides = [1, 1]} : vector<1x128xf32> to vector<1x32xf32>
    %451 = vector.broadcast %450 : vector<1x32xf32> to vector<16x32xf32>
    %452 = arith.addf %449, %451 : vector<16x32xf32>
    %453 = arith.addf %373, %452 : vector<16x32xf32>
    %c4 = arith.constant 4 : index
    %c0_97 = arith.constant 0 : index
    %c0_98 = arith.constant 0 : index
    %454 = vector.load %arg8[%c4, %c0_97, %c0_98] : memref<7x2x32xf32, #tpu.memory_space<vmem>>, vector<1x2x32xf32>
    %455 = vector.shape_cast %454 : vector<1x2x32xf32> to vector<2x32xf32>
    %cst_99 = arith.constant dense<0.000000e+00> : vector<16xf32>
    %456 = vector.multi_reduction <add>, %453, %cst_99 [1] : vector<16x32xf32> to vector<16xf32>
    %457 = vector.shape_cast %456 : vector<16xf32> to vector<16x1xf32>
    %cst_100 = arith.constant 3.200000e+01 : f32
    %458 = vector.broadcast %cst_100 : f32 to vector<16x1xf32>
    %459 = arith.divf %457, %458 : vector<16x1xf32>
    %460 = vector.broadcast %459 : vector<16x1xf32> to vector<16x32xf32>
    %461 = arith.subf %453, %460 : vector<16x32xf32>
    %462 = arith.mulf %461, %461 : vector<16x32xf32>
    %cst_101 = arith.constant dense<0.000000e+00> : vector<16xf32>
    %463 = vector.multi_reduction <add>, %462, %cst_101 [1] : vector<16x32xf32> to vector<16xf32>
    %464 = vector.shape_cast %463 : vector<16xf32> to vector<16x1xf32>
    %cst_102 = arith.constant 3.200000e+01 : f32
    %465 = vector.broadcast %cst_102 : f32 to vector<16x1xf32>
    %466 = arith.divf %464, %465 : vector<16x1xf32>
    %467 = vector.broadcast %459 : vector<16x1xf32> to vector<16x32xf32>
    %468 = arith.subf %453, %467 : vector<16x32xf32>
    %cst_103 = arith.constant 9.99999974E-6 : f32
    %469 = vector.broadcast %cst_103 : f32 to vector<16x1xf32>
    %470 = arith.addf %466, %469 : vector<16x1xf32>
    %471 = math.rsqrt %470 : vector<16x1xf32>
    %472 = vector.broadcast %471 : vector<16x1xf32> to vector<16x32xf32>
    %473 = arith.mulf %468, %472 : vector<16x32xf32>
    %474 = vector.extract_strided_slice %455 {offsets = [0, 0], sizes = [1, 32], strides = [1, 1]} : vector<2x32xf32> to vector<1x32xf32>
    %475 = vector.broadcast %474 : vector<1x32xf32> to vector<16x32xf32>
    %476 = arith.mulf %473, %475 : vector<16x32xf32>
    %477 = vector.extract_strided_slice %455 {offsets = [1, 0], sizes = [1, 32], strides = [1, 1]} : vector<2x32xf32> to vector<1x32xf32>
    %478 = vector.broadcast %477 : vector<1x32xf32> to vector<16x32xf32>
    %479 = arith.addf %476, %478 : vector<16x32xf32>
    %c1_104 = arith.constant 1 : index
    %c0_105 = arith.constant 0 : index
    %c0_106 = arith.constant 0 : index
    %480 = vector.load %arg6[%c1_104, %c0_105, %c0_106] : memref<2x33x64xf32, #tpu.memory_space<vmem>>, vector<1x33x64xf32>
    %481 = vector.shape_cast %480 : vector<1x33x64xf32> to vector<33x64xf32>
    %c1_107 = arith.constant 1 : index
    %c0_108 = arith.constant 0 : index
    %c0_109 = arith.constant 0 : index
    %482 = vector.load %arg7[%c1_107, %c0_108, %c0_109] : memref<2x65x32xf32, #tpu.memory_space<vmem>>, vector<1x65x32xf32>
    %483 = vector.shape_cast %482 : vector<1x65x32xf32> to vector<65x32xf32>
    %484 = vector.extract_strided_slice %481 {offsets = [0, 0], sizes = [32, 64], strides = [1, 1]} : vector<33x64xf32> to vector<32x64xf32>
    %cst_110 = arith.constant dense<0.000000e+00> : vector<16x64xf32>
    %485 = tpu.matmul %479, %484, %cst_110 {dimension_numbers = #tpu.dot_dimension_numbers<[1], [0], [0], [1], [0, 0, 1, 1], [], []>} : vector<16x32xf32>, vector<32x64xf32>, vector<16x64xf32> -> vector<16x64xf32>
    %486 = vector.extract_strided_slice %481 {offsets = [32, 0], sizes = [1, 64], strides = [1, 1]} : vector<33x64xf32> to vector<1x64xf32>
    %487 = vector.broadcast %486 : vector<1x64xf32> to vector<16x64xf32>
    %488 = arith.addf %485, %487 : vector<16x64xf32>
    %cst_111 = arith.constant 0.000000e+00 : f32
    %489 = vector.broadcast %cst_111 : f32 to vector<16x64xf32>
    %490 = arith.maximumf %488, %489 : vector<16x64xf32>
    %491 = vector.extract_strided_slice %483 {offsets = [0, 0], sizes = [64, 32], strides = [1, 1]} : vector<65x32xf32> to vector<64x32xf32>
    %cst_112 = arith.constant dense<0.000000e+00> : vector<16x32xf32>
    %492 = tpu.matmul %490, %491, %cst_112 {dimension_numbers = #tpu.dot_dimension_numbers<[1], [0], [0], [1], [0, 0, 1, 1], [], []>} : vector<16x64xf32>, vector<64x32xf32>, vector<16x32xf32> -> vector<16x32xf32>
    %493 = vector.extract_strided_slice %483 {offsets = [64, 0], sizes = [1, 32], strides = [1, 1]} : vector<65x32xf32> to vector<1x32xf32>
    %494 = vector.broadcast %493 : vector<1x32xf32> to vector<16x32xf32>
    %495 = arith.addf %492, %494 : vector<16x32xf32>
    %496 = arith.addf %479, %495 : vector<16x32xf32>
    %c5 = arith.constant 5 : index
    %c0_113 = arith.constant 0 : index
    %c0_114 = arith.constant 0 : index
    %497 = vector.load %arg8[%c5, %c0_113, %c0_114] : memref<7x2x32xf32, #tpu.memory_space<vmem>>, vector<1x2x32xf32>
    %498 = vector.shape_cast %497 : vector<1x2x32xf32> to vector<2x32xf32>
    %cst_115 = arith.constant dense<0.000000e+00> : vector<16xf32>
    %499 = vector.multi_reduction <add>, %496, %cst_115 [1] : vector<16x32xf32> to vector<16xf32>
    %500 = vector.shape_cast %499 : vector<16xf32> to vector<16x1xf32>
    %cst_116 = arith.constant 3.200000e+01 : f32
    %501 = vector.broadcast %cst_116 : f32 to vector<16x1xf32>
    %502 = arith.divf %500, %501 : vector<16x1xf32>
    %503 = vector.broadcast %502 : vector<16x1xf32> to vector<16x32xf32>
    %504 = arith.subf %496, %503 : vector<16x32xf32>
    %505 = arith.mulf %504, %504 : vector<16x32xf32>
    %cst_117 = arith.constant dense<0.000000e+00> : vector<16xf32>
    %506 = vector.multi_reduction <add>, %505, %cst_117 [1] : vector<16x32xf32> to vector<16xf32>
    %507 = vector.shape_cast %506 : vector<16xf32> to vector<16x1xf32>
    %cst_118 = arith.constant 3.200000e+01 : f32
    %508 = vector.broadcast %cst_118 : f32 to vector<16x1xf32>
    %509 = arith.divf %507, %508 : vector<16x1xf32>
    %510 = vector.broadcast %502 : vector<16x1xf32> to vector<16x32xf32>
    %511 = arith.subf %496, %510 : vector<16x32xf32>
    %cst_119 = arith.constant 9.99999974E-6 : f32
    %512 = vector.broadcast %cst_119 : f32 to vector<16x1xf32>
    %513 = arith.addf %509, %512 : vector<16x1xf32>
    %514 = math.rsqrt %513 : vector<16x1xf32>
    %515 = vector.broadcast %514 : vector<16x1xf32> to vector<16x32xf32>
    %516 = arith.mulf %511, %515 : vector<16x32xf32>
    %517 = vector.extract_strided_slice %498 {offsets = [0, 0], sizes = [1, 32], strides = [1, 1]} : vector<2x32xf32> to vector<1x32xf32>
    %518 = vector.broadcast %517 : vector<1x32xf32> to vector<16x32xf32>
    %519 = arith.mulf %516, %518 : vector<16x32xf32>
    %520 = vector.extract_strided_slice %498 {offsets = [1, 0], sizes = [1, 32], strides = [1, 1]} : vector<2x32xf32> to vector<1x32xf32>
    %521 = vector.broadcast %520 : vector<1x32xf32> to vector<16x32xf32>
    %522 = arith.addf %519, %521 : vector<16x32xf32>
    %c6 = arith.constant 6 : index
    %c0_120 = arith.constant 0 : index
    %c0_121 = arith.constant 0 : index
    %523 = vector.load %arg8[%c6, %c0_120, %c0_121] : memref<7x2x32xf32, #tpu.memory_space<vmem>>, vector<1x2x32xf32>
    %524 = vector.shape_cast %523 : vector<1x2x32xf32> to vector<2x32xf32>
    %cst_122 = arith.constant dense<0.000000e+00> : vector<16xf32>
    %525 = vector.multi_reduction <add>, %522, %cst_122 [1] : vector<16x32xf32> to vector<16xf32>
    %526 = vector.shape_cast %525 : vector<16xf32> to vector<16x1xf32>
    %cst_123 = arith.constant 3.200000e+01 : f32
    %527 = vector.broadcast %cst_123 : f32 to vector<16x1xf32>
    %528 = arith.divf %526, %527 : vector<16x1xf32>
    %529 = vector.broadcast %528 : vector<16x1xf32> to vector<16x32xf32>
    %530 = arith.subf %522, %529 : vector<16x32xf32>
    %531 = arith.mulf %530, %530 : vector<16x32xf32>
    %cst_124 = arith.constant dense<0.000000e+00> : vector<16xf32>
    %532 = vector.multi_reduction <add>, %531, %cst_124 [1] : vector<16x32xf32> to vector<16xf32>
    %533 = vector.shape_cast %532 : vector<16xf32> to vector<16x1xf32>
    %cst_125 = arith.constant 3.200000e+01 : f32
    %534 = vector.broadcast %cst_125 : f32 to vector<16x1xf32>
    %535 = arith.divf %533, %534 : vector<16x1xf32>
    %536 = vector.broadcast %528 : vector<16x1xf32> to vector<16x32xf32>
    %537 = arith.subf %522, %536 : vector<16x32xf32>
    %cst_126 = arith.constant 9.99999974E-6 : f32
    %538 = vector.broadcast %cst_126 : f32 to vector<16x1xf32>
    %539 = arith.addf %535, %538 : vector<16x1xf32>
    %540 = math.rsqrt %539 : vector<16x1xf32>
    %541 = vector.broadcast %540 : vector<16x1xf32> to vector<16x32xf32>
    %542 = arith.mulf %537, %541 : vector<16x32xf32>
    %543 = vector.extract_strided_slice %524 {offsets = [0, 0], sizes = [1, 32], strides = [1, 1]} : vector<2x32xf32> to vector<1x32xf32>
    %544 = vector.broadcast %543 : vector<1x32xf32> to vector<16x32xf32>
    %545 = arith.mulf %542, %544 : vector<16x32xf32>
    %546 = vector.extract_strided_slice %524 {offsets = [1, 0], sizes = [1, 32], strides = [1, 1]} : vector<2x32xf32> to vector<1x32xf32>
    %547 = vector.broadcast %546 : vector<1x32xf32> to vector<16x32xf32>
    %548 = arith.addf %545, %547 : vector<16x32xf32>
    %c0_127 = arith.constant 0 : index
    %c0_128 = arith.constant 0 : index
    %549 = vector.load %arg9[%c0_127, %c0_128] : memref<16x32xf32, #tpu.memory_space<vmem>>, vector<16x32xf32>
    tpu.vector_store %arg9[%c0_127, %c0_128], %548 {strides = array<i32>} : memref<16x32xf32, #tpu.memory_space<vmem>>, vector<16x32xf32>,
    return
  }
  func.func @transform_0(%arg0: i32) -> (i32, i32) {
    %c0_i32 = arith.constant 0 : i32
    %c0_i32_0 = arith.constant 0 : i32
    %c0_i32_1 = arith.constant 0 : i32
    return %c0_i32, %c0_i32_0 : i32, i32
  }
  func.func @transform_1(%arg0: i32) -> (i32, i32) {
    %c0_i32 = arith.constant 0 : i32
    %c0_i32_0 = arith.constant 0 : i32
    %c0_i32_1 = arith.constant 0 : i32
    return %c0_i32, %c0_i32_0 : i32, i32
  }
  func.func @transform_2(%arg0: i32) -> (i32, i32) {
    %c0_i32 = arith.constant 0 : i32
    %c0_i32_0 = arith.constant 0 : i32
    %c0_i32_1 = arith.constant 0 : i32
    return %c0_i32, %c0_i32_0 : i32, i32
  }
  func.func @transform_3(%arg0: i32) -> (i32, i32) {
    %c0_i32 = arith.constant 0 : i32
    %c0_i32_0 = arith.constant 0 : i32
    %c0_i32_1 = arith.constant 0 : i32
    return %c0_i32, %c0_i32_0 : i32, i32
  }
  func.func @transform_4(%arg0: i32) -> (i32, i32, i32) {
    %c0_i32 = arith.constant 0 : i32
    %c0_i32_0 = arith.constant 0 : i32
    %c0_i32_1 = arith.constant 0 : i32
    %c0_i32_2 = arith.constant 0 : i32
    return %c0_i32, %c0_i32_0, %c0_i32_1 : i32, i32, i32
  }
  func.func @transform_5(%arg0: i32) -> (i32, i32, i32) {
    %c0_i32 = arith.constant 0 : i32
    %c0_i32_0 = arith.constant 0 : i32
    %c0_i32_1 = arith.constant 0 : i32
    %c0_i32_2 = arith.constant 0 : i32
    return %c0_i32, %c0_i32_0, %c0_i32_1 : i32, i32, i32
  }
  func.func @transform_6(%arg0: i32) -> (i32, i32, i32) {
    %c0_i32 = arith.constant 0 : i32
    %c0_i32_0 = arith.constant 0 : i32
    %c0_i32_1 = arith.constant 0 : i32
    %c0_i32_2 = arith.constant 0 : i32
    return %c0_i32, %c0_i32_0, %c0_i32_1 : i32, i32, i32
  }
  func.func @transform_7(%arg0: i32) -> (i32, i32, i32) {
    %c0_i32 = arith.constant 0 : i32
    %c0_i32_0 = arith.constant 0 : i32
    %c0_i32_1 = arith.constant 0 : i32
    %c0_i32_2 = arith.constant 0 : i32
    return %c0_i32, %c0_i32_0, %c0_i32_1 : i32, i32, i32
  }
  func.func @transform_8(%arg0: i32) -> (i32, i32) {
    %c0_i32 = arith.constant 0 : i32
    %c0_i32_0 = arith.constant 0 : i32
    %c0_i32_1 = arith.constant 0 : i32
    return %c0_i32, %c0_i32_0 : i32, i32
  }
}

</mosaic_0001>

<bundles_post_ra>
// kernel: transformer_decoder_forward.1
= control target key start
LH: loop header
LB: loop body
LE: loop exit
PB: predicated region body
PF: predicated region fallthrough
CT: control target
= control target key end

     0   :  { %vm67_vm0 = vcmask 261120   ;;  %s8629_s0 = inlined_call_operand.vmem [shape: f32[16,32], index: 0, kind: input, shape index: {}]   ;;  %s8630_s1 = inlined_call_operand.vmem [shape: f32[32,32], index: 1, kind: input, shape index: {}]   ;;  %s8631_s2 = inlined_call_operand.vmem [shape: f32[16,32], index: 2, kind: input, shape index: {}]   ;;  %s8632_s3 = inlined_call_operand.vmem [shape: f32[32,32], index: 3, kind: input, shape index: {}]   ;;  %s8633_s4 = inlined_call_operand.vmem [shape: f32[4,33,128], index: 4, kind: input, shape index: {}]   ;;  %s8634_s5 = inlined_call_operand.vmem [shape: f32[2,33,64], index: 5, kind: input, shape index: {}]   ;;  %s8635_s6 = inlined_call_operand.vmem [shape: f32[2,65,32], index: 6, kind: input, shape index: {}]   ;;  %s8636_s7 = inlined_call_operand.vmem [shape: f32[7,2,32], index: 7, kind: input, shape index: {}]   ;;  %s8637_s8 = inlined_call_operand.hbm [shape: f32[16,32], index: 8, kind: output, shape index: {}]  }
   0x1   :  { %v58_v0 = vld [vmem:[%s8633_s4] sm:$0xff]  ;;  %v59_v1 = vld [vmem:[%s8633_s4 + $0x8] sm:$0xff]  ;;  %v60_v2 = vld [vmem:[%s8633_s4 + $0x10] sm:$0xff] }
   0x2   :  { %v6597_v3 = vpack.c.bf16 %v59_v1, %v58_v0  ;;  %v61_v4 = vld [vmem:[%s8633_s4 + $0x18] sm:$0xff]  ;;  %v7585_v5 = vld [vmem:[%s8629_s0] sm:$0xff] }
   0x3   :  { %v7590_v6 = vld [vmem:[%s8631_s2] sm:$0xff]  ;;  %v6601_v7 = vpack.c.bf16 %v61_v4, %v60_v2 }
   0x4   :  { %v56_v8 = vadd.f32 %v7590_v6, %v7585_v5 }
   0x5   :  { %13 = vsyncpa [#allocation3], 0  ;;  %6598 = vmatprep.subr.bf16.mxu1 %v6597_v3  ;;  %v7598_v9 = vld [vmem:[%s8629_s0 + $0x8] sm:$0xff]  ;;  %v7613_v12 = vld [vmem:[%s8633_s4 + $0x20] ss:$0 sm:$0xff]  ;;  %vm304_vm1 = vcmask 64512   ;;  %v7619_v19 = vpack.i.bf16 %v59_v1, %v58_v0  ;;  %v7625_v20 = vpack.i.bf16 %v61_v4, %v60_v2  ;;  %v46_v56 = vlaneseq }
   0x6   :  { %6600 = vmatpush3.bf16.msra.mxu1 %v6597_v3  ;;  %6091 = vmatprep.mubr.msk.f32.mxu1 %vm67_vm0, %v56_v8  ;;  %v7603_v10 = vld [vmem:[%s8631_s2 + $0x8] sm:$0xff]  ;;  %s7514_s0 = smov 104   ;;  %s7515_s23 = smov 120   ;;  %vm7635_vm2 = vmpackc.low %vm304_vm1, %vm304_vm1  ;;  %vm661_vm5 = vcmask 130048   ;;  %vm1102_vm6 = vcmask 195584   ;;  %vm2690_vm7 = vcmask 523264  }
   0x7   :  { %6602 = vmatprep.subr.bf16.mxu1 %v6601_v7  ;;  %v57_v11 = vadd.f32 %v7603_v10, %v7598_v9  ;;  %s7516_s24 = smov 64   ;;  %s7517_s25 = smov 112   ;;  %v7670_v57 = vshrl.u32 %v46_v56, 7  ;;  %v50_v59 = vand.u32 127, %v46_v56 }
   0x8   :  { %s7518_s26 = smov 96   ;;  %s7519_s27 = smov 32  }
   0x9   :  { %v48_v58 = vadd.s32 8, %v7670_v57  ;;  %v53_v61 = vand.u32 1, %v50_v59  ;;  %v51_v62 = vand.u32 1, %v7670_v57  ;;  %s7520_s28 = smov 8   ;;  %s7521_s29 = smov 16  }
   0xa   :  { %6604 = vmatpush3.bf16.msra.mxu1 %v6601_v7  ;;  %s7522_s30 = smov 24  }
   0xb   :  { %v52_v60 = vand.u32 1, %v48_v58  ;;  %vm7680_vm4 = vcmp.eq.s32.totalorder %v51_v62, %v53_v61 }
   0xd   :  { %6092 = vmatmul.mubr.msk.f32.vlgmr.msra.gmra.mrb[0].mxu1 %vm67_vm0, %v57_v11  ;;  %vm7674_vm3 = vcmp.eq.s32.totalorder %v52_v60, %v53_v61 }
   0xe   :  { %6102 = vmatprep.mubr.msk.f32.mxu1 %vm67_vm0, %v7585_v5 }
  0xe0   :  { %v6093_v13 = vpop.f32.mrb[0].mxu1 }
  0xe1   :  { %v146_v14 = vadd.f32 %v6093_v13, %v7613_v12  ;;  %v140_v15 = vpop.f32.mrb[1].mxu1 }
  0xe2   :  { %v141_v16 = vadd.f32 %v7613_v12, %v140_v15 }
  0xe3   :  { %v251_v36 = vmul.f32 0.35355338, %v146_v14 }
  0xe4   :  { %v7018_v17 = vpack.i.bf16 %v146_v14, %v141_v16  ;;  %v250_v18 = vmul.f32 0.35355338, %v141_v16 }
  0xe6   :  { %7019 = vrot.lane.b32.xlu1 %v7018_v17, %s7514_s0  ;;  %7009 = vrot.lane.b32.xlu0 %v7018_v17, %s7515_s23 }
  0xe7   :  { %6109 = vmatprep.mubr.msk.f32.mxu0 %vm304_vm1, %v250_v18 }
  0xea   :  { %7024 = vrot.lane.b32.xlu1 %v7619_v19, %s7516_s24  ;;  %7014 = vrot.lane.b32.xlu0 %v7018_v17, %s7517_s25 }
  0xee   :  { %7034 = vrot.lane.b32.xlu1 %v7018_v17, %s7518_s26  ;;  %7029 = vrot.lane.b32.xlu0 %v7625_v20, %s7516_s24 }
 0x158   :  { %v7020_v21 = vpop.permute.xlu1 %7019  ;;  %v7010_v22 = vpop.permute.xlu0 %7009 }
 0x159   :  { %7039 = vrot.lane.b32.xlu0 %v7010_v22, %s7518_s26 }
 0x15c   :  { %v7025_v23 = vpop.permute.xlu1 %7024  ;;  %v7015_v24 = vpop.permute.xlu0 %7014 }
 0x15d   :  { %v7027_v25 = vunpack.i.h.bf16 %v7025_v23  ;;  %v7026_v26 = vunpack.i.l.bf16 %v7025_v23  ;;  %7044 = vrot.lane.b32.xlu1 %v7015_v24, %s7518_s26  ;;  %7049 = vrot.lane.b32.xlu0 %v7020_v21, %s7518_s26 }
 0x15f   :  { %v6605_v27 = vpack.c.bf16 %v7027_v25, %v7026_v26 }
 0x160   :  { %v7035_v28 = vpop.permute.xlu1 %7034  ;;  %v7030_v29 = vpop.permute.xlu0 %7029 }
 0x161   :  { %v7037_v30 = vunpack.i.h.bf16 %v7035_v28  ;;  %v7036_v31 = vunpack.i.l.bf16 %v7035_v28  ;;  %v7032_v32 = vunpack.i.h.bf16 %v7030_v29  ;;  %v7031_v33 = vunpack.i.l.bf16 %v7030_v29  ;;  %6606 = vmatprep.subr.bf16.mxu1 %v6605_v27  ;;  %256 = vrot.lane.b32.xlu0 %v251_v36, %s7515_s23 }
 0x162   :  { %6608 = vmatpush3.bf16.msra.mxu1 %v6605_v27  ;;  %254 = vrot.lane.b32.xlu1 %v250_v18, %s7515_s23 }
 0x163   :  { %v6613_v35 = vpack.c.bf16 %v7037_v30, %v7036_v31  ;;  %v6609_v37 = vpack.c.bf16 %v7032_v32, %v7031_v33 }
 0x165   :  { %6615 = vmatprep.subr.msk.bf16.mxu0 %vm7635_vm2, %v6613_v35  ;;  %6610 = vmatprep.subr.bf16.mxu1 %v6609_v37 }
 0x166   :  { %6618 = vmatpush3.bf16.xpose.msk.msra.mxu0 %vm7635_vm2, %v6613_v35  ;;  %6612 = vmatpush3.bf16.msra.mxu1 %v6609_v37 }
 0x167   :  { %260 = vrot.lane.b32.xlu0 %v251_v36, %s7517_s25  ;;  %258 = vrot.lane.b32.xlu1 %v250_v18, %s7517_s25 }
 0x169   :  { %6103 = vmatmul.mubr.msk.f32.vlgmr.msra.gmra.mrb[2].mxu1 %vm67_vm0, %v7598_v9 }
 0x16b   :  { %264 = vrot.lane.b32.xlu0 %v251_v36, %s7514_s0  ;;  %262 = vrot.lane.b32.xlu1 %v250_v18, %s7514_s0 }
 0x16d   :  { %6110 = vmatmul.mubr.msk.f32.vlgmr.msra.gmra.mrb[0].mxu0 %vm304_vm1, %v251_v36 }
 0x1cb   :  { %v7040_v38 = vpop.permute.xlu0 %7039 }
 0x1cc   :  { %v7042_v39 = vunpack.i.h.bf16 %v7040_v38  ;;  %v7041_v40 = vunpack.i.l.bf16 %v7040_v38 }
 0x1ce   :  { %v6619_v41 = vpack.c.bf16 %v7042_v39, %v7041_v40 }
 0x1cf   :  { %v7045_v42 = vpop.permute.xlu1 %7044  ;;  %v7050_v43 = vpop.permute.xlu0 %7049 }
 0x1d0   :  { %v7047_v44 = vunpack.i.h.bf16 %v7045_v42  ;;  %v7046_v45 = vunpack.i.l.bf16 %v7045_v42  ;;  %v7052_v46 = vunpack.i.h.bf16 %v7050_v43  ;;  %v7051_v47 = vunpack.i.l.bf16 %v7050_v43  ;;  %6621 = vmatprep.subr.msk.bf16.mxu1 %vm7635_vm2, %v6619_v41 }
 0x1d1   :  { %6624 = vmatpush3.bf16.xpose.msk.msra.mxu1 %vm7635_vm2, %v6619_v41 }
 0x1d2   :  { %v6625_v48 = vpack.c.bf16 %v7047_v44, %v7046_v45  ;;  %v6631_v49 = vpack.c.bf16 %v7052_v46, %v7051_v47 }
 0x1d3   :  { %v257_v50 = vpop.permute.xlu0 %256 }
 0x1d4   :  { %v255_v51 = vpop.permute.xlu1 %254  ;;  %6627 = vmatprep.subr.msk.bf16.mxu0 %vm7635_vm2, %v6625_v48  ;;  %6633 = vmatprep.subr.msk.bf16.mxu1 %vm7635_vm2, %v6631_v49 }
 0x1d5   :  { %6116 = vmatprep.mubr.msk.f32.mxu1 %vm304_vm1, %v255_v51  ;;  %6630 = vmatpush3.bf16.xpose.msk.msra.mxu0 %vm7635_vm2, %v6625_v48 }
 0x1d8   :  { %6117 = vmatmul.mubr.msk.f32.vlgmr.msra.gmra.mrb[4].mxu1 %vm304_vm1, %v257_v50 }
 0x1d9   :  { %v259_v52 = vpop.permute.xlu1 %258  ;;  %v261_v53 = vpop.permute.xlu0 %260  ;;  %6636 = vmatpush3.bf16.xpose.msk.msra.mxu1 %vm7635_vm2, %v6631_v49 }
 0x1da   :  { %6123 = vmatprep.mubr.msk.f32.mxu0 %vm304_vm1, %v259_v52 }
 0x1dc   :  { %6124 = vmatmul.mubr.msk.f32.vlgmr.msra.gmra.mrb[2].mxu0 %vm304_vm1, %v261_v53 }
 0x1dd   :  { %v263_v54 = vpop.permute.xlu1 %262  ;;  %v265_v55 = vpop.permute.xlu0 %264 }
 0x1de   :  { %6130 = vmatprep.mubr.msk.f32.mxu1 %vm304_vm1, %v263_v54 }
 0x1e0   :  { %6131 = vmatmul.mubr.msk.f32.vlgmr.msra.gmra.mrb[6].mxu1 %vm304_vm1, %v265_v55 }
 0x23c   :  { %v7678_v0 = vpop.f32.mrb[2].mxu1 }
 0x23d   :  { %v7684_v2 = vpop.f32.mrb[3].mxu1 }
 0x240   :  { %v6111_v3 = vpop.f32.mrb[0].mxu0 }
 0x241   :  { %v654_v4 = vsel %vm7674_vm3, %v6111_v3, -1e+30  ;;  %v379_v7 = vpop.f32.mrb[1].mxu0 }
 0x242   :  { %v653_v8 = vsel %vm7680_vm4, %v379_v7, -1e+30  ;;  %v665_v11 = vsel %vm661_vm5, %v654_v4, -inf }
 0x243   :  { %666 = vmax.xlane.f32.xlu0 %v665_v11  ;;  %v662_v13 = vsel %vm661_vm5, %v653_v8, -inf }
 0x244   :  { %663 = vmax.xlane.f32.xlu1 %v662_v13 }
 0x2ab   :  { %v6118_v14 = vpop.f32.mrb[4].mxu1 }
 0x2ac   :  { %v656_v15 = vsel %vm7674_vm3, %v6118_v14, -1e+30  ;;  %v466_v16 = vpop.f32.mrb[5].mxu1 }
 0x2ad   :  { %v655_v17 = vsel %vm7680_vm4, %v466_v16, -1e+30  ;;  %v671_v18 = vsel %vm661_vm5, %v656_v15, -inf }
 0x2ae   :  { %672 = vmax.xlane.f32.xlu1 %v671_v18  ;;  %v668_v21 = vsel %vm661_vm5, %v655_v17, -inf }
 0x2af   :  { %669 = vmax.xlane.f32.xlu0 %v668_v21  ;;  %v6125_v22 = vpop.f32.mrb[2].mxu0 }
 0x2b0   :  { %v658_v23 = vsel %vm7674_vm3, %v6125_v22, -1e+30  ;;  %v553_v24 = vpop.f32.mrb[3].mxu0 }
 0x2b1   :  { %v657_v25 = vsel %vm7680_vm4, %v553_v24, -1e+30  ;;  %v677_v26 = vsel %vm661_vm5, %v658_v23, -inf }
 0x2b2   :  { %678 = vmax.xlane.f32.xlu1 %v677_v26  ;;  %v674_v27 = vsel %vm661_vm5, %v657_v25, -inf }
 0x2b3   :  { %v6132_v28 = vpop.f32.mrb[6].mxu1  ;;  %675 = vmax.xlane.f32.xlu0 %v674_v27 }
 0x2b4   :  { %v660_v29 = vsel %vm7674_vm3, %v6132_v28, -1e+30  ;;  %v640_v30 = vpop.f32.mrb[7].mxu1 }
 0x2b5   :  { %v659_v31 = vsel %vm7680_vm4, %v640_v30, -1e+30  ;;  %v683_v32 = vsel %vm661_vm5, %v660_v29, -inf }
 0x2b6   :  { %684 = vmax.xlane.f32.xlu1 %v683_v32  ;;  %v680_v33 = vsel %vm661_vm5, %v659_v31, -inf }
 0x2b7   :  { %681 = vmax.xlane.f32.xlu0 %v680_v33 }
 0x2cd   :  { %166 = vrot.lane.b32.xlu0 %v7613_v12, %s7516_s24 }
 0x2d0   :  { %v667_v35 = vpop.xlane.xlu0 %666 }
 0x2d1   :  { %v687_v36 = vsub.f32 %v654_v4, %v667_v35  ;;  %v664_v37 = vpop.xlane.xlu1 %663 }
 0x2d2   :  { %v686_v38 = vsub.f32 %v653_v8, %v664_v37 }
 0x2d3   :  { %v696_v39 = vmul.f32 1.442695, %v687_v36 }
 0x2d4   :  { %v694_v40 = vmul.f32 1.442695, %v686_v38 }
 0x2d5   :  { %7328 = vpow2.f32 %v696_v39 }
 0x2d6   :  { %7330 = vpow2.f32 %v694_v40 }
 0x2df   :  { %v7712_v41 = vpop.eup %7328 }
 0x2e0   :  { %v713_v42 = vsel %vm661_vm5, %v7712_v41, 0.0  ;;  %v7331_v43 = vpop.eup %7330 }
 0x2e1   :  { %714 = vadd.xlane.f32.xlu1 %v713_v42  ;;  %v710_v44 = vsel %vm661_vm5, %v7331_v43, 0.0 }
 0x2e5   :  { %711 = vadd.xlane.f32.xlu1 %v710_v44 }
 0x33b   :  { %v673_v45 = vpop.xlane.xlu1 %672 }
 0x33c   :  { %v689_v46 = vsub.f32 %v656_v15, %v673_v45  ;;  %v670_v47 = vpop.xlane.xlu0 %669 }
 0x33d   :  { %v688_v49 = vsub.f32 %v655_v17, %v670_v47 }
 0x33e   :  { %v700_v48 = vmul.f32 1.442695, %v689_v46 }
 0x33f   :  { %v679_v50 = vpop.xlane.xlu1 %678  ;;  %v698_v53 = vmul.f32 1.442695, %v688_v49 }
 0x340   :  { %7332 = vpow2.f32 %v700_v48  ;;  %v691_v51 = vsub.f32 %v658_v23, %v679_v50  ;;  %v676_v52 = vpop.xlane.xlu0 %675 }
 0x341   :  { %v690_v55 = vsub.f32 %v657_v25, %v676_v52 }
 0x342   :  { %v704_v54 = vmul.f32 1.442695, %v691_v51 }
 0x343   :  { %v685_v56 = vpop.xlane.xlu1 %684  ;;  %v702_v60 = vmul.f32 1.442695, %v690_v55 }
 0x344   :  { %7334 = vpow2.f32 %v704_v54  ;;  %v682_v58 = vpop.xlane.xlu0 %681  ;;  %v693_v61 = vsub.f32 %v660_v29, %v685_v56 }
 0x345   :  { %v692_v59 = vsub.f32 %v659_v31, %v682_v58  ;;  %7336 = vpow2.f32 %v698_v53 }
 0x346   :  { %v708_v11 = vmul.f32 1.442695, %v693_v61 }
 0x347   :  { %v706_v62 = vmul.f32 1.442695, %v692_v59 }
 0x348   :  { %v167_v3 = vpop.permute.xlu0 %166 }
 0x349   :  { %7338 = vpow2.f32 %v706_v62  ;;  %v242_v4 = vadd.f32 %v7684_v2, %v167_v3  ;;  %v247_v7 = vadd.f32 %v7678_v0, %v167_v3 }
 0x34a   :  { %v7719_v8 = vpop.eup %7332  ;;  %7340 = vpow2.f32 %v702_v60 }
 0x34b   :  { %v719_v13 = vsel %vm661_vm5, %v7719_v8, 0.0  ;;  %v6637_v14 = vpack.c.bf16 %v247_v7, %v242_v4  ;;  %v7053_v15 = vpack.i.bf16 %v247_v7, %v242_v4  ;;  %7342 = vpow2.f32 %v708_v11 }
 0x34c   :  { %720 = vadd.xlane.f32.xlu1 %v719_v13 }
 0x34d   :  { %6638 = vmatprep.subr.bf16.mxu0 %v6637_v14 }
 0x34e   :  { %v7723_v16 = vpop.eup %7334  ;;  %6640 = vmatpush3.bf16.msra.mxu0 %v6637_v14 }
 0x34f   :  { %v725_v2 = vsel %vm661_vm5, %v7723_v16, 0.0  ;;  %v7337_v17 = vpop.eup %7336 }
 0x350   :  { %726 = vadd.xlane.f32.xlu1 %v725_v2  ;;  %v716_v18 = vsel %vm661_vm5, %v7337_v17, 0.0 }
 0x353   :  { %v7339_v0 = vpop.eup %7338 }
 0x354   :  { %v7341_v21 = vpop.eup %7340  ;;  %717 = vadd.xlane.f32.xlu1 %v716_v18  ;;  %v728_v22 = vsel %vm661_vm5, %v7339_v0, 0.0 }
 0x355   :  { %729 = vadd.xlane.f32.xlu0 %v728_v22  ;;  %v722_v23 = vsel %vm661_vm5, %v7341_v21, 0.0  ;;  %v7730_v24 = vpop.eup %7342 }
 0x356   :  { %v731_v25 = vsel %vm661_vm5, %v7730_v24, 0.0 }
 0x358   :  { %723 = vadd.xlane.f32.xlu1 %v722_v23 }
 0x35c   :  { %732 = vadd.xlane.f32.xlu1 %v731_v25 }
 0x36b   :  { %7069 = vrot.lane.b32.xlu0 %v7619_v19, %s7519_s27 }
 0x36d   :  { %7054 = vrot.lane.b32.xlu1 %v7053_v15, %s7515_s23 }
 0x36e   :  { %v715_v26 = vpop.xlane.xlu1 %714 }
 0x36f   :  { %7344 = vrcp.f32 %v715_v26 }
 0x371   :  { %7059 = vrot.lane.b32.xlu1 %v7053_v15, %s7517_s25 }
 0x372   :  { %v712_v27 = vpop.xlane.xlu1 %711 }
 0x373   :  { %7346 = vrcp.f32 %v712_v27 }
 0x375   :  { %7064 = vrot.lane.b32.xlu1 %v7053_v15, %s7514_s0 }
 0x379   :  { %v7345_v28 = vpop.eup %7344  ;;  %7074 = vrot.lane.b32.xlu1 %v7625_v20, %s7519_s27 }
 0x37a   :  { %v737_v31 = vmul.f32 %v7345_v28, %v7712_v41 }
 0x37d   :  { %v7347_v29 = vpop.eup %7346 }
 0x37e   :  { %v735_v30 = vmul.f32 %v7347_v29, %v7331_v43 }
 0x380   :  { %6137 = vmatprep.mubr.msk.f32.mxu0 %vm661_vm5, %v735_v30 }
 0x381   :  { %6138 = vmatmul.mubr.msk.f32.vlgmr.msra.gmra.mrb[4].mxu0 %vm661_vm5, %v737_v31 }
 0x3d9   :  { %v721_v32 = vpop.xlane.xlu1 %720 }
 0x3dd   :  { %v727_v33 = vpop.xlane.xlu1 %726 }
 0x3e1   :  { %v718_v35 = vpop.xlane.xlu1 %717 }
 0x3e2   :  { %7348 = vrcp.f32 %v718_v35  ;;  %v730_v36 = vpop.xlane.xlu0 %729 }
 0x3e5   :  { %v724_v37 = vpop.xlane.xlu1 %723 }
 0x3e6   :  { %7350 = vrcp.f32 %v724_v37  ;;  %v7070_v4 = vpop.permute.xlu0 %7069 }
 0x3e7   :  { %7352 = vrcp.f32 %v721_v32  ;;  %v7072_v7 = vunpack.i.h.bf16 %v7070_v4 }
 0x3e8   :  { %7354 = vrcp.f32 %v730_v36 }
 0x3e9   :  { %v733_v38 = vpop.xlane.xlu1 %732  ;;  %7356 = vrcp.f32 %v727_v33 }
 0x3ea   :  { %7358 = vrcp.f32 %v733_v38 }
 0x3ec   :  { %v7349_v39 = vpop.eup %7348 }
 0x3ed   :  { %v7055_v40 = vpop.permute.xlu1 %7054  ;;  %v739_v41 = vmul.f32 %v7349_v39, %v7337_v17 }
 0x3ee   :  { %v7057_v42 = vunpack.i.h.bf16 %v7055_v40  ;;  %v7056_v43 = vunpack.i.l.bf16 %v7055_v40 }
 0x3ef   :  { %6144 = vmatprep.mubr.msk.f32.mxu1 %vm661_vm5, %v739_v41 }
 0x3f0   :  { %v7351_v19 = vpop.eup %7350  ;;  %v6641_v20 = vpack.c.bf16 %v7057_v42, %v7056_v43 }
 0x3f1   :  { %v7353_v44 = vpop.eup %7352  ;;  %v7060_v45 = vpop.permute.xlu1 %7059  ;;  %v743_v46 = vmul.f32 %v7351_v19, %v7341_v21  ;;  %v5633_v19 = vld [vmem:[%s8633_s4 + $0x38] sm:$0xff] }
 0x3f2   :  { %v7355_v47 = vpop.eup %7354  ;;  %v7062_v48 = vunpack.i.h.bf16 %v7060_v45  ;;  %v7061_v49 = vunpack.i.l.bf16 %v7060_v45  ;;  %6642 = vmatprep.subr.bf16.mxu1 %v6641_v20  ;;  %v741_v50 = vmul.f32 %v7353_v44, %v7719_v8  ;;  %v7071_v8 = vunpack.i.l.bf16 %v7070_v4 }
 0x3f3   :  { %6644 = vmatpush3.bf16.msra.mxu1 %v6641_v20  ;;  %6151 = vmatprep.mubr.msk.f32.mxu0 %vm661_vm5, %v743_v46  ;;  %v7357_v52 = vpop.eup %7356  ;;  %v747_v54 = vmul.f32 %v7355_v47, %v7339_v0  ;;  %v5634_v20 = vld [vmem:[%s8633_s4 + $0x40] sm:$0xff] }
 0x3f4   :  { %v6645_v51 = vpack.c.bf16 %v7062_v48, %v7061_v49  ;;  %v745_v58 = vmul.f32 %v7357_v52, %v7723_v16  ;;  %v7359_v60 = vpop.eup %7358  ;;  %v6653_v11 = vpack.c.bf16 %v7072_v7, %v7071_v8  ;;  %v7779_v44 = vpack.i.bf16 %v5634_v20, %v5633_v19 }
 0x3f5   :  { %v7065_v53 = vpop.permute.xlu1 %7064  ;;  %v749_v61 = vmul.f32 %v7359_v60, %v7730_v24 }
 0x3f6   :  { %v7067_v55 = vunpack.i.h.bf16 %v7065_v53  ;;  %v7066_v56 = vunpack.i.l.bf16 %v7065_v53  ;;  %6145 = vmatmul.mubr.msk.f32.vlgmr.msra.gmra.mrb[8].mxu1 %vm661_vm5, %v741_v50  ;;  %6646 = vmatprep.subr.bf16.mxu0 %v6645_v51  ;;  %v5631_v53 = vld [vmem:[%s8633_s4 + $0x28] sm:$0xff] }
 0x3f7   :  { %6648 = vmatpush3.bf16.msra.mxu0 %v6645_v51  ;;  %6158 = vmatprep.mubr.msk.f32.mxu1 %vm661_vm5, %v747_v54  ;;  %v5632_v54 = vld [vmem:[%s8633_s4 + $0x30] sm:$0xff] }
 0x3f8   :  { %v6649_v59 = vpack.c.bf16 %v7067_v55, %v7066_v56  ;;  %6654 = vmatprep.subr.bf16.mxu0 %v6653_v11  ;;  %v7791_v55 = vpack.i.bf16 %v5632_v54, %v5631_v53  ;;  %v7798_v56 = vld [vmem:[%s8630_s1] sm:$0xff] }
 0x3f9   :  { %v7075_v13 = vpop.permute.xlu1 %7074 }
 0x3fa   :  { %6152 = vmatmul.mubr.msk.f32.vlgmr.msra.gmra.mrb[6].mxu0 %vm661_vm5, %v745_v58  ;;  %6650 = vmatprep.subr.bf16.mxu1 %v6649_v59  ;;  %v7077_v14 = vunpack.i.h.bf16 %v7075_v13  ;;  %v7076_v15 = vunpack.i.l.bf16 %v7075_v13  ;;  %v38_v58 = vld [vmem:[%s8632_s3] sm:$0xff] }
 0x3fb   :  { %6652 = vmatpush3.bf16.msra.mxu1 %v6649_v59  ;;  %6656 = vmatpush3.bf16.msra.mxu0 %v6653_v11  ;;  %v6661_v59 = vpack.c.bf16 %v5632_v54, %v5631_v53  ;;  %v7804_v60 = vadd.f32 %v38_v58, %v7798_v56 }
 0x3fc   :  { %v6657_v16 = vpack.c.bf16 %v7077_v14, %v7076_v15 }
 0x3fd   :  { %6662 = vmatprep.subr.bf16.mxu1 %v6661_v59 }
 0x3fe   :  { %6159 = vmatmul.mubr.msk.f32.vlgmr.msra.gmra.mrb[10].mxu1 %vm661_vm5, %v749_v61  ;;  %6658 = vmatprep.subr.bf16.mxu0 %v6657_v16  ;;  %v6665_v61 = vpack.c.bf16 %v5634_v20, %v5633_v19 }
 0x3ff   :  { %6660 = vmatpush3.bf16.msra.mxu0 %v6657_v16  ;;  %6664 = vmatpush3.bf16.msra.mxu1 %v6661_v59 }
 0x400   :  { %6666 = vmatprep.subr.bf16.mxu1 %v6665_v61 }
 0x403   :  { %6668 = vmatpush3.bf16.msra.mxu1 %v6665_v61 }
 0x454   :  { %v6139_v62 = vpop.f32.mrb[4].mxu0 }
 0x455   :  { %v822_v3 = vpop.f32.mrb[5].mxu0 }
 0x4c9   :  { %v6146_v2 = vpop.f32.mrb[8].mxu1 }
 0x4ca   :  { %1078 = vrot.lane.b32.xlu1 %v6146_v2, %s7520_s28  ;;  %v903_v17 = vpop.f32.mrb[9].mxu1 }
 0x4cd   :  { %v6153_v0 = vpop.f32.mrb[6].mxu0 }
 0x4ce   :  { %1086 = vrot.lane.b32.xlu1 %v6153_v0, %s7521_s29  ;;  %v984_v18 = vpop.f32.mrb[7].mxu0 }
 0x4d1   :  { %v6160_v21 = vpop.f32.mrb[10].mxu1 }
 0x4d2   :  { %1076 = vrot.lane.b32.xlu1 %v903_v17, %s7520_s28  ;;  %1094 = vrot.lane.b32.xlu0 %v6160_v21, %s7522_s30  ;;  %v1065_v22 = vpop.f32.mrb[11].mxu1 }
 0x4d6   :  { %1084 = vrot.lane.b32.xlu1 %v984_v18, %s7521_s29 }
 0x4da   :  { %1092 = vrot.lane.b32.xlu1 %v1065_v22, %s7522_s30  ;;  %v7820_v22 = vsub.s32 0, %v7670_v57 }
 0x4de   :  { %1117 = vrot.lane.b32.xlu1 %v7613_v12, %s7519_s27 }
 0x53c   :  { %v1079_v23 = vpop.permute.xlu1 %1078 }
 0x53d   :  { %v1099_v29 = vsel %vm304_vm1, %v6139_v62, %v1079_v23  ;;  %v7811_v62 = vld [vmem:[%s8633_s4 + $0x48] ss:$0 sm:$0xff]  ;;  %v1203_v23 = vld [vmem:[%s8636_s7] sm:$0x3] }
 0x540   :  { %v1087_v24 = vpop.permute.xlu1 %1086 }
 0x541   :  { %v1101_v32 = vsel %vm661_vm5, %v1099_v29, %v1087_v24  ;;  %v33_v24 = vld [vmem:[%s8630_s1 + $0x8] sm:$0xff]  ;;  %v1234_v29 = vrot.slane %v1203_v23, %v7820_v22 }
 0x544   :  { %v1077_v25 = vpop.permute.xlu1 %1076  ;;  %v1095_v28 = vpop.permute.xlu0 %1094 }
 0x545   :  { %v1098_v27 = vsel %vm304_vm1, %v822_v3, %v1077_v25  ;;  %v1104_v35 = vsel %vm1102_vm6, %v1101_v32, %v1095_v28  ;;  %v39_v25 = vld [vmem:[%s8632_s3 + $0x8] sm:$0xff]  ;;  %v40_v28 = vld [vmem:[%s8632_s3 + $0x10] sm:$0xff] }
 0x546   :  { %v7841_v32 = vadd.f32 %v39_v25, %v33_v24 }
 0x548   :  { %v1085_v26 = vpop.permute.xlu1 %1084 }
 0x549   :  { %v1100_v30 = vsel %vm661_vm5, %v1098_v27, %v1085_v26  ;;  %v34_v27 = vld [vmem:[%s8630_s1 + $0x10] sm:$0xff] }
 0x54c   :  { %v1093_v31 = vpop.permute.xlu1 %1092 }
 0x54d   :  { %v1103_v33 = vsel %vm1102_vm6, %v1100_v30, %v1093_v31  ;;  %v7839_v30 = vsub.s32 1, %v7670_v57 }
 0x54e   :  { %6169 = vmatprep.mubr.msk.f32.mxu0 %vm67_vm0, %v1103_v33  ;;  %v7843_v33 = vadd.f32 %v40_v28, %v34_v27 }
 0x54f   :  { %6170 = vmatmul.mubr.msk.f32.vlgmr.msra.gmra.mrb[8].mxu0 %vm67_vm0, %v1104_v35  ;;  %v35_v35 = vld [vmem:[%s8630_s1 + $0x18] sm:$0xff] }
 0x550   :  { %v1118_v12 = vpop.permute.xlu1 %1117  ;;  %6191 = vmatprep.mubr.msk.f32.mxu0 %vm67_vm0, %v7804_v60 }
 0x622   :  { %v6171_v36 = vpop.f32.mrb[8].mxu0 }
 0x623   :  { %v1198_v37 = vadd.f32 %v6171_v36, %v1118_v12  ;;  %v1192_v38 = vpop.f32.mrb[9].mxu0 }
 0x624   :  { %v1193_v39 = vadd.f32 %v1192_v38, %v1118_v12  ;;  %v41_v12 = vld [vmem:[%s8632_s3 + $0x18] sm:$0xff]  ;;  %v1240_v38 = vrot.slane %v1203_v23, %v7839_v30 }
 0x625   :  { %v1202_v40 = vadd.f32 %v1198_v37, %v7598_v9 }
 0x626   :  { %v1201_v41 = vadd.f32 %v1193_v39, %v7585_v5  ;;  %v7854_v39 = vadd.f32 %v41_v12, %v35_v35 }
 0x627   :  { %v1207_v42 = vsel %vm67_vm0, %v1202_v40, 0.0 }
 0x628   :  { %1208 = vadd.xlane.f32.xlu1 %v1207_v42  ;;  %v1204_v43 = vsel %vm67_vm0, %v1201_v41, 0.0 }
 0x629   :  { %1205 = vadd.xlane.f32.xlu0 %v1204_v43 }
 0x639   :  { %7084 = vrot.lane.b32.xlu1 %v7779_v44, %s7518_s26 }
 0x63d   :  { %1353 = vrot.lane.b32.xlu1 %v7811_v62, %s7518_s26 }
 0x641   :  { %7089 = vrot.lane.b32.xlu1 %v7791_v55, %s7516_s24 }
 0x6b5   :  { %v1209_v5 = vpop.xlane.xlu1 %1208 }
 0x6b6   :  { %v1212_v9 = vmul.f32 0.03125, %v1209_v5  ;;  %v1206_v45 = vpop.xlane.xlu0 %1205 }
 0x6b7   :  { %v1211_v46 = vmul.f32 0.03125, %v1206_v45 }
 0x6b8   :  { %v1214_v47 = vsub.f32 %v1202_v40, %v1212_v9 }
 0x6b9   :  { %v1213_v48 = vsub.f32 %v1201_v41, %v1211_v46  ;;  %v7085_v11 = vpop.permute.xlu1 %7084 }
 0x6ba   :  { %v1216_v49 = vmul.f32 %v1214_v47, %v1214_v47  ;;  %v7087_v15 = vunpack.i.h.bf16 %v7085_v11  ;;  %v7086_v16 = vunpack.i.l.bf16 %v7085_v11 }
 0x6bb   :  { %v1215_v51 = vmul.f32 %v1213_v48, %v1213_v48 }
 0x6bc   :  { %v1220_v50 = vsel %vm67_vm0, %v1216_v49, 0.0  ;;  %v6673_v21 = vpack.c.bf16 %v7087_v15, %v7086_v16 }
 0x6bd   :  { %1221 = vadd.xlane.f32.xlu0 %v1220_v50  ;;  %v1217_v52 = vsel %vm67_vm0, %v1215_v51, 0.0  ;;  %v1354_v20 = vpop.permute.xlu1 %1353 }
 0x6c1   :  { %1218 = vadd.xlane.f32.xlu0 %v1217_v52  ;;  %v7090_v5 = vpop.permute.xlu1 %7089 }
 0x6c2   :  { %v7092_v45 = vunpack.i.h.bf16 %v7090_v5  ;;  %v7091_v46 = vunpack.i.l.bf16 %v7090_v5 }
 0x6c4   :  { %v6677_v49 = vpack.c.bf16 %v7092_v45, %v7091_v46 }
 0x6c6   :  { %6678 = vmatprep.subr.bf16.mxu1 %v6677_v49 }
 0x6d7   :  { %7079 = vrot.lane.b32.xlu0 %v7791_v55, %s7518_s26 }
 0x6db   :  { %7094 = vrot.lane.b32.xlu0 %v7779_v44, %s7516_s24 }
 0x74a   :  { %v1222_v3 = vpop.xlane.xlu0 %1221 }
 0x74b   :  { %v1224_v4 = vmul.f32 0.03125, %v1222_v3 }
 0x74d   :  { %v1226_v7 = vadd.f32 1e-05, %v1224_v4 }
 0x74e   :  { %v1219_v8 = vpop.xlane.xlu0 %1218 }
 0x74f   :  { %7360 = vrsqrt.f32 %v1226_v7  ;;  %v1223_v13 = vmul.f32 0.03125, %v1219_v8 }
 0x751   :  { %v1225_v14 = vadd.f32 1e-05, %v1223_v13 }
 0x752   :  { %v7080_v2 = vpop.permute.xlu0 %7079 }
 0x753   :  { %7362 = vrsqrt.f32 %v1225_v14  ;;  %v7082_v17 = vunpack.i.h.bf16 %v7080_v2  ;;  %v7081_v0 = vunpack.i.l.bf16 %v7080_v2 }
 0x755   :  { %v6669_v18 = vpack.c.bf16 %v7082_v17, %v7081_v0 }
 0x756   :  { %v7095_v9 = vpop.permute.xlu0 %7094 }
 0x757   :  { %6670 = vmatprep.subr.bf16.mxu0 %v6669_v18 }
 0x758   :  { %6672 = vmatpush3.bf16.msra.mxu0 %v6669_v18 }
 0x759   :  { %v7361_v26 = vpop.eup %7360  ;;  %6674 = vmatprep.subr.bf16.mxu0 %v6673_v21 }
 0x75a   :  { %v1230_v31 = vmul.f32 %v7361_v26, %v1214_v47  ;;  %v7097_v47 = vunpack.i.h.bf16 %v7095_v9 }
 0x75c   :  { %6676 = vmatpush3.bf16.msra.mxu0 %v6673_v21  ;;  %v1236_v37 = vmul.f32 %v1234_v29, %v1230_v31 }
 0x75d   :  { %v7363_v36 = vpop.eup %7362 }
 0x75e   :  { %v1229_v57 = vmul.f32 %v7363_v36, %v1213_v48  ;;  %v7858_v41 = vadd.f32 %v1240_v38, %v1236_v37  ;;  %v7096_v48 = vunpack.i.l.bf16 %v7095_v9 }
 0x75f   :  { %6192 = vmatmul.mubr.msk.f32.vlgmr.msra.gmra.mrb[10].mxu0 %vm67_vm0, %v7841_v32 }
 0x760   :  { %6194 = vmatprep.mubr.msk.f32.mxu0 %vm67_vm0, %v7843_v33  ;;  %v1235_v40 = vmul.f32 %v1234_v29, %v1229_v57  ;;  %v1244_v19 = vadd.f32 %v7858_v41, %v7603_v10  ;;  %v6681_v50 = vpack.c.bf16 %v7097_v47, %v7096_v48 }
 0x762   :  { %v7860_v42 = vadd.f32 %v1240_v38, %v1235_v40 }
 0x763   :  { %6195 = vmatmul.mubr.msk.f32.gmra.mrb[12].mxu0 %vm67_vm0, %v7854_v39 }
 0x764   :  { %v1243_v43 = vadd.f32 %v7860_v42, %v7590_v6 }
 0x766   :  { %6180 = vmatprep.mubr.msk.f32.mxu1 %vm67_vm0, %v1243_v43 }
 0x767   :  { %6181 = vmatmul.mubr.msk.f32.vlgmr.msra.gmra.mrb[12].mxu1 %vm67_vm0, %v1244_v19 }
 0x768   :  { %6205 = vmatprep.mubr.msk.f32.mxu1 %vm67_vm0, %v7798_v56  ;;  %6680 = vmatpush3.bf16.msra.mxu1 %v6677_v49 }
 0x769   :  { %6682 = vmatprep.subr.bf16.mxu1 %v6681_v50 }
 0x76c   :  { %6684 = vmatpush3.bf16.msra.mxu1 %v6681_v50 }
 0x76f   :  { %6206 = vmatmul.mubr.msk.f32.vlgmr.msra.gmra.mrb[14].mxu1 %vm67_vm0, %v33_v24 }
 0x770   :  { %6208 = vmatprep.mubr.msk.f32.mxu1 %vm67_vm0, %v34_v27 }
 0x773   :  { %6209 = vmatmul.mubr.msk.f32.gmra.mrb[16].mxu1 %vm67_vm0, %v35_v35 }
 0x832   :  { %v6193_v6 = vpop.f32.mrb[10].mxu0 }
 0x833   :  { %v1440_v10 = vadd.f32 %v6193_v6, %v1354_v20  ;;  %v1434_v51 = vpop.f32.mrb[11].mxu0 }
 0x834   :  { %v1435_v52 = vadd.f32 %v1434_v51, %v1354_v20 }
 0x836   :  { %v6196_v53 = vpop.f32.mrb[12].mxu0  ;;  %v7098_v54 = vpack.i.bf16 %v1440_v10, %v1435_v52  ;;  %v6685_v56 = vpack.c.bf16 %v1440_v10, %v1435_v52 }
 0x837   :  { %v1450_v58 = vadd.f32 %v6196_v53, %v1354_v20  ;;  %v1444_v59 = vpop.f32.mrb[13].mxu0 }
 0x838   :  { %v1445_v61 = vadd.f32 %v1444_v59, %v1354_v20  ;;  %7099 = vrot.lane.b32.xlu1 %v7098_v54, %s7515_s23  ;;  %6687 = vmatprep.subr.msk.bf16.mxu0 %vm7635_vm2, %v6685_v56 }
 0x839   :  { %6690 = vmatpush3.bf16.xpose.msk.msra.mxu0 %vm7635_vm2, %v6685_v56 }
 0x83a   :  { %v6182_v3 = vpop.f32.mrb[12].mxu1  ;;  %v7103_v4 = vpack.i.bf16 %v1450_v58, %v1445_v61  ;;  %v6691_v7 = vpack.c.bf16 %v1450_v58, %v1445_v61 }
 0x83b   :  { %v1327_v8 = vpop.f32.mrb[13].mxu1  ;;  %v1333_v13 = vadd.f32 %v6182_v3, %v7811_v62 }
 0x83c   :  { %v1328_v11 = vadd.f32 %v7811_v62, %v1327_v8  ;;  %7104 = vrot.lane.b32.xlu0 %v7103_v4, %s7515_s23  ;;  %7109 = vrot.lane.b32.xlu1 %v7098_v54, %s7517_s25 }
 0x83d   :  { %6693 = vmatprep.subr.msk.bf16.mxu0 %vm7635_vm2, %v6691_v7  ;;  %v1566_v15 = vmul.f32 0.35355338, %v1333_v13 }
 0x83e   :  { %v1565_v14 = vmul.f32 0.35355338, %v1328_v11 }
 0x840   :  { %6219 = vmatprep.mubr.msk.f32.mxu0 %vm304_vm1, %v1565_v14  ;;  %7114 = vrot.lane.b32.xlu0 %v7098_v54, %s7514_s0 }
 0x841   :  { %1569 = vrot.lane.b32.xlu1 %v1565_v14, %s7515_s23  ;;  %6696 = vmatpush3.bf16.xpose.msk.msra.mxu0 %vm7635_vm2, %v6691_v7 }
 0x842   :  { %v7903_v27 = vpop.f32.mrb[14].mxu1 }
 0x843   :  { %v7905_v31 = vpop.f32.mrb[15].mxu1 }
 0x844   :  { %1571 = vrot.lane.b32.xlu0 %v1566_v15, %s7515_s23 }
 0x845   :  { %7119 = vrot.lane.b32.xlu1 %v7103_v4, %s7517_s25 }
 0x846   :  { %v7914_v38 = vpop.f32.mrb[16].mxu1 }
 0x847   :  { %v7916_v57 = vpop.f32.mrb[17].mxu1 }
 0x848   :  { %7124 = vrot.lane.b32.xlu0 %v7103_v4, %s7514_s0  ;;  %6220 = vmatmul.mubr.msk.f32.vlgmr.msra.gmra.mrb[14].mxu0 %vm304_vm1, %v1566_v15 }
 0x849   :  { %1573 = vrot.lane.b32.xlu1 %v1565_v14, %s7517_s25 }
 0x84c   :  { %1575 = vrot.lane.b32.xlu0 %v1566_v15, %s7517_s25 }
 0x84d   :  { %1577 = vrot.lane.b32.xlu1 %v1565_v14, %s7514_s0 }
 0x850   :  { %1579 = vrot.lane.b32.xlu0 %v1566_v15, %s7514_s0 }
 0x8aa   :  { %v7100_v16 = vpop.permute.xlu1 %7099 }
 0x8ab   :  { %v7102_v2 = vunpack.i.h.bf16 %v7100_v16  ;;  %v7101_v17 = vunpack.i.l.bf16 %v7100_v16 }
 0x8ad   :  { %v6697_v0 = vpack.c.bf16 %v7102_v2, %v7101_v17 }
 0x8ae   :  { %v7105_v18 = vpop.permute.xlu0 %7104  ;;  %v7110_v21 = vpop.permute.xlu1 %7109 }
 0x8af   :  { %v7107_v23 = vunpack.i.h.bf16 %v7105_v18  ;;  %v7106_v24 = vunpack.i.l.bf16 %v7105_v18  ;;  %v7112_v25 = vunpack.i.h.bf16 %v7110_v21  ;;  %v7111_v26 = vunpack.i.l.bf16 %v7110_v21  ;;  %6699 = vmatprep.subr.msk.bf16.mxu1 %vm7635_vm2, %v6697_v0 }
 0x8b0   :  { %6702 = vmatpush3.bf16.xpose.msk.msra.mxu1 %vm7635_vm2, %v6697_v0 }
 0x8b1   :  { %v6703_v28 = vpack.c.bf16 %v7107_v23, %v7106_v24  ;;  %v6709_v29 = vpack.c.bf16 %v7112_v25, %v7111_v26 }
 0x8b2   :  { %v7115_v35 = vpop.permute.xlu0 %7114 }
 0x8b3   :  { %v7117_v12 = vunpack.i.h.bf16 %v7115_v35  ;;  %v7116_v36 = vunpack.i.l.bf16 %v7115_v35  ;;  %v1570_v37 = vpop.permute.xlu1 %1569  ;;  %6705 = vmatprep.subr.msk.bf16.mxu1 %vm7635_vm2, %v6703_v28  ;;  %6711 = vmatprep.subr.msk.bf16.mxu0 %vm7635_vm2, %v6709_v29 }
 0x8b4   :  { %6230 = vmatprep.mubr.msk.f32.mxu1 %vm304_vm1, %v1570_v37  ;;  %6714 = vmatpush3.bf16.xpose.msk.msra.mxu0 %vm7635_vm2, %v6709_v29 }
 0x8b5   :  { %v6721_v43 = vpack.c.bf16 %v7117_v12, %v7116_v36 }
 0x8b6   :  { %v1572_v40 = vpop.permute.xlu0 %1571 }
 0x8b7   :  { %v7120_v19 = vpop.permute.xlu1 %7119 }
 0x8b8   :  { %v7122_v20 = vunpack.i.h.bf16 %v7120_v19  ;;  %v7121_v5 = vunpack.i.l.bf16 %v7120_v19  ;;  %6708 = vmatpush3.bf16.xpose.msk.msra.mxu1 %vm7635_vm2, %v6703_v28 }
 0x8b9   :  { %6723 = vmatprep.subr.msk.bf16.mxu1 %vm7635_vm2, %v6721_v43 }
 0x8ba   :  { %v6715_v9 = vpack.c.bf16 %v7122_v20, %v7121_v5  ;;  %v7125_v45 = vpop.permute.xlu0 %7124 }
 0x8bb   :  { %v7127_v46 = vunpack.i.h.bf16 %v7125_v45  ;;  %v7126_v47 = vunpack.i.l.bf16 %v7125_v45  ;;  %v1574_v48 = vpop.permute.xlu1 %1573 }
 0x8bc   :  { %6717 = vmatprep.subr.msk.bf16.mxu0 %vm7635_vm2, %v6715_v9  ;;  %6241 = vmatprep.mubr.msk.f32.mxu0 %vm304_vm1, %v1574_v48 }
 0x8bd   :  { %6720 = vmatpush3.bf16.xpose.msk.msra.mxu0 %vm7635_vm2, %v6715_v9  ;;  %v6727_v49 = vpack.c.bf16 %v7127_v46, %v7126_v47 }
 0x8be   :  { %v1576_v6 = vpop.permute.xlu0 %1575 }
 0x8bf   :  { %v1578_v50 = vpop.permute.xlu1 %1577  ;;  %6231 = vmatmul.mubr.msk.f32.vlgmr.msra.gmra.mrb[18].mxu1 %vm304_vm1, %v1572_v40 }
 0x8c0   :  { %6726 = vmatpush3.bf16.xpose.msk.msra.mxu1 %vm7635_vm2, %v6721_v43  ;;  %6252 = vmatprep.mubr.msk.f32.mxu1 %vm304_vm1, %v1578_v50 }
 0x8c1   :  { %6729 = vmatprep.subr.msk.bf16.mxu1 %vm7635_vm2, %v6727_v49 }
 0x8c2   :  { %v1580_v10 = vpop.permute.xlu0 %1579 }
 0x8c4   :  { %6242 = vmatmul.mubr.msk.f32.vlgmr.msra.gmra.mrb[16].mxu0 %vm304_vm1, %v1576_v6 }
 0x8c8   :  { %6732 = vmatpush3.bf16.xpose.msk.msra.mxu1 %vm7635_vm2, %v6727_v49 }
 0x8cf   :  { %6253 = vmatmul.mubr.msk.f32.vlgmr.msra.gmra.mrb[20].mxu1 %vm304_vm1, %v1580_v10 }
 0x91b   :  { %v6221_v51 = vpop.f32.mrb[14].mxu0 }
 0x91c   :  { %v1998_v52 = vsel %vm7674_vm3, %v6221_v51, -1e+30  ;;  %v1727_v53 = vpop.f32.mrb[15].mxu0 }
 0x91d   :  { %v1997_v54 = vsel %vm7680_vm4, %v1727_v53, -1e+30  ;;  %v2008_v56 = vsel %vm67_vm0, %v1998_v52, -inf }
 0x91e   :  { %2009 = vmax.xlane.f32.xlu0 %v2008_v56  ;;  %v2005_v58 = vsel %vm67_vm0, %v1997_v54, -inf }
 0x91f   :  { %2006 = vmax.xlane.f32.xlu1 %v2005_v58 }
 0x992   :  { %v6232_v59 = vpop.f32.mrb[18].mxu1 }
 0x993   :  { %v2000_v61 = vsel %vm7674_vm3, %v6232_v59, -1e+30  ;;  %v1814_v3 = vpop.f32.mrb[19].mxu1 }
 0x994   :  { %v2014_v4 = vsel %vm67_vm0, %v2000_v61, -inf  ;;  %v1999_v15 = vsel %vm7680_vm4, %v1814_v3, -1e+30 }
 0x995   :  { %2015 = vmax.xlane.f32.xlu0 %v2014_v4  ;;  %v2011_v2 = vsel %vm67_vm0, %v1999_v15, -inf }
 0x997   :  { %v6243_v7 = vpop.f32.mrb[16].mxu0 }
 0x998   :  { %v2002_v8 = vsel %vm7674_vm3, %v6243_v7, -1e+30  ;;  %v1901_v11 = vpop.f32.mrb[17].mxu0 }
 0x999   :  { %v2001_v13 = vsel %vm7680_vm4, %v1901_v11, -1e+30  ;;  %v2020_v14 = vsel %vm67_vm0, %v2002_v8, -inf }
 0x99a   :  { %2021 = vmax.xlane.f32.xlu0 %v2020_v14  ;;  %v2017_v16 = vsel %vm67_vm0, %v2001_v13, -inf }
 0x99b   :  { %2018 = vmax.xlane.f32.xlu1 %v2017_v16 }
 0x99e   :  { %2012 = vmax.xlane.f32.xlu0 %v2011_v2 }
 0x9a2   :  { %v6254_v17 = vpop.f32.mrb[20].mxu1 }
 0x9a3   :  { %v7957_v0 = vsel %vm7674_vm3, %v6254_v17, -1e+30  ;;  %v1988_v18 = vpop.f32.mrb[21].mxu1 }
 0x9a4   :  { %v7961_v21 = vsel %vm7680_vm4, %v1988_v18, -1e+30  ;;  %v2026_v23 = vsel %vm67_vm0, %v7957_v0, -inf }
 0x9a5   :  { %2027 = vmax.xlane.f32.xlu0 %v2026_v23  ;;  %v2023_v24 = vsel %vm67_vm0, %v7961_v21, -inf }
 0x9a6   :  { %2024 = vmax.xlane.f32.xlu1 %v2023_v24 }
 0x9ac   :  { %v2007_v25 = vpop.xlane.xlu1 %2006 }
 0x9ad   :  { %v2029_v48 = vsub.f32 %v1997_v54, %v2007_v25 }
 0x9af   :  { %v2037_v49 = vmul.f32 1.442695, %v2029_v48 }
 0x9b7   :  { %1465 = vrot.lane.b32.xlu1 %v7811_v62, %s7516_s24 }
 0xa28   :  { %v2019_v26 = vpop.xlane.xlu1 %2018 }
 0xa29   :  { %v2033_v28 = vsub.f32 %v2001_v13, %v2019_v26 }
 0xa2b   :  { %v2045_v29 = vmul.f32 1.442695, %v2033_v28 }
 0xa2d   :  { %7364 = vpow2.f32 %v2045_v29 }
 0xa33   :  { %v2025_v35 = vpop.xlane.xlu1 %2024 }
 0xa34   :  { %v2035_v2 = vsub.f32 %v7961_v21, %v2025_v35 }
 0xa36   :  { %v2049_v17 = vmul.f32 1.442695, %v2035_v2 }
 0xa37   :  { %v7969_v12 = vpop.eup %7364  ;;  %v1466_v36 = vpop.permute.xlu1 %1465 }
 0xa38   :  { %v1547_v37 = vadd.f32 %v7905_v31, %v1466_v36  ;;  %v1552_v40 = vadd.f32 %v7903_v27, %v1466_v36  ;;  %v1557_v43 = vadd.f32 %v7916_v57, %v1466_v36  ;;  %v1562_v19 = vadd.f32 %v7914_v38, %v1466_v36  ;;  %v2010_v31 = vpop.xlane.xlu0 %2009 }
 0xa39   :  { %v2065_v20 = vsel %vm67_vm0, %v7969_v12, 0.0  ;;  %v2030_v27 = vsub.f32 %v1998_v52, %v2010_v31 }
 0xa3a   :  { %2066 = vadd.xlane.f32.xlu1 %v2065_v20  ;;  %v7128_v5 = vpack.i.bf16 %v1552_v40, %v1547_v37  ;;  %v6733_v9 = vpack.c.bf16 %v1552_v40, %v1547_v37  ;;  %v6737_v45 = vpack.c.bf16 %v1562_v19, %v1557_v43  ;;  %v7133_v46 = vpack.i.bf16 %v1562_v19, %v1557_v43 }
 0xa3b   :  { %v2039_v57 = vmul.f32 1.442695, %v2030_v27 }
 0xa3c   :  { %7129 = vrot.lane.b32.xlu0 %v7128_v5, %s7515_s23  ;;  %6734 = vmatprep.subr.bf16.mxu0 %v6733_v9  ;;  %v2016_v47 = vpop.xlane.xlu0 %2015 }
 0xa3d   :  { %6736 = vmatpush3.bf16.msra.mxu0 %v6733_v9  ;;  %7366 = vpow2.f32 %v2039_v57  ;;  %v2032_v50 = vsub.f32 %v2000_v61, %v2016_v47 }
 0xa3e   :  { %6738 = vmatprep.subr.bf16.mxu0 %v6737_v45  ;;  %7368 = vpow2.f32 %v2037_v49 }
 0xa3f   :  { %v2043_v6 = vmul.f32 1.442695, %v2032_v50 }
 0xa40   :  { %v2022_v38 = vpop.xlane.xlu0 %2021 }
 0xa41   :  { %6740 = vmatpush3.bf16.msra.mxu0 %v6737_v45  ;;  %v2034_v10 = vsub.f32 %v2002_v8, %v2022_v38  ;;  %7370 = vpow2.f32 %v2043_v6 }
 0xa43   :  { %v2047_v53 = vmul.f32 1.442695, %v2034_v10 }
 0xa44   :  { %v2013_v51 = vpop.xlane.xlu0 %2012 }
 0xa45   :  { %v2031_v56 = vsub.f32 %v1999_v15, %v2013_v51  ;;  %7372 = vpow2.f32 %v2047_v53 }
 0xa47   :  { %v7367_v58 = vpop.eup %7366  ;;  %v2041_v59 = vmul.f32 1.442695, %v2031_v56 }
 0xa48   :  { %v2056_v52 = vsel %vm67_vm0, %v7367_v58, 0.0  ;;  %v7369_v3 = vpop.eup %7368  ;;  %v2028_v14 = vpop.xlane.xlu0 %2027 }
 0xa49   :  { %7374 = vpow2.f32 %v2041_v59  ;;  %v2053_v54 = vsel %vm67_vm0, %v7369_v3, 0.0  ;;  %v2036_v15 = vsub.f32 %v7957_v0, %v2028_v14 }
 0xa4b   :  { %7134 = vrot.lane.b32.xlu1 %v7133_v46, %s7515_s23  ;;  %v7981_v4 = vpop.eup %7370  ;;  %v2051_v16 = vmul.f32 1.442695, %v2036_v15 }
 0xa4c   :  { %v2062_v61 = vsel %vm67_vm0, %v7981_v4, 0.0 }
 0xa4d   :  { %7376 = vpow2.f32 %v2051_v16 }
 0xa4e   :  { %7378 = vpow2.f32 %v2049_v17 }
 0xa4f   :  { %v7985_v7 = vpop.eup %7372  ;;  %7164 = vrot.lane.b32.xlu1 %v7779_v44, %s7519_s27 }
 0xa50   :  { %v2068_v8 = vsel %vm67_vm0, %v7985_v7, 0.0 }
 0xa53   :  { %v7989_v11 = vpop.eup %7374 }
 0xa54   :  { %v2059_v13 = vsel %vm67_vm0, %v7989_v11, 0.0 }
 0xa57   :  { %v7998_v18 = vpop.eup %7376 }
 0xa58   :  { %v2074_v23 = vsel %vm67_vm0, %v7998_v18, 0.0  ;;  %v8002_v24 = vpop.eup %7378 }
 0xa59   :  { %v2071_v25 = vsel %vm67_vm0, %v8002_v24, 0.0 }
 0xa5b   :  { %2057 = vadd.xlane.f32.xlu0 %v2056_v52 }
 0xa5f   :  { %2054 = vadd.xlane.f32.xlu0 %v2053_v54 }
 0xa63   :  { %2063 = vadd.xlane.f32.xlu0 %v2062_v61 }
 0xa67   :  { %2069 = vadd.xlane.f32.xlu0 %v2068_v8 }
 0xa6b   :  { %2060 = vadd.xlane.f32.xlu0 %v2059_v13 }
 0xa81   :  { %7139 = vrot.lane.b32.xlu0 %v7128_v5, %s7517_s25 }
 0xa85   :  { %7144 = vrot.lane.b32.xlu0 %v7128_v5, %s7514_s0 }
 0xa89   :  { %7149 = vrot.lane.b32.xlu0 %v7133_v46, %s7517_s25 }
 0xaa8   :  { %2075 = vadd.xlane.f32.xlu0 %v2074_v23 }
 0xaac   :  { %2072 = vadd.xlane.f32.xlu0 %v2071_v25 }
 0xaae   :  { %v7130_v26 = vpop.permute.xlu0 %7129 }
 0xaaf   :  { %v7132_v0 = vunpack.i.h.bf16 %v7130_v26  ;;  %v7131_v28 = vunpack.i.l.bf16 %v7130_v26 }
 0xab1   :  { %v6741_v29 = vpack.c.bf16 %v7132_v0, %v7131_v28 }
 0xab3   :  { %6742 = vmatprep.subr.bf16.mxu1 %v6741_v29 }
 0xab4   :  { %6744 = vmatpush3.bf16.msra.mxu1 %v6741_v29 }
 0xac2   :  { %7154 = vrot.lane.b32.xlu0 %v7133_v46, %s7514_s0 }
 0xac6   :  { %7159 = vrot.lane.b32.xlu0 %v7791_v55, %s7519_s27 }
 0xac7   :  { %v2067_v21 = vpop.xlane.xlu1 %2066 }
 0xac8   :  { %7380 = vrcp.f32 %v2067_v21 }
 0xacb   :  { %v7135_v35 = vpop.permute.xlu1 %7134 }
 0xacc   :  { %v7137_v36 = vunpack.i.h.bf16 %v7135_v35  ;;  %v7136_v37 = vunpack.i.l.bf16 %v7135_v35 }
 0xace   :  { %v6745_v40 = vpack.c.bf16 %v7137_v36, %v7136_v37 }
 0xacf   :  { %v7165_v28 = vpop.permute.xlu1 %7164 }
 0xad0   :  { %6746 = vmatprep.subr.bf16.mxu1 %v6745_v40  ;;  %v7167_v21 = vunpack.i.h.bf16 %v7165_v28  ;;  %v7166_v35 = vunpack.i.l.bf16 %v7165_v28  ;;  %v2593_v28 = vld [vmem:[%s8635_s6 + $0x18] sm:$0xff] }
 0xad1   :  { %6748 = vmatpush3.bf16.msra.mxu1 %v6745_v40 }
 0xad2   :  { %v7381_v9 = vpop.eup %7380 }
 0xad3   :  { %v2086_v57 = vmul.f32 %v7381_v9, %v7969_v12 }
 0xae8   :  { %v2058_v43 = vpop.xlane.xlu0 %2057 }
 0xae9   :  { %7382 = vrcp.f32 %v2058_v43 }
 0xaec   :  { %v2055_v19 = vpop.xlane.xlu0 %2054 }
 0xaed   :  { %7384 = vrcp.f32 %v2055_v19 }
 0xaf0   :  { %v2064_v20 = vpop.xlane.xlu0 %2063 }
 0xaf1   :  { %7386 = vrcp.f32 %v2064_v20 }
 0xaf3   :  { %v7383_v45 = vpop.eup %7382 }
 0xaf4   :  { %v2070_v5 = vpop.xlane.xlu0 %2069  ;;  %v2080_v47 = vmul.f32 %v7383_v45, %v7367_v58 }
 0xaf7   :  { %v7385_v31 = vpop.eup %7384 }
 0xaf8   :  { %v2061_v27 = vpop.xlane.xlu0 %2060  ;;  %v2078_v46 = vmul.f32 %v7385_v31, %v7369_v3 }
 0xaf9   :  { %7388 = vrcp.f32 %v2061_v27 }
 0xafa   :  { %6263 = vmatprep.mubr.msk.f32.mxu0 %vm67_vm0, %v2078_v46  ;;  %7390 = vrcp.f32 %v2070_v5 }
 0xafb   :  { %6264 = vmatmul.mubr.msk.f32.vlgmr.msra.gmra.mrb[18].mxu0 %vm67_vm0, %v2080_v47  ;;  %v7387_v53 = vpop.eup %7386 }
 0xafc   :  { %v7140_v48 = vpop.permute.xlu0 %7139  ;;  %6285 = vmatprep.mubr.msk.f32.mxu0 %vm67_vm0, %v2086_v57  ;;  %v2084_v54 = vmul.f32 %v7387_v53, %v7981_v4 }
 0xafd   :  { %v7142_v38 = vunpack.i.h.bf16 %v7140_v48  ;;  %v7141_v49 = vunpack.i.l.bf16 %v7140_v48 }
 0xaff   :  { %v6749_v50 = vpack.c.bf16 %v7142_v38, %v7141_v49 }
 0xb00   :  { %v7145_v6 = vpop.permute.xlu0 %7144 }
 0xb01   :  { %v7147_v10 = vunpack.i.h.bf16 %v7145_v6  ;;  %v7146_v51 = vunpack.i.l.bf16 %v7145_v6  ;;  %6750 = vmatprep.subr.bf16.mxu0 %v6749_v50 }
 0xb02   :  { %6752 = vmatpush3.bf16.msra.mxu0 %v6749_v50 }
 0xb03   :  { %v7389_v56 = vpop.eup %7388  ;;  %v6757_v58 = vpack.c.bf16 %v7147_v10, %v7146_v51 }
 0xb04   :  { %v7150_v59 = vpop.permute.xlu0 %7149  ;;  %v2082_v12 = vmul.f32 %v7389_v56, %v7989_v11  ;;  %v7391_v8 = vpop.eup %7390 }
 0xb05   :  { %v7152_v52 = vunpack.i.h.bf16 %v7150_v59  ;;  %v7151_v3 = vunpack.i.l.bf16 %v7150_v59  ;;  %6758 = vmatprep.subr.bf16.mxu1 %v6757_v58  ;;  %v2088_v13 = vmul.f32 %v7391_v8, %v7985_v7 }
 0xb06   :  { %6274 = vmatprep.mubr.msk.f32.mxu1 %vm67_vm0, %v2082_v12 }
 0xb07   :  { %6275 = vmatmul.mubr.msk.f32.vlgmr.msra.gmra.mrb[22].mxu1 %vm67_vm0, %v2084_v54  ;;  %v6753_v61 = vpack.c.bf16 %v7152_v52, %v7151_v3 }
 0xb08   :  { %6760 = vmatpush3.bf16.msra.mxu1 %v6757_v58 }
 0xb09   :  { %6754 = vmatprep.subr.bf16.mxu0 %v6753_v61 }
 0xb0a   :  { %6756 = vmatpush3.bf16.msra.mxu0 %v6753_v61 }
 0xb0d   :  { %6286 = vmatmul.mubr.msk.f32.vlgmr.msra.gmra.mrb[20].mxu0 %vm67_vm0, %v2088_v13 }
 0xb35   :  { %v2076_v14 = vpop.xlane.xlu0 %2075 }
 0xb36   :  { %7392 = vrcp.f32 %v2076_v14 }
 0xb39   :  { %v2073_v11 = vpop.xlane.xlu0 %2072 }
 0xb3a   :  { %7394 = vrcp.f32 %v2073_v11 }
 0xb3d   :  { %v7155_v15 = vpop.permute.xlu0 %7154 }
 0xb3e   :  { %v7157_v16 = vunpack.i.h.bf16 %v7155_v15  ;;  %v7156_v4 = vunpack.i.l.bf16 %v7155_v15 }
 0xb40   :  { %v6761_v2 = vpack.c.bf16 %v7157_v16, %v7156_v4  ;;  %v7393_v17 = vpop.eup %7392  ;;  %v2586_v16 = vld [vmem:[%s8634_s5 + $0x8] sm:$0xff] }
 0xb41   :  { %v2092_v26 = vmul.f32 %v7393_v17, %v7998_v18  ;;  %v7160_v29 = vpop.permute.xlu0 %7159  ;;  %v6769_v18 = vpack.c.bf16 %v7167_v21, %v7166_v35  ;;  %v2588_v17 = vld [vmem:[%s8634_s5 + $0x18] sm:$0xff]  ;;  %v2594_v21 = vld [vmem:[%s8635_s6 + $0x20] sm:$0xff]  ;;  %v2595_v35 = vld [vmem:[%s8635_s6 + $0x28] sm:$0xff] }
 0xb42   :  { %6762 = vmatprep.subr.bf16.mxu1 %v6761_v2  ;;  %v7162_v36 = vunpack.i.h.bf16 %v7160_v29 }
 0xb43   :  { %6764 = vmatpush3.bf16.msra.mxu1 %v6761_v2  ;;  %v2587_v2 = vld [vmem:[%s8634_s5 + $0x10] sm:$0xff] }
 0xb44   :  { %v7395_v23 = vpop.eup %7394 }
 0xb45   :  { %v2090_v25 = vmul.f32 %v7395_v23, %v8002_v24  ;;  %v7161_v24 = vunpack.i.l.bf16 %v7160_v29  ;;  %v6777_v23 = vpack.c.bf16 %v2588_v17, %v2587_v2 }
 0xb47   :  { %6296 = vmatprep.mubr.msk.f32.mxu1 %vm67_vm0, %v2090_v25  ;;  %v6765_v37 = vpack.c.bf16 %v7162_v36, %v7161_v24  ;;  %v2590_v25 = vld [vmem:[%s8635_s6] sm:$0xff]  ;;  %v6789_v36 = vpack.c.bf16 %v2595_v35, %v2594_v21 }
 0xb48   :  { %6297 = vmatmul.mubr.msk.f32.vlgmr.msra.gmra.mrb[24].mxu1 %vm67_vm0, %v2092_v26  ;;  %v2591_v26 = vld [vmem:[%s8635_s6 + $0x8] sm:$0xff] }
 0xb49   :  { %6766 = vmatprep.subr.bf16.mxu0 %v6765_v37 }
 0xb4a   :  { %6768 = vmatpush3.bf16.msra.mxu0 %v6765_v37 }
 0xb4b   :  { %6770 = vmatprep.subr.bf16.mxu0 %v6769_v18 }
 0xb4e   :  { %6772 = vmatpush3.bf16.msra.mxu0 %v6769_v18 }
 0xbce   :  { %v6265_v7 = vpop.f32.mrb[18].mxu0 }
 0xbcf   :  { %v2165_v0 = vpop.f32.mrb[19].mxu0 }
 0xbda   :  { %v6276_v40 = vpop.f32.mrb[22].mxu1 }
 0xbdb   :  { %2421 = vrot.lane.b32.xlu1 %v6276_v40, %s7520_s28  ;;  %v2246_v44 = vpop.f32.mrb[23].mxu1 }
 0xbdc   :  { %2419 = vrot.lane.b32.xlu0 %v2246_v44, %s7520_s28 }
 0xbe0   :  { %v6287_v55 = vpop.f32.mrb[20].mxu0 }
 0xbe1   :  { %v2327_v43 = vpop.f32.mrb[21].mxu0  ;;  %2429 = vrot.lane.b32.xlu1 %v6287_v55, %s7521_s29 }
 0xbe2   :  { %2427 = vrot.lane.b32.xlu0 %v2327_v43, %s7521_s29  ;;  %v5681_v43 = vld [vmem:[%s8636_s7 + $0x2] sm:$0x3] }
 0xc1b   :  { %v6298_v19 = vpop.f32.mrb[24].mxu1 }
 0xc1c   :  { %2437 = vrot.lane.b32.xlu1 %v6298_v19, %s7522_s30  ;;  %v2408_v20 = vpop.f32.mrb[25].mxu1  ;;  %v2576_v19 = vrot.slane %v5681_v43, %v7820_v22 }
 0xc1d   :  { %2435 = vrot.lane.b32.xlu0 %v2408_v20, %s7522_s30 }
 0xc21   :  { %2459 = vrot.lane.b32.xlu0 %v7811_v62, %s7519_s27 }
 0xc4d   :  { %v2422_v5 = vpop.permute.xlu1 %2421 }
 0xc4e   :  { %v2420_v9 = vpop.permute.xlu0 %2419  ;;  %v2442_v47 = vsel %vm304_vm1, %v6265_v7, %v2422_v5  ;;  %v2592_v7 = vld [vmem:[%s8635_s6 + $0x10] sm:$0xff] }
 0xc4f   :  { %v2441_v27 = vsel %vm304_vm1, %v2165_v0, %v2420_v9  ;;  %v6781_v0 = vpack.c.bf16 %v2591_v26, %v2590_v25  ;;  %v6785_v29 = vpack.c.bf16 %v2593_v28, %v2592_v7  ;;  %v5689_v25 = vld [vmem:[%s8633_s4 + $0x50] sm:$0xff]  ;;  %v5690_v26 = vld [vmem:[%s8633_s4 + $0x58] sm:$0xff]  ;;  %v5691_v7 = vld [vmem:[%s8633_s4 + $0x60] sm:$0xff] }
 0xc50   :  { %v5692_v28 = vld [vmem:[%s8633_s4 + $0x68] sm:$0xff] }
 0xc51   :  { %6782 = vmatprep.subr.bf16.mxu0 %v6781_v0 }
 0xc53   :  { %v2430_v45 = vpop.permute.xlu1 %2429 }
 0xc54   :  { %v2428_v31 = vpop.permute.xlu0 %2427  ;;  %v2444_v38 = vsel %vm661_vm5, %v2442_v47, %v2430_v45 }
 0xc55   :  { %v2443_v57 = vsel %vm661_vm5, %v2441_v27, %v2428_v31  ;;  %v2582_v31 = vrot.slane %v5681_v43, %v7839_v30 }
 0xc8e   :  { %v2438_v46 = vpop.permute.xlu1 %2437 }
 0xc8f   :  { %v2436_v48 = vpop.permute.xlu0 %2435  ;;  %v2446_v50 = vsel %vm1102_vm6, %v2444_v38, %v2438_v46  ;;  %v2597_v38 = vld [vmem:[%s8635_s6 + $0x38] sm:$0xff] }
 0xc90   :  { %v2445_v49 = vsel %vm1102_vm6, %v2443_v57, %v2436_v48  ;;  %v2596_v48 = vld [vmem:[%s8635_s6 + $0x30] sm:$0xff] }
 0xc91   :  { %6307 = vmatprep.mubr.msk.f32.mxu0 %vm67_vm0, %v2445_v49  ;;  %v6793_v49 = vpack.c.bf16 %v2597_v38, %v2596_v48  ;;  %v8144_v38 = vld [vmem:[%s8633_s4 + $0x70] ss:$0 sm:$0xff] }
 0xc92   :  { %6308 = vmatmul.mubr.msk.f32.vlgmr.msra.gmra.mrb[22].mxu0 %vm67_vm0, %v2446_v50  ;;  %v5682_v50 = vld [vmem:[%s8634_s5 + $0x20] ss:$0 sm:$0xff] }
 0xc93   :  { %v2460_v62 = vpop.permute.xlu0 %2459  ;;  %6784 = vmatpush3.bf16.msra.mxu0 %v6781_v0  ;;  %v6797_v0 = vpack.c.bf16 %v5690_v26, %v5689_v25 }
 0xc94   :  { %6786 = vmatprep.subr.bf16.mxu0 %v6785_v29 }
 0xc97   :  { %6788 = vmatpush3.bf16.msra.mxu0 %v6785_v29  ;;  %v6801_v29 = vpack.c.bf16 %v5692_v28, %v5691_v7 }
 0xc98   :  { %6790 = vmatprep.subr.bf16.mxu0 %v6789_v36 }
 0xc9b   :  { %6792 = vmatpush3.bf16.msra.mxu0 %v6789_v36 }
 0xc9c   :  { %6794 = vmatprep.subr.bf16.mxu0 %v6793_v49 }
 0xc9f   :  { %6796 = vmatpush3.bf16.msra.mxu0 %v6793_v49 }
 0xd65   :  { %v6309_v6 = vpop.f32.mrb[22].mxu0 }
 0xd66   :  { %v2540_v10 = vadd.f32 %v6309_v6, %v2460_v62  ;;  %v2534_v51 = vpop.f32.mrb[23].mxu0 }
 0xd67   :  { %v2535_v53 = vadd.f32 %v2534_v51, %v2460_v62 }
 0xd68   :  { %v2544_v56 = vadd.f32 %v2540_v10, %v7858_v41 }
 0xd69   :  { %v2543_v58 = vadd.f32 %v2535_v53, %v7860_v42  ;;  %v2585_v42 = vld [vmem:[%s8634_s5] sm:$0xff] }
 0xd6a   :  { %v2550_v59 = vsel %vm67_vm0, %v2544_v56, 0.0  ;;  %v6773_v4 = vpack.c.bf16 %v2586_v16, %v2585_v42 }
 0xd6b   :  { %2551 = vadd.xlane.f32.xlu0 %v2550_v59  ;;  %v2547_v12 = vsel %vm67_vm0, %v2543_v58, 0.0 }
 0xd6c   :  { %2548 = vadd.xlane.f32.xlu1 %v2547_v12  ;;  %6774 = vmatprep.subr.bf16.mxu1 %v6773_v4 }
 0xd6d   :  { %6776 = vmatpush3.bf16.msra.mxu1 %v6773_v4 }
 0xd6e   :  { %6778 = vmatprep.subr.bf16.mxu1 %v6777_v23 }
 0xd71   :  { %6780 = vmatpush3.bf16.msra.mxu1 %v6777_v23 }
 0xd72   :  { %6798 = vmatprep.subr.bf16.mxu1 %v6797_v0 }
 0xdf8   :  { %v2552_v52 = vpop.xlane.xlu0 %2551 }
 0xdf9   :  { %v2554_v3 = vmul.f32 0.03125, %v2552_v52  ;;  %v2549_v54 = vpop.xlane.xlu1 %2548 }
 0xdfa   :  { %v2553_v61 = vmul.f32 0.03125, %v2549_v54 }
 0xdfb   :  { %v2556_v8 = vsub.f32 %v2544_v56, %v2554_v3 }
 0xdfc   :  { %v2555_v13 = vsub.f32 %v2543_v58, %v2553_v61  ;;  %v5685_v58 = vld [vmem:[%s8635_s6 + $0x40] ss:$0 sm:$0xff] }
 0xdfd   :  { %v2558_v14 = vmul.f32 %v2556_v8, %v2556_v8 }
 0xdfe   :  { %v2557_v11 = vmul.f32 %v2555_v13, %v2555_v13 }
 0xdff   :  { %v2562_v15 = vsel %vm67_vm0, %v2558_v14, 0.0 }
 0xe00   :  { %2563 = vadd.xlane.f32.xlu1 %v2562_v15  ;;  %v2559_v41 = vsel %vm67_vm0, %v2557_v11, 0.0 }
 0xe01   :  { %2560 = vadd.xlane.f32.xlu0 %v2559_v41 }
 0xe8d   :  { %v2564_v24 = vpop.xlane.xlu1 %2563 }
 0xe8e   :  { %v2566_v37 = vmul.f32 0.03125, %v2564_v24  ;;  %v2561_v18 = vpop.xlane.xlu0 %2560 }
 0xe8f   :  { %v2565_v40 = vmul.f32 0.03125, %v2561_v18 }
 0xe90   :  { %v2568_v44 = vadd.f32 1e-05, %v2566_v37 }
 0xe91   :  { %v2567_v55 = vadd.f32 1e-05, %v2565_v40  ;;  %v5688_v40 = vld [vmem:[%s8636_s7 + $0x4] sm:$0x3] }
 0xe92   :  { %7396 = vrsqrt.f32 %v2568_v44  ;;  %v2805_v44 = vrot.slane %v5688_v40, %v7820_v22 }
 0xe93   :  { %7398 = vrsqrt.f32 %v2567_v55 }
 0xe9c   :  { %v7397_v20 = vpop.eup %7396 }
 0xe9d   :  { %v7399_v5 = vpop.eup %7398  ;;  %v2572_v9 = vmul.f32 %v7397_v20, %v2556_v8  ;;  %v2811_v20 = vrot.slane %v5688_v40, %v7839_v30 }
 0xe9e   :  { %v2571_v45 = vmul.f32 %v7399_v5, %v2555_v13 }
 0xe9f   :  { %v2578_v27 = vmul.f32 %v2576_v19, %v2572_v9 }
 0xea0   :  { %v2577_v46 = vmul.f32 %v2576_v19, %v2571_v45 }
 0xea1   :  { %v2584_v57 = vadd.f32 %v2582_v31, %v2578_v27 }
 0xea2   :  { %v2583_v47 = vadd.f32 %v2582_v31, %v2577_v46  ;;  %v8126_v46 = vld [vmem:[%s8631_s2] sm:$0xff] }
 0xea4   :  { %6318 = vmatprep.mubr.msk.f32.mxu1 %vm67_vm0, %v2583_v47 }
 0xea5   :  { %6319 = vmatmul.mubr.msk.f32.vlgmr.msra.gmra.mrb[26].mxu1 %vm67_vm0, %v2584_v57 }
 0xea6   :  { %6800 = vmatpush3.bf16.msra.mxu1 %v6797_v0 }
 0xea7   :  { %6802 = vmatprep.subr.bf16.mxu1 %v6801_v29 }
 0xeaa   :  { %6804 = vmatpush3.bf16.msra.mxu1 %v6801_v29 }
 0xf78   :  { %v6320_v62 = vpop.f32.mrb[26].mxu1 }
 0xf79   :  { %v2681_v6 = vadd.f32 %v6320_v62, %v5682_v50  ;;  %v2675_v10 = vpop.f32.mrb[27].mxu1 }
 0xf7a   :  { %v2676_v51 = vadd.f32 %v5682_v50, %v2675_v10 }
 0xf7b   :  { %v2685_v56 = vmax.f32 %v2681_v6, 0.0 }
 0xf7c   :  { %v2684_v53 = vmax.f32 %v2676_v51, 0.0 }
 0xf7e   :  { %6337 = vmatprep.mubr.msk.f32.mxu0 %vm2690_vm7, %v2684_v53  ;;  %v8150_v53 = vpack.i.bf16 %v5690_v26, %v5689_v25 }
 0xf7f   :  { %6338 = vmatmul.mubr.msk.f32.vlgmr.msra.gmra.mrb[24].mxu0 %vm2690_vm7, %v2685_v56  ;;  %v8156_v56 = vpack.i.bf16 %v5692_v28, %v5691_v7 }
0x1052   :  { %v6339_v59 = vpop.f32.mrb[24].mxu0 }
0x1053   :  { %v2769_v12 = vadd.f32 %v6339_v59, %v5685_v58  ;;  %v2763_v52 = vpop.f32.mrb[25].mxu0 }
0x1054   :  { %v2764_v3 = vadd.f32 %v5685_v58, %v2763_v52 }
0x1055   :  { %v2773_v54 = vadd.f32 %v2769_v12, %v2584_v57  ;;  %v8133_v57 = vld [vmem:[%s8631_s2 + $0x8] sm:$0xff] }
0x1056   :  { %v2772_v61 = vadd.f32 %v2764_v3, %v2583_v47 }
0x1057   :  { %v2779_v8 = vsel %vm67_vm0, %v2773_v54, 0.0 }
0x1058   :  { %2780 = vadd.xlane.f32.xlu1 %v2779_v8  ;;  %v2776_v13 = vsel %vm67_vm0, %v2772_v61, 0.0 }
0x1059   :  { %2777 = vadd.xlane.f32.xlu0 %v2776_v13 }
0x10e5   :  { %v2781_v14 = vpop.xlane.xlu1 %2780 }
0x10e6   :  { %v2783_v11 = vmul.f32 0.03125, %v2781_v14  ;;  %v2778_v15 = vpop.xlane.xlu0 %2777 }
0x10e7   :  { %v2782_v41 = vmul.f32 0.03125, %v2778_v15 }
0x10e8   :  { %v2785_v42 = vsub.f32 %v2773_v54, %v2783_v11 }
0x10e9   :  { %v2784_v16 = vsub.f32 %v2772_v61, %v2782_v41 }
0x10ea   :  { %v2787_v4 = vmul.f32 %v2785_v42, %v2785_v42 }
0x10eb   :  { %v2786_v2 = vmul.f32 %v2784_v16, %v2784_v16 }
0x10ec   :  { %v2791_v17 = vsel %vm67_vm0, %v2787_v4, 0.0 }
0x10ed   :  { %2792 = vadd.xlane.f32.xlu1 %v2791_v17  ;;  %v2788_v23 = vsel %vm67_vm0, %v2786_v2, 0.0 }
0x10ee   :  { %2789 = vadd.xlane.f32.xlu0 %v2788_v23 }
0x117a   :  { %v2793_v21 = vpop.xlane.xlu1 %2792 }
0x117b   :  { %v2795_v35 = vmul.f32 0.03125, %v2793_v21  ;;  %v2790_v36 = vpop.xlane.xlu0 %2789 }
0x117c   :  { %v2794_v24 = vmul.f32 0.03125, %v2790_v36 }
0x117d   :  { %v2797_v37 = vadd.f32 1e-05, %v2795_v35 }
0x117e   :  { %v2796_v18 = vadd.f32 1e-05, %v2794_v24 }
0x117f   :  { %7400 = vrsqrt.f32 %v2797_v37 }
0x1180   :  { %7402 = vrsqrt.f32 %v2796_v18 }
0x1189   :  { %v7401_v55 = vpop.eup %7400 }
0x118a   :  { %v7403_v43 = vpop.eup %7402  ;;  %v2801_v19 = vmul.f32 %v7401_v55, %v2785_v42 }
0x118b   :  { %v2800_v5 = vmul.f32 %v7403_v43, %v2784_v16 }
0x118c   :  { %v2807_v9 = vmul.f32 %v2805_v44, %v2801_v19 }
0x118d   :  { %v2806_v45 = vmul.f32 %v2805_v44, %v2800_v5 }
0x118e   :  { %v8119_v31 = vadd.f32 %v2811_v20, %v2807_v9 }
0x118f   :  { %v8121_v27 = vadd.f32 %v2811_v20, %v2806_v45 }
0x1190   :  { %v2815_v48 = vadd.f32 %v8133_v57, %v8119_v31 }
0x1191   :  { %v2814_v47 = vadd.f32 %v8126_v46, %v8121_v27 }
0x1193   :  { %6348 = vmatprep.mubr.msk.f32.mxu1 %vm67_vm0, %v2814_v47 }
0x1194   :  { %6349 = vmatmul.mubr.msk.f32.vlgmr.msra.gmra.mrb[28].mxu1 %vm67_vm0, %v2815_v48 }
0x1195   :  { %6359 = vmatprep.mubr.msk.f32.mxu1 %vm67_vm0, %v8121_v27 }
0x1267   :  { %v6350_v49 = vpop.f32.mrb[28].mxu1 }
0x1268   :  { %v2904_v50 = vadd.f32 %v6350_v49, %v8144_v38  ;;  %v2898_v62 = vpop.f32.mrb[29].mxu1 }
0x1269   :  { %v2899_v6 = vadd.f32 %v8144_v38, %v2898_v62 }
0x126a   :  { %v3009_v4 = vmul.f32 0.35355338, %v2904_v50 }
0x126b   :  { %v7173_v10 = vpack.i.bf16 %v2904_v50, %v2899_v6  ;;  %v3008_v51 = vmul.f32 0.35355338, %v2899_v6 }
0x126d   :  { %7174 = vrot.lane.b32.xlu1 %v7173_v10, %s7517_s25  ;;  %7169 = vrot.lane.b32.xlu0 %v7173_v10, %s7515_s23 }
0x126e   :  { %6366 = vmatprep.mubr.msk.f32.mxu0 %vm304_vm1, %v3008_v51 }
0x1271   :  { %7179 = vrot.lane.b32.xlu1 %v7173_v10, %s7514_s0  ;;  %7184 = vrot.lane.b32.xlu0 %v8150_v53, %s7516_s24 }
0x1275   :  { %7189 = vrot.lane.b32.xlu1 %v8156_v56, %s7516_s24  ;;  %7194 = vrot.lane.b32.xlu0 %v7173_v10, %s7518_s26 }
0x12df   :  { %v7175_v58 = vpop.permute.xlu1 %7174  ;;  %v7170_v59 = vpop.permute.xlu0 %7169 }
0x12e0   :  { %7204 = vrot.lane.b32.xlu0 %v7175_v58, %s7518_s26  ;;  %7199 = vrot.lane.b32.xlu1 %v7170_v59, %s7518_s26 }
0x12e3   :  { %v7180_v12 = vpop.permute.xlu1 %7179  ;;  %v7185_v52 = vpop.permute.xlu0 %7184 }
0x12e4   :  { %v7187_v3 = vunpack.i.h.bf16 %v7185_v52  ;;  %v7186_v54 = vunpack.i.l.bf16 %v7185_v52  ;;  %7209 = vrot.lane.b32.xlu1 %v7180_v12, %s7518_s26  ;;  %3012 = vrot.lane.b32.xlu0 %v3008_v51, %s7515_s23 }
0x12e6   :  { %v6805_v61 = vpack.c.bf16 %v7187_v3, %v7186_v54 }
0x12e7   :  { %v7190_v8 = vpop.permute.xlu1 %7189  ;;  %v7195_v13 = vpop.permute.xlu0 %7194 }
0x12e8   :  { %v7192_v14 = vunpack.i.h.bf16 %v7190_v8  ;;  %v7191_v11 = vunpack.i.l.bf16 %v7190_v8  ;;  %v7197_v15 = vunpack.i.h.bf16 %v7195_v13  ;;  %v7196_v41 = vunpack.i.l.bf16 %v7195_v13  ;;  %6806 = vmatprep.subr.bf16.mxu1 %v6805_v61  ;;  %3014 = vrot.lane.b32.xlu1 %v3009_v4, %s7515_s23 }
0x12e9   :  { %6808 = vmatpush3.bf16.msra.mxu1 %v6805_v61  ;;  %3016 = vrot.lane.b32.xlu0 %v3008_v51, %s7517_s25 }
0x12ea   :  { %v6813_v42 = vpack.c.bf16 %v7197_v15, %v7196_v41  ;;  %v6809_v16 = vpack.c.bf16 %v7192_v14, %v7191_v11 }
0x12ec   :  { %6810 = vmatprep.subr.bf16.mxu1 %v6809_v16  ;;  %6815 = vmatprep.subr.msk.bf16.mxu0 %vm7635_vm2, %v6813_v42 }
0x12ed   :  { %6812 = vmatpush3.bf16.msra.mxu1 %v6809_v16  ;;  %6818 = vmatpush3.bf16.xpose.msk.msra.mxu0 %vm7635_vm2, %v6813_v42 }
0x12ee   :  { %3018 = vrot.lane.b32.xlu1 %v3009_v4, %s7517_s25  ;;  %3020 = vrot.lane.b32.xlu0 %v3008_v51, %s7514_s0 }
0x12f0   :  { %6360 = vmatmul.mubr.msk.f32.vlgmr.msra.gmra.mrb[30].mxu1 %vm67_vm0, %v8119_v31 }
0x12f2   :  { %3022 = vrot.lane.b32.xlu1 %v3009_v4, %s7514_s0 }
0x12f4   :  { %6367 = vmatmul.mubr.msk.f32.vlgmr.msra.gmra.mrb[26].mxu0 %vm304_vm1, %v3009_v4 }
0x1352   :  { %v7205_v2 = vpop.permute.xlu0 %7204  ;;  %v7200_v17 = vpop.permute.xlu1 %7199 }
0x1353   :  { %v7207_v23 = vunpack.i.h.bf16 %v7205_v2  ;;  %v7206_v25 = vunpack.i.l.bf16 %v7205_v2  ;;  %v7202_v26 = vunpack.i.h.bf16 %v7200_v17  ;;  %v7201_v7 = vunpack.i.l.bf16 %v7200_v17 }
0x1355   :  { %v6825_v0 = vpack.c.bf16 %v7207_v23, %v7206_v25  ;;  %v6819_v28 = vpack.c.bf16 %v7202_v26, %v7201_v7 }
0x1356   :  { %v7210_v29 = vpop.permute.xlu1 %7209  ;;  %v3013_v36 = vpop.permute.xlu0 %3012 }
0x1357   :  { %v7212_v21 = vunpack.i.h.bf16 %v7210_v29  ;;  %v7211_v35 = vunpack.i.l.bf16 %v7210_v29  ;;  %6821 = vmatprep.subr.msk.bf16.mxu1 %vm7635_vm2, %v6819_v28  ;;  %6827 = vmatprep.subr.msk.bf16.mxu0 %vm7635_vm2, %v6825_v0 }
0x1358   :  { %6373 = vmatprep.mubr.msk.f32.mxu1 %vm304_vm1, %v3013_v36  ;;  %6824 = vmatpush3.bf16.xpose.msk.msra.mxu1 %vm7635_vm2, %v6819_v28 }
0x1359   :  { %v6831_v24 = vpack.c.bf16 %v7212_v21, %v7211_v35  ;;  %6830 = vmatpush3.bf16.xpose.msk.msra.mxu0 %vm7635_vm2, %v6825_v0 }
0x135a   :  { %v3015_v37 = vpop.permute.xlu1 %3014 }
0x135b   :  { %v3017_v18 = vpop.permute.xlu0 %3016  ;;  %6833 = vmatprep.subr.msk.bf16.mxu1 %vm7635_vm2, %v6831_v24 }
0x135c   :  { %6380 = vmatprep.mubr.msk.f32.mxu0 %vm304_vm1, %v3017_v18 }
0x135f   :  { %6374 = vmatmul.mubr.msk.f32.vlgmr.msra.gmra.mrb[32].mxu1 %vm304_vm1, %v3015_v37 }
0x1360   :  { %v3019_v40 = vpop.permute.xlu1 %3018  ;;  %v3021_v44 = vpop.permute.xlu0 %3020  ;;  %6836 = vmatpush3.bf16.xpose.msk.msra.mxu1 %vm7635_vm2, %v6831_v24 }
0x1361   :  { %6381 = vmatmul.mubr.msk.f32.vlgmr.msra.gmra.mrb[28].mxu0 %vm304_vm1, %v3019_v40  ;;  %6387 = vmatprep.mubr.msk.f32.mxu1 %vm304_vm1, %v3021_v44 }
0x1364   :  { %v3023_v55 = vpop.permute.xlu1 %3022 }
0x1367   :  { %6388 = vmatmul.mubr.msk.f32.vlgmr.msra.gmra.mrb[34].mxu1 %vm304_vm1, %v3023_v55 }
0x13c3   :  { %v6361_v43 = vpop.f32.mrb[30].mxu1 }
0x13c4   :  { %v2999_v19 = vpop.f32.mrb[31].mxu1 }
0x13c7   :  { %v6368_v20 = vpop.f32.mrb[26].mxu0 }
0x13c8   :  { %v3407_v5 = vsel %vm7674_vm3, %v6368_v20, -1e+30  ;;  %v3136_v9 = vpop.f32.mrb[27].mxu0 }
0x13c9   :  { %v3417_v45 = vsel %vm661_vm5, %v3407_v5, -inf  ;;  %v3406_v47 = vsel %vm7680_vm4, %v3136_v9, -1e+30 }
0x13ca   :  { %v3414_v48 = vsel %vm661_vm5, %v3406_v47, -inf  ;;  %3418 = vmax.xlane.f32.xlu1 %v3417_v45 }
0x13cb   :  { %3415 = vmax.xlane.f32.xlu0 %v3414_v48 }
0x1432   :  { %v6375_v49 = vpop.f32.mrb[32].mxu1 }
0x1433   :  { %v3409_v50 = vsel %vm7674_vm3, %v6375_v49, -1e+30  ;;  %v3223_v6 = vpop.f32.mrb[33].mxu1 }
0x1434   :  { %v6382_v62 = vpop.f32.mrb[28].mxu0  ;;  %v3423_v10 = vsel %vm661_vm5, %v3409_v50, -inf  ;;  %v3408_v58 = vsel %vm7680_vm4, %v3223_v6, -1e+30 }
0x1435   :  { %v3310_v51 = vpop.f32.mrb[29].mxu0  ;;  %3424 = vmax.xlane.f32.xlu0 %v3423_v10  ;;  %v3420_v52 = vsel %vm661_vm5, %v3408_v58, -inf  ;;  %v3411_v3 = vsel %vm7674_vm3, %v6382_v62, -1e+30 }
0x1436   :  { %v3410_v59 = vsel %vm7680_vm4, %v3310_v51, -1e+30  ;;  %v3429_v8 = vsel %vm661_vm5, %v3411_v3, -inf }
0x1437   :  { %v3426_v12 = vsel %vm661_vm5, %v3410_v59, -inf }
0x1438   :  { %3427 = vmax.xlane.f32.xlu1 %v3426_v12 }
0x1439   :  { %3421 = vmax.xlane.f32.xlu0 %v3420_v52 }
0x143a   :  { %v6389_v54 = vpop.f32.mrb[34].mxu1 }
0x143b   :  { %v3397_v61 = vpop.f32.mrb[35].mxu1  ;;  %v3413_v14 = vsel %vm7674_vm3, %v6389_v54, -1e+30 }
0x143c   :  { %v3412_v13 = vsel %vm7680_vm4, %v3397_v61, -1e+30  ;;  %v3435_v15 = vsel %vm661_vm5, %v3413_v14, -inf }
0x143d   :  { %v3432_v11 = vsel %vm661_vm5, %v3412_v13, -inf  ;;  %3430 = vmax.xlane.f32.xlu0 %v3429_v8 }
0x143e   :  { %3433 = vmax.xlane.f32.xlu1 %v3432_v11 }
0x1441   :  { %3436 = vmax.xlane.f32.xlu0 %v3435_v15 }
0x144f   :  { %2924 = vrot.lane.b32.xlu1 %v8144_v38, %s7516_s24 }
0x1457   :  { %v3419_v41 = vpop.xlane.xlu1 %3418 }
0x1458   :  { %v3416_v29 = vpop.xlane.xlu0 %3415  ;;  %v3439_v35 = vsub.f32 %v3407_v5, %v3419_v41 }
0x1459   :  { %v3438_v37 = vsub.f32 %v3406_v47, %v3416_v29 }
0x145a   :  { %v3448_v24 = vmul.f32 1.442695, %v3439_v35 }
0x145b   :  { %v3446_v18 = vmul.f32 1.442695, %v3438_v37 }
0x14c2   :  { %v3425_v21 = vpop.xlane.xlu0 %3424 }
0x14c3   :  { %v3441_v40 = vsub.f32 %v3409_v50, %v3425_v21 }
0x14c5   :  { %v3428_v42 = vpop.xlane.xlu1 %3427  ;;  %v3452_v55 = vmul.f32 1.442695, %v3441_v40 }
0x14c6   :  { %v3442_v16 = vsub.f32 %v3410_v59, %v3428_v42  ;;  %v3422_v36 = vpop.xlane.xlu0 %3421 }
0x14c8   :  { %v3454_v4 = vmul.f32 1.442695, %v3442_v16 }
0x14ca   :  { %7404 = vpow2.f32 %v3454_v4  ;;  %v3431_v44 = vpop.xlane.xlu0 %3430 }
0x14cb   :  { %v3434_v2 = vpop.xlane.xlu1 %3433  ;;  %7406 = vpow2.f32 %v3448_v24 }
0x14cc   :  { %7408 = vpow2.f32 %v3446_v18  ;;  %v3444_v50 = vsub.f32 %v3412_v13, %v3434_v2 }
0x14cd   :  { %7410 = vpow2.f32 %v3452_v55 }
0x14ce   :  { %v3437_v9 = vpop.xlane.xlu0 %3436  ;;  %v3458_v51 = vmul.f32 1.442695, %v3444_v50 }
0x14cf   :  { %v2925_v17 = vpop.permute.xlu1 %2924  ;;  %v3445_v5 = vsub.f32 %v3413_v14, %v3437_v9 }
0x14d0   :  { %v3000_v23 = vadd.f32 %v2999_v19, %v2925_v17  ;;  %v3005_v25 = vadd.f32 %v6361_v43, %v2925_v17  ;;  %v3443_v43 = vsub.f32 %v3411_v3, %v3431_v44  ;;  %v3440_v19 = vsub.f32 %v3408_v58, %v3422_v36 }
0x14d1   :  { %v3460_v62 = vmul.f32 1.442695, %v3445_v5 }
0x14d2   :  { %v7213_v26 = vpack.i.bf16 %v3005_v25, %v3000_v23  ;;  %v6837_v7 = vpack.c.bf16 %v3005_v25, %v3000_v23  ;;  %v3456_v20 = vmul.f32 1.442695, %v3443_v43  ;;  %v3450_v48 = vmul.f32 1.442695, %v3440_v19 }
0x14d4   :  { %v8221_v0 = vpop.eup %7404  ;;  %7214 = vrot.lane.b32.xlu0 %v7213_v26, %s7515_s23  ;;  %6838 = vmatprep.subr.bf16.mxu0 %v6837_v7  ;;  %7412 = vpow2.f32 %v3456_v20 }
0x14d5   :  { %v3474_v28 = vsel %vm661_vm5, %v8221_v0, 0.0  ;;  %6840 = vmatpush3.bf16.msra.mxu0 %v6837_v7  ;;  %v7407_v45 = vpop.eup %7406  ;;  %7414 = vpow2.f32 %v3450_v48 }
0x14d6   :  { %3475 = vadd.xlane.f32.xlu1 %v3474_v28  ;;  %v3465_v49 = vsel %vm661_vm5, %v7407_v45, 0.0  ;;  %v7409_v47 = vpop.eup %7408  ;;  %7416 = vpow2.f32 %v3460_v62 }
0x14d7   :  { %v3462_v6 = vsel %vm661_vm5, %v7409_v47, 0.0  ;;  %v7411_v10 = vpop.eup %7410  ;;  %7418 = vpow2.f32 %v3458_v51 }
0x14d8   :  { %v3471_v58 = vsel %vm661_vm5, %v7411_v10, 0.0 }
0x14de   :  { %v8230_v59 = vpop.eup %7412 }
0x14df   :  { %v3477_v12 = vsel %vm661_vm5, %v8230_v59, 0.0  ;;  %v7415_v52 = vpop.eup %7414 }
0x14e0   :  { %v3468_v3 = vsel %vm661_vm5, %v7415_v52, 0.0  ;;  %v7417_v54 = vpop.eup %7416 }
0x14e1   :  { %v3483_v61 = vsel %vm661_vm5, %v7417_v54, 0.0  ;;  %v7419_v8 = vpop.eup %7418 }
0x14e2   :  { %v3480_v13 = vsel %vm661_vm5, %v7419_v8, 0.0 }
0x14e7   :  { %7224 = vrot.lane.b32.xlu1 %v7213_v26, %s7514_s0 }
0x14f3   :  { %3466 = vadd.xlane.f32.xlu0 %v3465_v49 }
0x14f7   :  { %3463 = vadd.xlane.f32.xlu0 %v3462_v6 }
0x14fb   :  { %3472 = vadd.xlane.f32.xlu0 %v3471_v58 }
0x14ff   :  { %3478 = vadd.xlane.f32.xlu0 %v3477_v12 }
0x1503   :  { %3469 = vadd.xlane.f32.xlu0 %v3468_v3 }
0x1507   :  { %3484 = vadd.xlane.f32.xlu0 %v3483_v61 }
0x150b   :  { %3481 = vadd.xlane.f32.xlu0 %v3480_v13 }
0x1521   :  { %7219 = vrot.lane.b32.xlu0 %v7213_v26, %s7517_s25 }
0x1525   :  { %7229 = vrot.lane.b32.xlu0 %v8150_v53, %s7519_s27 }
0x1529   :  { %7234 = vrot.lane.b32.xlu0 %v8156_v56, %s7519_s27 }
0x1546   :  { %v7215_v14 = vpop.permute.xlu0 %7214 }
0x1547   :  { %v7217_v11 = vunpack.i.h.bf16 %v7215_v14  ;;  %v7216_v15 = vunpack.i.l.bf16 %v7215_v14 }
0x1549   :  { %v6841_v41 = vpack.c.bf16 %v7217_v11, %v7216_v15 }
0x154b   :  { %6842 = vmatprep.subr.bf16.mxu1 %v6841_v41 }
0x154c   :  { %6844 = vmatpush3.bf16.msra.mxu1 %v6841_v41 }
0x1563   :  { %v3476_v42 = vpop.xlane.xlu1 %3475 }
0x1564   :  { %7420 = vrcp.f32 %v3476_v42 }
0x1567   :  { %v7225_v16 = vpop.permute.xlu1 %7224 }
0x1568   :  { %v7227_v4 = vunpack.i.h.bf16 %v7225_v16  ;;  %v7226_v2 = vunpack.i.l.bf16 %v7225_v16 }
0x156a   :  { %v6849_v17 = vpack.c.bf16 %v7227_v4, %v7226_v2 }
0x156c   :  { %6850 = vmatprep.subr.bf16.mxu1 %v6849_v17 }
0x156e   :  { %v7421_v26 = vpop.eup %7420 }
0x156f   :  { %v3495_v37 = vmul.f32 %v7421_v26, %v8221_v0 }
0x1580   :  { %v3467_v23 = vpop.xlane.xlu0 %3466 }
0x1581   :  { %7422 = vrcp.f32 %v3467_v23 }
0x1584   :  { %v3464_v25 = vpop.xlane.xlu0 %3463 }
0x1585   :  { %7424 = vrcp.f32 %v3464_v25 }
0x1588   :  { %v3473_v7 = vpop.xlane.xlu0 %3472 }
0x1589   :  { %7426 = vrcp.f32 %v3473_v7 }
0x158b   :  { %v7423_v29 = vpop.eup %7422 }
0x158c   :  { %v3479_v28 = vpop.xlane.xlu0 %3478  ;;  %v3489_v24 = vmul.f32 %v7423_v29, %v7407_v45 }
0x158f   :  { %v7425_v21 = vpop.eup %7424 }
0x1590   :  { %v3470_v35 = vpop.xlane.xlu0 %3469  ;;  %v3487_v36 = vmul.f32 %v7425_v21, %v7409_v47 }
0x1591   :  { %7428 = vrcp.f32 %v3470_v35 }
0x1592   :  { %6394 = vmatprep.mubr.msk.f32.mxu0 %vm661_vm5, %v3487_v36  ;;  %7430 = vrcp.f32 %v3479_v28 }
0x1593   :  { %6395 = vmatmul.mubr.msk.f32.vlgmr.msra.gmra.mrb[30].mxu0 %vm661_vm5, %v3489_v24  ;;  %v7427_v44 = vpop.eup %7426 }
0x1594   :  { %v3485_v18 = vpop.xlane.xlu0 %3484  ;;  %6408 = vmatprep.mubr.msk.f32.mxu0 %vm661_vm5, %v3495_v37  ;;  %v3493_v20 = vmul.f32 %v7427_v44, %v7411_v10  ;;  %v5726_v44 = vld [vmem:[%s8633_s4 + $0x78] sm:$0xff] }
0x1595   :  { %7432 = vrcp.f32 %v3485_v18 }
0x1598   :  { %v3482_v40 = vpop.xlane.xlu0 %3481 }
0x1599   :  { %7434 = vrcp.f32 %v3482_v40 }
0x159b   :  { %v7429_v55 = vpop.eup %7428 }
0x159c   :  { %v7220_v43 = vpop.permute.xlu0 %7219  ;;  %v3491_v19 = vmul.f32 %v7429_v55, %v7415_v52  ;;  %v7431_v0 = vpop.eup %7430 }
0x159d   :  { %v7222_v9 = vunpack.i.h.bf16 %v7220_v43  ;;  %v7221_v45 = vunpack.i.l.bf16 %v7220_v43  ;;  %v3497_v47 = vmul.f32 %v7431_v0, %v8230_v59 }
0x159e   :  { %6401 = vmatprep.mubr.msk.f32.mxu1 %vm661_vm5, %v3491_v19 }
0x159f   :  { %v6845_v48 = vpack.c.bf16 %v7222_v9, %v7221_v45  ;;  %6402 = vmatmul.mubr.msk.f32.vlgmr.msra.gmra.mrb[36].mxu1 %vm661_vm5, %v3493_v20  ;;  %v7433_v5 = vpop.eup %7432 }
0x15a0   :  { %6852 = vmatpush3.bf16.msra.mxu1 %v6849_v17  ;;  %v3501_v62 = vmul.f32 %v7433_v5, %v7417_v54  ;;  %v7230_v6 = vpop.permute.xlu0 %7229 }
0x15a1   :  { %6846 = vmatprep.subr.bf16.mxu0 %v6845_v48  ;;  %v7232_v10 = vunpack.i.h.bf16 %v7230_v6  ;;  %v7231_v51 = vunpack.i.l.bf16 %v7230_v6 }
0x15a2   :  { %6848 = vmatpush3.bf16.msra.mxu0 %v6845_v48 }
0x15a3   :  { %v7435_v49 = vpop.eup %7434  ;;  %v6853_v58 = vpack.c.bf16 %v7232_v10, %v7231_v51 }
0x15a4   :  { %v3499_v50 = vmul.f32 %v7435_v49, %v7419_v8  ;;  %v7235_v12 = vpop.permute.xlu0 %7234 }
0x15a5   :  { %6409 = vmatmul.mubr.msk.f32.vlgmr.msra.gmra.mrb[32].mxu0 %vm661_vm5, %v3497_v47  ;;  %v7237_v59 = vunpack.i.h.bf16 %v7235_v12  ;;  %v7236_v52 = vunpack.i.l.bf16 %v7235_v12  ;;  %6854 = vmatprep.subr.bf16.mxu0 %v6853_v58  ;;  %v5728_v47 = vld [vmem:[%s8633_s4 + $0x88] sm:$0xff] }
0x15a6   :  { %6415 = vmatprep.mubr.msk.f32.mxu1 %vm661_vm5, %v3499_v50  ;;  %6856 = vmatpush3.bf16.msra.mxu0 %v6853_v58  ;;  %v5729_v50 = vld [vmem:[%s8633_s4 + $0x90] sm:$0xff] }
0x15a7   :  { %6416 = vmatmul.mubr.msk.f32.vlgmr.msra.gmra.mrb[38].mxu1 %vm661_vm5, %v3501_v62  ;;  %v6857_v3 = vpack.c.bf16 %v7237_v59, %v7236_v52  ;;  %v8292_v51 = vpack.i.bf16 %v5729_v50, %v5728_v47  ;;  %v6865_v12 = vpack.c.bf16 %v5729_v50, %v5728_v47  ;;  %v8299_v59 = vld [vmem:[%s8633_s4 + $0x98] ss:$0 sm:$0xff] }
0x15a9   :  { %6858 = vmatprep.subr.bf16.mxu0 %v6857_v3 }
0x15aa   :  { %6860 = vmatpush3.bf16.msra.mxu0 %v6857_v3 }
0x1666   :  { %v6396_v54 = vpop.f32.mrb[30].mxu0 }
0x1667   :  { %v3574_v61 = vpop.f32.mrb[31].mxu0 }
0x1672   :  { %v6403_v8 = vpop.f32.mrb[36].mxu1 }
0x1673   :  { %3830 = vrot.lane.b32.xlu0 %v6403_v8, %s7520_s28  ;;  %v3655_v53 = vpop.f32.mrb[37].mxu1 }
0x1678   :  { %v6410_v13 = vpop.f32.mrb[32].mxu0 }
0x1679   :  { %3838 = vrot.lane.b32.xlu0 %v6410_v13, %s7521_s29  ;;  %v3736_v56 = vpop.f32.mrb[33].mxu0 }
0x167a   :  { %3836 = vrot.lane.b32.xlu1 %v3736_v56, %s7521_s29  ;;  %v6417_v14 = vpop.f32.mrb[38].mxu1 }
0x167b   :  { %v3817_v11 = vpop.f32.mrb[39].mxu1 }
0x167d   :  { %3828 = vrot.lane.b32.xlu0 %v3655_v53, %s7520_s28 }
0x167e   :  { %3844 = vrot.lane.b32.xlu1 %v3817_v11, %s7522_s30 }
0x1681   :  { %3846 = vrot.lane.b32.xlu0 %v6417_v14, %s7522_s30 }
0x1682   :  { %3868 = vrot.lane.b32.xlu1 %v8144_v38, %s7519_s27 }
0x16e5   :  { %v3831_v15 = vpop.permute.xlu0 %3830 }
0x16e6   :  { %v3851_v23 = vsel %vm304_vm1, %v6396_v54, %v3831_v15  ;;  %v5725_v15 = vld [vmem:[%s8636_s7 + $0x6] sm:$0x3] }
0x16eb   :  { %v3839_v41 = vpop.permute.xlu0 %3838 }
0x16ec   :  { %v3837_v42 = vpop.permute.xlu1 %3836  ;;  %v3853_v7 = vsel %vm661_vm5, %v3851_v23, %v3839_v41 }
0x16ef   :  { %v3829_v16 = vpop.permute.xlu0 %3828 }
0x16f0   :  { %v3850_v4 = vsel %vm304_vm1, %v3574_v61, %v3829_v16  ;;  %v3845_v2 = vpop.permute.xlu1 %3844 }
0x16f1   :  { %v3852_v17 = vsel %vm661_vm5, %v3850_v4, %v3837_v42  ;;  %v3985_v42 = vrot.slane %v5725_v15, %v7820_v22 }
0x16f2   :  { %v3854_v25 = vsel %vm1102_vm6, %v3852_v17, %v3845_v2  ;;  %v3991_v17 = vrot.slane %v5725_v15, %v7839_v30 }
0x16f3   :  { %v3847_v28 = vpop.permute.xlu0 %3846  ;;  %6426 = vmatprep.mubr.msk.f32.mxu0 %vm67_vm0, %v3854_v25 }
0x16f4   :  { %v3855_v38 = vsel %vm1102_vm6, %v3853_v7, %v3847_v28  ;;  %v3869_v26 = vpop.permute.xlu1 %3868 }
0x16f5   :  { %6427 = vmatmul.mubr.msk.f32.vlgmr.msra.gmra.mrb[34].mxu0 %vm67_vm0, %v3855_v38 }
0x16f6   :  { %6448 = vmatprep.mubr.msk.f32.mxu0 %vm67_vm0, %v7804_v60  ;;  %v5727_v60 = vld [vmem:[%s8633_s4 + $0x80] sm:$0xff] }
0x16f7   :  { %v8280_v55 = vpack.i.bf16 %v5727_v60, %v5726_v44  ;;  %v6861_v58 = vpack.c.bf16 %v5727_v60, %v5726_v44 }
0x16f9   :  { %6862 = vmatprep.subr.bf16.mxu1 %v6861_v58 }
0x16fa   :  { %6864 = vmatpush3.bf16.msra.mxu1 %v6861_v58 }
0x16fb   :  { %6866 = vmatprep.subr.bf16.mxu1 %v6865_v12 }
0x16fe   :  { %6868 = vmatpush3.bf16.msra.mxu1 %v6865_v12 }
0x17c8   :  { %v6428_v29 = vpop.f32.mrb[34].mxu0 }
0x17c9   :  { %v3949_v21 = vadd.f32 %v6428_v29, %v3869_v26  ;;  %v3943_v35 = vpop.f32.mrb[35].mxu0 }
0x17ca   :  { %v3944_v36 = vadd.f32 %v3943_v35, %v3869_v26 }
0x17cb   :  { %v3953_v24 = vadd.f32 %v3949_v21, %v8119_v31 }
0x17cc   :  { %v3952_v37 = vadd.f32 %v3944_v36, %v8121_v27 }
0x17cd   :  { %v3959_v18 = vsel %vm67_vm0, %v3953_v24, 0.0 }
0x17ce   :  { %3960 = vadd.xlane.f32.xlu1 %v3959_v18  ;;  %v3956_v40 = vsel %vm67_vm0, %v3952_v37, 0.0  ;;  %v7488_v18 = vld [vmem:[%s8630_s1 + $0x10] sm:$0xff] }
0x17cf   :  { %3957 = vadd.xlane.f32.xlu0 %v3956_v40  ;;  %v7489_v40 = vld [vmem:[%s8630_s1 + $0x18] sm:$0xff] }
0x17df   :  { %7239 = vrot.lane.b32.xlu1 %v8280_v55, %s7518_s26 }
0x17e3   :  { %4104 = vrot.lane.b32.xlu1 %v8299_v59, %s7518_s26 }
0x17e7   :  { %7249 = vrot.lane.b32.xlu1 %v8280_v55, %s7516_s24 }
0x185b   :  { %v3961_v31 = vpop.xlane.xlu1 %3960 }
0x185c   :  { %v3963_v27 = vmul.f32 0.03125, %v3961_v31  ;;  %v3958_v43 = vpop.xlane.xlu0 %3957 }
0x185d   :  { %v3962_v19 = vmul.f32 0.03125, %v3958_v43 }
0x185e   :  { %v3965_v20 = vsub.f32 %v3953_v24, %v3963_v27 }
0x185f   :  { %v3964_v9 = vsub.f32 %v3952_v37, %v3962_v19  ;;  %v7240_v49 = vpop.permute.xlu1 %7239 }
0x1860   :  { %v3967_v45 = vmul.f32 %v3965_v20, %v3965_v20  ;;  %v7242_v62 = vunpack.i.h.bf16 %v7240_v49  ;;  %v7241_v6 = vunpack.i.l.bf16 %v7240_v49 }
0x1861   :  { %v3966_v0 = vmul.f32 %v3964_v9, %v3964_v9 }
0x1862   :  { %v3971_v48 = vsel %vm67_vm0, %v3967_v45, 0.0  ;;  %v6869_v10 = vpack.c.bf16 %v7242_v62, %v7241_v6 }
0x1863   :  { %3972 = vadd.xlane.f32.xlu0 %v3971_v48  ;;  %v3968_v5 = vsel %vm67_vm0, %v3966_v0, 0.0 }
0x1864   :  { %6870 = vmatprep.subr.bf16.mxu0 %v6869_v10 }
0x1865   :  { %6872 = vmatpush3.bf16.msra.mxu0 %v6869_v10 }
0x1867   :  { %3969 = vadd.xlane.f32.xlu0 %v3968_v5 }
0x187d   :  { %7244 = vrot.lane.b32.xlu0 %v8292_v51, %s7518_s26 }
0x1881   :  { %7254 = vrot.lane.b32.xlu0 %v8292_v51, %s7516_s24 }
0x18f0   :  { %v3973_v52 = vpop.xlane.xlu0 %3972 }
0x18f1   :  { %v3975_v3 = vmul.f32 0.03125, %v3973_v52 }
0x18f3   :  { %v3977_v54 = vadd.f32 1e-05, %v3975_v3 }
0x18f4   :  { %v3970_v61 = vpop.xlane.xlu0 %3969 }
0x18f5   :  { %7436 = vrsqrt.f32 %v3977_v54  ;;  %v3974_v8 = vmul.f32 0.03125, %v3970_v61 }
0x18f7   :  { %v3976_v53 = vadd.f32 1e-05, %v3974_v8 }
0x18f8   :  { %v7245_v13 = vpop.permute.xlu0 %7244 }
0x18f9   :  { %7438 = vrsqrt.f32 %v3976_v53  ;;  %v7247_v56 = vunpack.i.h.bf16 %v7245_v13  ;;  %v7246_v14 = vunpack.i.l.bf16 %v7245_v13 }
0x18fb   :  { %v6873_v11 = vpack.c.bf16 %v7247_v56, %v7246_v14 }
0x18fc   :  { %v7255_v29 = vpop.permute.xlu0 %7254 }
0x18fd   :  { %6874 = vmatprep.subr.bf16.mxu0 %v6873_v11  ;;  %v7257_v36 = vunpack.i.h.bf16 %v7255_v29 }
0x18fe   :  { %6876 = vmatpush3.bf16.msra.mxu0 %v6873_v11 }
0x18ff   :  { %v7437_v41 = vpop.eup %7436 }
0x1900   :  { %v3981_v16 = vmul.f32 %v7437_v41, %v3965_v20 }
0x1901   :  { %6449 = vmatmul.mubr.msk.f32.vlgmr.msra.gmra.mrb[36].mxu0 %vm67_vm0, %v7841_v32 }
0x1902   :  { %6451 = vmatprep.mubr.msk.f32.mxu0 %vm67_vm0, %v7843_v33  ;;  %v3987_v2 = vmul.f32 %v3985_v42, %v3981_v16  ;;  %v7486_v33 = vld [vmem:[%s8630_s1] sm:$0xff] }
0x1903   :  { %v7439_v4 = vpop.eup %7438 }
0x1904   :  { %v3980_v23 = vmul.f32 %v7439_v4, %v3964_v9  ;;  %v8318_v7 = vadd.f32 %v3991_v17, %v3987_v2 }
0x1905   :  { %6452 = vmatmul.mubr.msk.f32.gmra.mrb[38].mxu0 %vm67_vm0, %v7854_v39  ;;  %v4105_v39 = vpop.permute.xlu1 %4104 }
0x1906   :  { %v3986_v25 = vmul.f32 %v3985_v42, %v3980_v23  ;;  %v3995_v32 = vadd.f32 %v8133_v57, %v8318_v7  ;;  %v7487_v57 = vld [vmem:[%s8630_s1 + $0x8] sm:$0xff] }
0x1908   :  { %v8320_v28 = vadd.f32 %v3991_v17, %v3986_v25 }
0x1909   :  { %v7250_v26 = vpop.permute.xlu1 %7249 }
0x190a   :  { %v3994_v38 = vadd.f32 %v8126_v46, %v8320_v28  ;;  %v7252_v21 = vunpack.i.h.bf16 %v7250_v26  ;;  %v7251_v35 = vunpack.i.l.bf16 %v7250_v26  ;;  %v7256_v46 = vunpack.i.l.bf16 %v7255_v29 }
0x190c   :  { %6437 = vmatprep.mubr.msk.f32.mxu1 %vm67_vm0, %v3994_v38  ;;  %v6877_v24 = vpack.c.bf16 %v7252_v21, %v7251_v35  ;;  %v6881_v37 = vpack.c.bf16 %v7257_v36, %v7256_v46 }
0x190d   :  { %6438 = vmatmul.mubr.msk.f32.vlgmr.msra.gmra.mrb[40].mxu1 %vm67_vm0, %v3995_v32 }
0x190e   :  { %6462 = vmatprep.mubr.msk.f32.mxu1 %vm67_vm0, %v7486_v33  ;;  %6878 = vmatprep.subr.bf16.mxu1 %v6877_v24 }
0x190f   :  { %6880 = vmatpush3.bf16.msra.mxu1 %v6877_v24 }
0x1910   :  { %6882 = vmatprep.subr.bf16.mxu1 %v6881_v37 }
0x1913   :  { %6884 = vmatpush3.bf16.msra.mxu1 %v6881_v37 }
0x1916   :  { %6463 = vmatmul.mubr.msk.f32.vlgmr.msra.gmra.mrb[42].mxu1 %vm67_vm0, %v7487_v57 }
0x1917   :  { %6465 = vmatprep.mubr.msk.f32.mxu1 %vm67_vm0, %v7488_v18 }
0x191a   :  { %6466 = vmatmul.mubr.msk.f32.gmra.mrb[44].mxu1 %vm67_vm0, %v7489_v40 }
0x19d4   :  { %v6450_v44 = vpop.f32.mrb[36].mxu0 }
0x19d5   :  { %v4179_v60 = vadd.f32 %v6450_v44, %v4105_v39  ;;  %v4173_v31 = vpop.f32.mrb[37].mxu0 }
0x19d6   :  { %v4174_v27 = vadd.f32 %v4173_v31, %v4105_v39 }
0x19d8   :  { %v6453_v43 = vpop.f32.mrb[38].mxu0  ;;  %v7258_v19 = vpack.i.bf16 %v4179_v60, %v4174_v27  ;;  %v6885_v20 = vpack.c.bf16 %v4179_v60, %v4174_v27 }
0x19d9   :  { %v4189_v9 = vadd.f32 %v6453_v43, %v4105_v39  ;;  %v4183_v45 = vpop.f32.mrb[39].mxu0 }
0x19da   :  { %v4184_v48 = vadd.f32 %v4183_v45, %v4105_v39  ;;  %7259 = vrot.lane.b32.xlu1 %v7258_v19, %s7515_s23  ;;  %6887 = vmatprep.subr.msk.bf16.mxu0 %vm7635_vm2, %v6885_v20 }
0x19db   :  { %6890 = vmatpush3.bf16.xpose.msk.msra.mxu0 %vm7635_vm2, %v6885_v20 }
0x19dc   :  { %v7263_v0 = vpack.i.bf16 %v4189_v9, %v4184_v48  ;;  %v6891_v5 = vpack.c.bf16 %v4189_v9, %v4184_v48 }
0x19de   :  { %7264 = vrot.lane.b32.xlu0 %v7263_v0, %s7515_s23  ;;  %7269 = vrot.lane.b32.xlu1 %v7258_v19, %s7517_s25 }
0x19df   :  { %6893 = vmatprep.subr.msk.bf16.mxu0 %vm7635_vm2, %v6891_v5 }
0x19e0   :  { %v6439_v49 = vpop.f32.mrb[40].mxu1 }
0x19e1   :  { %v4084_v47 = vadd.f32 %v6439_v49, %v8299_v59  ;;  %v4078_v50 = vpop.f32.mrb[41].mxu1 }
0x19e2   :  { %v4079_v62 = vadd.f32 %v8299_v59, %v4078_v50  ;;  %7274 = vrot.lane.b32.xlu0 %v7258_v19, %s7514_s0 }
0x19e3   :  { %v4293_v6 = vmul.f32 0.35355338, %v4084_v47  ;;  %6896 = vmatpush3.bf16.xpose.msk.msra.mxu0 %vm7635_vm2, %v6891_v5 }
0x19e4   :  { %v4292_v10 = vmul.f32 0.35355338, %v4079_v62 }
0x19e6   :  { %6476 = vmatprep.mubr.msk.f32.mxu0 %vm304_vm1, %v4292_v10  ;;  %4298 = vrot.lane.b32.xlu0 %v4293_v6, %s7515_s23 }
0x19e7   :  { %4296 = vrot.lane.b32.xlu1 %v4292_v10, %s7515_s23 }
0x19e9   :  { %v8372_v15 = vpop.f32.mrb[42].mxu1 }
0x19ea   :  { %7284 = vrot.lane.b32.xlu0 %v7263_v0, %s7514_s0  ;;  %6477 = vmatmul.mubr.msk.f32.vlgmr.msra.gmra.mrb[40].mxu0 %vm304_vm1, %v4293_v6  ;;  %v8374_v42 = vpop.f32.mrb[43].mxu1 }
0x19eb   :  { %7279 = vrot.lane.b32.xlu1 %v7263_v0, %s7517_s25 }
0x19ed   :  { %v8382_v2 = vpop.f32.mrb[44].mxu1 }
0x19ee   :  { %4302 = vrot.lane.b32.xlu0 %v4293_v6, %s7517_s25  ;;  %v8384_v23 = vpop.f32.mrb[45].mxu1 }
0x19ef   :  { %4300 = vrot.lane.b32.xlu1 %v4292_v10, %s7517_s25 }
0x19f2   :  { %4306 = vrot.lane.b32.xlu0 %v4293_v6, %s7514_s0 }
0x19f3   :  { %4304 = vrot.lane.b32.xlu1 %v4292_v10, %s7514_s0 }
0x1a4c   :  { %v7260_v58 = vpop.permute.xlu1 %7259 }
0x1a4d   :  { %v7262_v12 = vunpack.i.h.bf16 %v7260_v58  ;;  %v7261_v52 = vunpack.i.l.bf16 %v7260_v58 }
0x1a4f   :  { %v6897_v3 = vpack.c.bf16 %v7262_v12, %v7261_v52 }
0x1a50   :  { %v7265_v54 = vpop.permute.xlu0 %7264  ;;  %v7270_v61 = vpop.permute.xlu1 %7269 }
0x1a51   :  { %v7267_v8 = vunpack.i.h.bf16 %v7265_v54  ;;  %v7266_v53 = vunpack.i.l.bf16 %v7265_v54  ;;  %v7272_v13 = vunpack.i.h.bf16 %v7270_v61  ;;  %v7271_v56 = vunpack.i.l.bf16 %v7270_v61  ;;  %6899 = vmatprep.subr.msk.bf16.mxu1 %vm7635_vm2, %v6897_v3 }
0x1a52   :  { %6902 = vmatpush3.bf16.xpose.msk.msra.mxu1 %vm7635_vm2, %v6897_v3 }
0x1a53   :  { %v6903_v14 = vpack.c.bf16 %v7267_v8, %v7266_v53  ;;  %v6909_v11 = vpack.c.bf16 %v7272_v13, %v7271_v56 }
0x1a54   :  { %v7275_v41 = vpop.permute.xlu0 %7274 }
0x1a55   :  { %v7277_v16 = vunpack.i.h.bf16 %v7275_v41  ;;  %v7276_v4 = vunpack.i.l.bf16 %v7275_v41  ;;  %6905 = vmatprep.subr.msk.bf16.mxu1 %vm7635_vm2, %v6903_v14  ;;  %6911 = vmatprep.subr.msk.bf16.mxu0 %vm7635_vm2, %v6909_v11 }
0x1a56   :  { %6914 = vmatpush3.bf16.xpose.msk.msra.mxu0 %vm7635_vm2, %v6909_v11 }
0x1a57   :  { %v6921_v25 = vpack.c.bf16 %v7277_v16, %v7276_v4 }
0x1a58   :  { %v4299_v17 = vpop.permute.xlu0 %4298 }
0x1a59   :  { %v4297_v38 = vpop.permute.xlu1 %4296 }
0x1a5a   :  { %6487 = vmatprep.mubr.msk.f32.mxu1 %vm304_vm1, %v4297_v38  ;;  %6908 = vmatpush3.bf16.xpose.msk.msra.mxu1 %vm7635_vm2, %v6903_v14 }
0x1a5b   :  { %6923 = vmatprep.subr.msk.bf16.mxu1 %vm7635_vm2, %v6921_v25 }
0x1a5c   :  { %v7285_v32 = vpop.permute.xlu0 %7284 }
0x1a5d   :  { %v7280_v33 = vpop.permute.xlu1 %7279  ;;  %v7287_v39 = vunpack.i.h.bf16 %v7285_v32  ;;  %v7286_v26 = vunpack.i.l.bf16 %v7285_v32 }
0x1a5e   :  { %v7282_v29 = vunpack.i.h.bf16 %v7280_v33  ;;  %v7281_v21 = vunpack.i.l.bf16 %v7280_v33 }
0x1a5f   :  { %v6927_v46 = vpack.c.bf16 %v7287_v39, %v7286_v26 }
0x1a60   :  { %v6915_v35 = vpack.c.bf16 %v7282_v29, %v7281_v21  ;;  %v4303_v37 = vpop.permute.xlu0 %4302 }
0x1a61   :  { %v4301_v36 = vpop.permute.xlu1 %4300  ;;  %6488 = vmatmul.mubr.msk.f32.vlgmr.msra.gmra.mrb[46].mxu1 %vm304_vm1, %v4299_v17 }
0x1a62   :  { %6917 = vmatprep.subr.msk.bf16.mxu0 %vm7635_vm2, %v6915_v35  ;;  %6498 = vmatprep.mubr.msk.f32.mxu0 %vm304_vm1, %v4301_v36 }
0x1a63   :  { %6920 = vmatpush3.bf16.xpose.msk.msra.mxu0 %vm7635_vm2, %v6915_v35  ;;  %6926 = vmatpush3.bf16.xpose.msk.msra.mxu1 %vm7635_vm2, %v6921_v25 }
0x1a64   :  { %6929 = vmatprep.subr.msk.bf16.mxu1 %vm7635_vm2, %v6927_v46  ;;  %v4307_v57 = vpop.permute.xlu0 %4306 }
0x1a65   :  { %v4305_v24 = vpop.permute.xlu1 %4304 }
0x1a66   :  { %6509 = vmatprep.mubr.msk.f32.mxu1 %vm304_vm1, %v4305_v24 }
0x1a6a   :  { %6499 = vmatmul.mubr.msk.f32.vlgmr.msra.gmra.mrb[42].mxu0 %vm304_vm1, %v4303_v37 }
0x1a6b   :  { %6932 = vmatpush3.bf16.xpose.msk.msra.mxu1 %vm7635_vm2, %v6927_v46 }
0x1a72   :  { %6510 = vmatmul.mubr.msk.f32.vlgmr.msra.gmra.mrb[48].mxu1 %vm304_vm1, %v4307_v57 }
0x1abd   :  { %v6478_v18 = vpop.f32.mrb[40].mxu0 }
0x1abe   :  { %v8408_v40 = vsel %vm7674_vm3, %v6478_v18, -1e+30  ;;  %v4454_v44 = vpop.f32.mrb[41].mxu0 }
0x1abf   :  { %v4735_v60 = vsel %vm67_vm0, %v8408_v40, -inf  ;;  %v8414_v31 = vsel %vm7680_vm4, %v4454_v44, -1e+30 }
0x1ac0   :  { %v4732_v34 = vsel %vm67_vm0, %v8414_v31, -inf  ;;  %4736 = vmax.xlane.f32.xlu0 %v4735_v60 }
0x1ac1   :  { %4733 = vmax.xlane.f32.xlu1 %v4732_v34 }
0x1b34   :  { %v6489_v27 = vpop.f32.mrb[46].mxu1 }
0x1b35   :  { %v4727_v43 = vsel %vm7674_vm3, %v6489_v27, -1e+30  ;;  %v4541_v19 = vpop.f32.mrb[47].mxu1 }
0x1b36   :  { %v4741_v20 = vsel %vm67_vm0, %v4727_v43, -inf  ;;  %v8423_v9 = vsel %vm7680_vm4, %v4541_v19, -1e+30 }
0x1b37   :  { %v4738_v45 = vsel %vm67_vm0, %v8423_v9, -inf  ;;  %4742 = vmax.xlane.f32.xlu1 %v4741_v20 }
0x1b38   :  { %4739 = vmax.xlane.f32.xlu0 %v4738_v45 }
0x1b3d   :  { %v6500_v48 = vpop.f32.mrb[42].mxu0 }
0x1b3e   :  { %v4729_v0 = vsel %vm7674_vm3, %v6500_v48, -1e+30  ;;  %v4628_v5 = vpop.f32.mrb[43].mxu0 }
0x1b3f   :  { %v4747_v49 = vsel %vm67_vm0, %v4729_v0, -inf  ;;  %v8432_v47 = vsel %vm7680_vm4, %v4628_v5, -1e+30 }
0x1b40   :  { %v4744_v50 = vsel %vm67_vm0, %v8432_v47, -inf  ;;  %4748 = vmax.xlane.f32.xlu1 %v4747_v49 }
0x1b41   :  { %4745 = vmax.xlane.f32.xlu0 %v4744_v50 }
0x1b45   :  { %v6511_v62 = vpop.f32.mrb[48].mxu1 }
0x1b46   :  { %v8438_v6 = vsel %vm7674_vm3, %v6511_v62, -1e+30  ;;  %v4715_v10 = vpop.f32.mrb[49].mxu1 }
0x1b47   :  { %v4753_v58 = vsel %vm67_vm0, %v8438_v6, -inf  ;;  %v8444_v12 = vsel %vm7680_vm4, %v4715_v10, -1e+30 }
0x1b48   :  { %v4750_v52 = vsel %vm67_vm0, %v8444_v12, -inf  ;;  %4754 = vmax.xlane.f32.xlu1 %v4753_v58 }
0x1b49   :  { %4751 = vmax.xlane.f32.xlu0 %v4750_v52 }
0x1b4d   :  { %v4737_v54 = vpop.xlane.xlu0 %4736 }
0x1b4e   :  { %v4734_v3 = vpop.xlane.xlu1 %4733 }
0x1b5f   :  { %4204 = vrot.lane.b32.xlu0 %v8299_v59, %s7516_s24 }
0x1bc4   :  { %v4743_v63 = vpop.xlane.xlu1 %4742 }
0x1bc5   :  { %v4740_v8 = vpop.xlane.xlu0 %4739  ;;  %v4759_v26 = vsub.f32 %v4727_v43, %v4743_v63 }
0x1bc6   :  { %v4758_v57 = vsub.f32 %v8423_v9, %v4740_v8 }
0x1bc7   :  { %v4770_v29 = vmul.f32 1.442695, %v4759_v26 }
0x1bc8   :  { %v4768_v18 = vmul.f32 1.442695, %v4758_v57 }
0x1bcd   :  { %v4749_v61 = vpop.xlane.xlu1 %4748 }
0x1bce   :  { %v4761_v53 = vsub.f32 %v4729_v0, %v4749_v61  ;;  %v4746_v56 = vpop.xlane.xlu0 %4745 }
0x1bd0   :  { %v4774_v13 = vmul.f32 1.442695, %v4761_v53 }
0x1bd2   :  { %7440 = vpow2.f32 %v4774_v13 }
0x1bd5   :  { %v4755_v44 = vpop.xlane.xlu1 %4754 }
0x1bd6   :  { %v4752_v1 = vpop.xlane.xlu0 %4751 }
0x1bd7   :  { %v4762_v27 = vsub.f32 %v8444_v12, %v4752_v1 }
0x1bd9   :  { %v4776_v43 = vmul.f32 1.442695, %v4762_v27 }
0x1bda   :  { %v4205_v14 = vpop.permute.xlu0 %4204 }
0x1bdb   :  { %v4274_v11 = vadd.f32 %v8374_v42, %v4205_v14  ;;  %v4279_v41 = vadd.f32 %v8372_v15, %v4205_v14  ;;  %v4284_v16 = vadd.f32 %v8384_v23, %v4205_v14  ;;  %v4289_v17 = vadd.f32 %v8382_v2, %v4205_v14 }
0x1bdc   :  { %v8453_v4 = vpop.eup %7440  ;;  %v4757_v15 = vsub.f32 %v8408_v40, %v4737_v54  ;;  %v4756_v2 = vsub.f32 %v8414_v31, %v4734_v3  ;;  %v4760_v40 = vsub.f32 %v8432_v47, %v4746_v56  ;;  %v4763_v31 = vsub.f32 %v8438_v6, %v4755_v44 }
0x1bdd   :  { %v4795_v25 = vsel %vm67_vm0, %v8453_v4, 0.0  ;;  %v7288_v38 = vpack.i.bf16 %v4279_v41, %v4274_v11  ;;  %v6933_v32 = vpack.c.bf16 %v4279_v41, %v4274_v11  ;;  %v6937_v33 = vpack.c.bf16 %v4289_v17, %v4284_v16 }
0x1bde   :  { %4796 = vadd.xlane.f32.xlu0 %v4795_v25  ;;  %v8458_v39 = vpack.i.bf16 %v4289_v17, %v4284_v16  ;;  %v4766_v42 = vmul.f32 1.442695, %v4757_v15  ;;  %v4764_v23 = vmul.f32 1.442695, %v4756_v2  ;;  %v4772_v60 = vmul.f32 1.442695, %v4760_v40 }
0x1bdf   :  { %7289 = vrot.lane.b32.xlu1 %v7288_v38, %s7515_s23  ;;  %6934 = vmatprep.subr.bf16.mxu0 %v6933_v32  ;;  %v4778_v34 = vmul.f32 1.442695, %v4763_v31 }
0x1be0   :  { %6936 = vmatpush3.bf16.msra.mxu0 %v6933_v32  ;;  %7442 = vpow2.f32 %v4766_v42 }
0x1be1   :  { %6938 = vmatprep.subr.bf16.mxu0 %v6937_v33  ;;  %7444 = vpow2.f32 %v4764_v23 }
0x1be2   :  { %7446 = vpow2.f32 %v4770_v29 }
0x1be3   :  { %7294 = vrot.lane.b32.xlu1 %v8458_v39, %s7515_s23  ;;  %7448 = vpow2.f32 %v4768_v18 }
0x1be4   :  { %6940 = vmatpush3.bf16.msra.mxu0 %v6937_v33  ;;  %7450 = vpow2.f32 %v4772_v60 }
0x1be5   :  { %7452 = vpow2.f32 %v4778_v34 }
0x1be6   :  { %7454 = vpow2.f32 %v4776_v43 }
0x1be7   :  { %7299 = vrot.lane.b32.xlu1 %v7288_v38, %s7517_s25 }
0x1bea   :  { %v8467_v21 = vpop.eup %7442 }
0x1beb   :  { %v4783_v35 = vsel %vm67_vm0, %v8467_v21, 0.0  ;;  %v8471_v36 = vpop.eup %7444 }
0x1bec   :  { %v4780_v46 = vsel %vm67_vm0, %v8471_v36, 0.0  ;;  %v8475_v24 = vpop.eup %7446 }
0x1bed   :  { %v4789_v37 = vsel %vm67_vm0, %v8475_v24, 0.0  ;;  %v8485_v19 = vpop.eup %7448 }
0x1bee   :  { %v4786_v20 = vsel %vm67_vm0, %v8485_v19, 0.0  ;;  %v8489_v9 = vpop.eup %7450 }
0x1bef   :  { %v4792_v45 = vsel %vm67_vm0, %v8489_v9, 0.0  ;;  %v8493_v48 = vpop.eup %7452 }
0x1bf0   :  { %v4801_v0 = vsel %vm67_vm0, %v8493_v48, 0.0  ;;  %v8497_v5 = vpop.eup %7454 }
0x1bf1   :  { %v4798_v62 = vsel %vm67_vm0, %v8497_v5, 0.0 }
0x1bf4   :  { %7304 = vrot.lane.b32.xlu0 %v7288_v38, %s7514_s0 }
0x1c0b   :  { %4784 = vadd.xlane.f32.xlu1 %v4783_v35 }
0x1c0f   :  { %4781 = vadd.xlane.f32.xlu1 %v4780_v46 }
0x1c13   :  { %4790 = vadd.xlane.f32.xlu1 %v4789_v37 }
0x1c24   :  { %7309 = vrot.lane.b32.xlu1 %v8458_v39, %s7517_s25 }
0x1c48   :  { %4787 = vadd.xlane.f32.xlu1 %v4786_v20 }
0x1c4c   :  { %4793 = vadd.xlane.f32.xlu1 %v4792_v45 }
0x1c50   :  { %4802 = vadd.xlane.f32.xlu1 %v4801_v0 }
0x1c51   :  { %v7290_v49 = vpop.permute.xlu1 %7289 }
0x1c52   :  { %v7292_v47 = vunpack.i.h.bf16 %v7290_v49  ;;  %v7291_v50 = vunpack.i.l.bf16 %v7290_v49 }
0x1c54   :  { %v6941_v6 = vpack.c.bf16 %v7292_v47, %v7291_v50  ;;  %4799 = vadd.xlane.f32.xlu1 %v4798_v62 }
0x1c55   :  { %v7295_v10 = vpop.permute.xlu1 %7294 }
0x1c56   :  { %v7297_v58 = vunpack.i.h.bf16 %v7295_v10  ;;  %v7296_v12 = vunpack.i.l.bf16 %v7295_v10  ;;  %6942 = vmatprep.subr.bf16.mxu1 %v6941_v6 }
0x1c57   :  { %6944 = vmatpush3.bf16.msra.mxu1 %v6941_v6 }
0x1c58   :  { %v6945_v52 = vpack.c.bf16 %v7297_v58, %v7296_v12 }
0x1c59   :  { %v7300_v3 = vpop.permute.xlu1 %7299 }
0x1c5a   :  { %v7302_v63 = vunpack.i.h.bf16 %v7300_v3  ;;  %v7301_v54 = vunpack.i.l.bf16 %v7300_v3  ;;  %6946 = vmatprep.subr.bf16.mxu1 %v6945_v52 }
0x1c5b   :  { %6948 = vmatpush3.bf16.msra.mxu1 %v6945_v52 }
0x1c5c   :  { %v6949_v61 = vpack.c.bf16 %v7302_v63, %v7301_v54 }
0x1c5e   :  { %6950 = vmatprep.subr.bf16.mxu0 %v6949_v61 }
0x1c65   :  { %7314 = vrot.lane.b32.xlu1 %v8458_v39, %s7514_s0 }
0x1c69   :  { %7319 = vrot.lane.b32.xlu1 %v8280_v55, %s7519_s27 }
0x1c6b   :  { %v4797_v8 = vpop.xlane.xlu0 %4796 }
0x1c6d   :  { %7324 = vrot.lane.b32.xlu1 %v8292_v51, %s7519_s27 }
0x1c6f   :  { %v7305_v53 = vpop.permute.xlu0 %7304 }
0x1c70   :  { %v7307_v13 = vunpack.i.h.bf16 %v7305_v53  ;;  %v7306_v56 = vunpack.i.l.bf16 %v7305_v53 }
0x1c72   :  { %v6957_v1 = vpack.c.bf16 %v7307_v13, %v7306_v56 }
0x1c74   :  { %6958 = vmatprep.subr.bf16.mxu1 %v6957_v1 }
0x1c98   :  { %v4785_v14 = vpop.xlane.xlu1 %4784 }
0x1c99   :  { %7456 = vrcp.f32 %v4785_v14 }
0x1c9c   :  { %v4782_v11 = vpop.xlane.xlu1 %4781 }
0x1c9d   :  { %7458 = vrcp.f32 %v4782_v11 }
0x1ca0   :  { %v4791_v41 = vpop.xlane.xlu1 %4790 }
0x1ca1   :  { %7460 = vrcp.f32 %v4791_v41 }
0x1ca3   :  { %v7457_v17 = vpop.eup %7456 }
0x1ca4   :  { %v7310_v16 = vpop.permute.xlu1 %7309  ;;  %v4807_v39 = vmul.f32 %v7457_v17, %v8467_v21 }
0x1ca5   :  { %v7312_v38 = vunpack.i.h.bf16 %v7310_v16  ;;  %v7311_v32 = vunpack.i.l.bf16 %v7310_v16 }
0x1ca7   :  { %v7459_v25 = vpop.eup %7458  ;;  %v6953_v15 = vpack.c.bf16 %v7312_v38, %v7311_v32 }
0x1ca8   :  { %v4805_v33 = vmul.f32 %v7459_v25, %v8471_v36 }
0x1caa   :  { %6520 = vmatprep.mubr.msk.f32.mxu0 %vm67_vm0, %v4805_v33 }
0x1cab   :  { %6521 = vmatmul.mubr.msk.f32.vlgmr.msra.gmra.mrb[44].mxu0 %vm67_vm0, %v4807_v39  ;;  %v7461_v26 = vpop.eup %7460 }
0x1cac   :  { %6952 = vmatpush3.bf16.msra.mxu0 %v6949_v61  ;;  %v4811_v36 = vmul.f32 %v7461_v26, %v8475_v24 }
0x1cad   :  { %6954 = vmatprep.subr.bf16.mxu0 %v6953_v15 }
0x1cb0   :  { %6956 = vmatpush3.bf16.msra.mxu0 %v6953_v15 }
0x1cd5   :  { %v4788_v42 = vpop.xlane.xlu1 %4787 }
0x1cd6   :  { %7462 = vrcp.f32 %v4788_v42 }
0x1cd7   :  { %7464 = vrcp.f32 %v4797_v8 }
0x1cd9   :  { %v4794_v2 = vpop.xlane.xlu1 %4793 }
0x1cda   :  { %7466 = vrcp.f32 %v4794_v2 }
0x1cdd   :  { %v4803_v23 = vpop.xlane.xlu1 %4802 }
0x1cde   :  { %7468 = vrcp.f32 %v4803_v23 }
0x1ce0   :  { %v7463_v29 = vpop.eup %7462 }
0x1ce1   :  { %v4800_v35 = vpop.xlane.xlu1 %4799  ;;  %v4809_v21 = vmul.f32 %v7463_v29, %v8485_v19  ;;  %v7465_v46 = vpop.eup %7464 }
0x1ce2   :  { %7470 = vrcp.f32 %v4800_v35  ;;  %v4815_v40 = vmul.f32 %v7465_v46, %v8453_v4  ;;  %v5779_v46 = vld [vmem:[%s8634_s5 + $0x38] sm:$0xff] }
0x1ce3   :  { %6531 = vmatprep.mubr.msk.f32.mxu1 %vm67_vm0, %v4809_v21  ;;  %v5778_v21 = vld [vmem:[%s8634_s5 + $0x30] sm:$0xff] }
0x1ce4   :  { %v7467_v37 = vpop.eup %7466  ;;  %6532 = vmatmul.mubr.msk.f32.vlgmr.msra.gmra.mrb[50].mxu1 %vm67_vm0, %v4811_v36 }
0x1ce5   :  { %6960 = vmatpush3.bf16.msra.mxu1 %v6957_v1  ;;  %v7315_v57 = vpop.permute.xlu1 %7314  ;;  %v4813_v18 = vmul.f32 %v7467_v37, %v8489_v9  ;;  %v5780_v37 = vld [vmem:[%s8634_s5 + $0x40] sm:$0xff] }
0x1ce6   :  { %v7317_v44 = vunpack.i.h.bf16 %v7315_v57  ;;  %v7316_v60 = vunpack.i.l.bf16 %v7315_v57  ;;  %v6977_v57 = vpack.c.bf16 %v5780_v37, %v5779_v46 }
0x1ce7   :  { %6542 = vmatprep.mubr.msk.f32.mxu0 %vm67_vm0, %v4813_v18  ;;  %v5782_v18 = vld [vmem:[%s8635_s6 + $0x48] sm:$0xff] }
0x1ce8   :  { %v6961_v31 = vpack.c.bf16 %v7317_v44, %v7316_v60  ;;  %6543 = vmatmul.mubr.msk.f32.vlgmr.msra.gmra.mrb[46].mxu0 %vm67_vm0, %v4815_v40  ;;  %v7469_v24 = vpop.eup %7468  ;;  %v5783_v40 = vld [vmem:[%s8635_s6 + $0x50] sm:$0xff]  ;;  %v5784_v44 = vld [vmem:[%s8635_s6 + $0x58] sm:$0xff] }
0x1ce9   :  { %v4819_v43 = vmul.f32 %v7469_v24, %v8493_v48  ;;  %v7320_v4 = vpop.permute.xlu1 %7319  ;;  %v6981_v60 = vpack.c.bf16 %v5783_v40, %v5782_v18 }
0x1cea   :  { %6962 = vmatprep.subr.bf16.mxu1 %v6961_v31  ;;  %v7322_v19 = vunpack.i.h.bf16 %v7320_v4  ;;  %v7321_v20 = vunpack.i.l.bf16 %v7320_v4 }
0x1ceb   :  { %6964 = vmatpush3.bf16.msra.mxu1 %v6961_v31  ;;  %v5785_v31 = vld [vmem:[%s8635_s6 + $0x60] sm:$0xff] }
0x1cec   :  { %v7471_v34 = vpop.eup %7470  ;;  %v6965_v9 = vpack.c.bf16 %v7322_v19, %v7321_v20  ;;  %v6985_v24 = vpack.c.bf16 %v5785_v31, %v5784_v44 }
0x1ced   :  { %v4817_v27 = vmul.f32 %v7471_v34, %v8497_v5  ;;  %v7325_v45 = vpop.permute.xlu1 %7324  ;;  %v5786_v34 = vld [vmem:[%s8635_s6 + $0x68] sm:$0xff] }
0x1cee   :  { %v7327_v0 = vunpack.i.h.bf16 %v7325_v45  ;;  %v7326_v49 = vunpack.i.l.bf16 %v7325_v45  ;;  %6966 = vmatprep.subr.bf16.mxu0 %v6965_v9 }
0x1cef   :  { %6553 = vmatprep.mubr.msk.f32.mxu1 %vm67_vm0, %v4817_v27  ;;  %6968 = vmatpush3.bf16.msra.mxu0 %v6965_v9  ;;  %v5787_v27 = vld [vmem:[%s8635_s6 + $0x70] sm:$0xff] }
0x1cf0   :  { %6554 = vmatmul.mubr.msk.f32.vlgmr.msra.gmra.mrb[52].mxu1 %vm67_vm0, %v4819_v43  ;;  %v6969_v48 = vpack.c.bf16 %v7327_v0, %v7326_v49  ;;  %v6989_v43 = vpack.c.bf16 %v5787_v27, %v5786_v34  ;;  %v5776_v49 = vld [vmem:[%s8636_s7 + $0x8] sm:$0x3] }
0x1cf2   :  { %6970 = vmatprep.subr.bf16.mxu0 %v6969_v48 }
0x1cf3   :  { %6972 = vmatpush3.bf16.msra.mxu0 %v6969_v48  ;;  %v5303_v48 = vrot.slane %v5776_v49, %v7820_v22 }
0x1cf4   :  { %6982 = vmatprep.subr.bf16.mxu0 %v6981_v60 }
0x1d7e   :  { %v6522_v5 = vpop.f32.mrb[44].mxu0 }
0x1d7f   :  { %v4892_v47 = vpop.f32.mrb[45].mxu0 }
0x1db7   :  { %v6533_v50 = vpop.f32.mrb[50].mxu1 }
0x1db8   :  { %5148 = vrot.lane.b32.xlu0 %v6533_v50, %s7520_s28  ;;  %v4973_v55 = vpop.f32.mrb[51].mxu1  ;;  %v5309_v50 = vrot.slane %v5776_v49, %v7839_v30 }
0x1db9   :  { %5146 = vrot.lane.b32.xlu1 %v4973_v55, %s7520_s28 }
0x1dbb   :  { %v6544_v51 = vpop.f32.mrb[46].mxu0 }
0x1dbc   :  { %5156 = vrot.lane.b32.xlu0 %v6544_v51, %s7521_s29  ;;  %v5054_v62 = vpop.f32.mrb[47].mxu0 }
0x1dbd   :  { %5154 = vrot.lane.b32.xlu1 %v5054_v62, %s7521_s29  ;;  %s7523_s29 = smov [#allocation2]  }
0x1dc3   :  { %v6555_v6 = vpop.f32.mrb[52].mxu1 }
0x1dc4   :  { %5164 = vrot.lane.b32.xlu0 %v6555_v6, %s7522_s30  ;;  %v5135_v10 = vpop.f32.mrb[53].mxu1 }
0x1dc5   :  { %5162 = vrot.lane.b32.xlu1 %v5135_v10, %s7522_s30  ;;  %s5589_s30 = sshll.u32 %s7523_s29, 4  ;;  %s5590_s30 = int_to_ptr.vmem [resolvable:$true] %s5589_s30 }
0x1dc6   :  { %p7495_p1 = scmp.lt.s32.totalorder %s5590_s30, %s5590_s30 }
0x1dc9   :  { %5186 = vrot.lane.b32.xlu1 %v8299_v59, %s7519_s27 }
0x1e2a   :  { %v5149_v58 = vpop.permute.xlu0 %5148 }
0x1e2b   :  { %v5147_v12 = vpop.permute.xlu1 %5146  ;;  %v5169_v61 = vsel %vm304_vm1, %v6522_v5, %v5149_v58 }
0x1e2c   :  { %v5168_v63 = vsel %vm304_vm1, %v4892_v47, %v5147_v12  ;;  %v5788_v12 = vld [vmem:[%s8635_s6 + $0x78] sm:$0xff] }
0x1e2e   :  { %v5157_v52 = vpop.permute.xlu0 %5156 }
0x1e2f   :  { %v5155_v3 = vpop.permute.xlu1 %5154  ;;  %v5171_v13 = vsel %vm661_vm5, %v5169_v61, %v5157_v52  ;;  %v5789_v52 = vld [vmem:[%s8635_s6 + $0x80] sm:$0xff] }
0x1e30   :  { %v5170_v8 = vsel %vm661_vm5, %v5168_v63, %v5155_v3  ;;  %v6993_v3 = vpack.c.bf16 %v5789_v52, %v5788_v12  ;;  %v5791_v63 = vld [vmem:[%s8634_s5 + $0x48] ss:$0 sm:$0xff] }
0x1e36   :  { %v5165_v54 = vpop.permute.xlu0 %5164 }
0x1e37   :  { %v5163_v53 = vpop.permute.xlu1 %5162  ;;  %v5173_v1 = vsel %vm1102_vm6, %v5171_v13, %v5165_v54 }
0x1e38   :  { %v5172_v56 = vsel %vm1102_vm6, %v5170_v8, %v5163_v53 }
0x1e39   :  { %6564 = vmatprep.mubr.msk.f32.mxu0 %vm67_vm0, %v5172_v56 }
0x1e3a   :  { %6565 = vmatmul.mubr.msk.f32.vlgmr.msra.gmra.mrb[48].mxu0 %vm67_vm0, %v5173_v1  ;;  %v5794_v1 = vld [vmem:[%s8635_s6 + $0x88] ss:$0 sm:$0xff] }
0x1e3b   :  { %v5187_v59 = vpop.permute.xlu1 %5186  ;;  %6984 = vmatpush3.bf16.msra.mxu0 %v6981_v60 }
0x1e3c   :  { %6986 = vmatprep.subr.bf16.mxu0 %v6985_v24 }
0x1e3f   :  { %6988 = vmatpush3.bf16.msra.mxu0 %v6985_v24 }
0x1e40   :  { %6990 = vmatprep.subr.bf16.mxu0 %v6989_v43 }
0x1e43   :  { %6992 = vmatpush3.bf16.msra.mxu0 %v6989_v43 }
0x1e44   :  { %6994 = vmatprep.subr.bf16.mxu0 %v6993_v3 }
0x1e47   :  { %6996 = vmatpush3.bf16.msra.mxu0 %v6993_v3  ;;  %v5798_v3 = vld [vmem:[%s8636_s7 + $0xc] sm:$0x3] }
0x1f0d   :  { %v6566_v14 = vpop.f32.mrb[48].mxu0 }
0x1f0e   :  { %v5267_v11 = vadd.f32 %v6566_v14, %v5187_v59  ;;  %v5261_v41 = vpop.f32.mrb[49].mxu0 }
0x1f0f   :  { %v5262_v16 = vadd.f32 %v5261_v41, %v5187_v59 }
0x1f10   :  { %v5271_v17 = vadd.f32 %v5267_v11, %v8318_v7 }
0x1f11   :  { %v5270_v25 = vadd.f32 %v5262_v16, %v8320_v28  ;;  %v5777_v28 = vld [vmem:[%s8634_s5 + $0x28] sm:$0xff] }
0x1f12   :  { %v5277_v38 = vsel %vm67_vm0, %v5271_v17, 0.0  ;;  %v6973_v36 = vpack.c.bf16 %v5778_v21, %v5777_v28 }
0x1f13   :  { %5278 = vadd.xlane.f32.xlu1 %v5277_v38  ;;  %v5274_v32 = vsel %vm67_vm0, %v5270_v25, 0.0 }
0x1f14   :  { %5275 = vadd.xlane.f32.xlu0 %v5274_v32  ;;  %6974 = vmatprep.subr.bf16.mxu1 %v6973_v36 }
0x1f15   :  { %6976 = vmatpush3.bf16.msra.mxu1 %v6973_v36 }
0x1f16   :  { %6978 = vmatprep.subr.bf16.mxu1 %v6977_v57 }
0x1f19   :  { %6980 = vmatpush3.bf16.msra.mxu1 %v6977_v57  ;;  %v5797_v57 = vld [vmem:[%s8636_s7 + $0xa] sm:$0x3]  ;;  %s7490_s7 = scalar_lea.vmem %s5590_s30, 256 }
0x1f1a   :  { %v5533_v18 = vrot.slane %v5797_v57, %v7820_v22  ;;  %v5539_v31 = vrot.slane %v5797_v57, %v7839_v30  ;;  %p7491_p0 = scmp.ne.s32.totalorder %s5590_s30, %s7490_s7  ;;  %p7496_p2 = scmp.lt.s32.totalorder %s7490_s7, %s7490_s7 }
0x1f1c   :  { %p7497_p3 = por %p7496_p2, %p7495_p1 }
0x1f1e   :  { %p7498_p4 = pnand %p7497_p3, %p7491_p0 }
0x1fa0   :  { %v5279_v33 = vpop.xlane.xlu1 %5278 }
0x1fa1   :  { %v5281_v39 = vmul.f32 0.03125, %v5279_v33  ;;  %v5276_v15 = vpop.xlane.xlu0 %5275 }
0x1fa2   :  { %v5280_v42 = vmul.f32 0.03125, %v5276_v15 }
0x1fa3   :  { %v5283_v2 = vsub.f32 %v5271_v17, %v5281_v39 }
0x1fa4   :  { %v5282_v23 = vsub.f32 %v5270_v25, %v5280_v42 }
0x1fa5   :  { %v5285_v35 = vmul.f32 %v5283_v2, %v5283_v2 }
0x1fa6   :  { %v5284_v26 = vmul.f32 %v5282_v23, %v5282_v23 }
0x1fa7   :  { %v5289_v7 = vsel %vm67_vm0, %v5285_v35, 0.0 }
0x1fa8   :  { %v5286_v29 = vsel %vm67_vm0, %v5284_v26, 0.0 }
0x1fa9   :  { %5287 = vadd.xlane.f32.xlu0 %v5286_v29 }
0x1fad   :  { %5290 = vadd.xlane.f32.xlu0 %v5289_v7 }
0x2036   :  { %v5288_v4 = vpop.xlane.xlu0 %5287 }
0x2037   :  { %v5292_v19 = vmul.f32 0.03125, %v5288_v4 }
0x2039   :  { %v5294_v20 = vadd.f32 1e-05, %v5292_v19 }
0x203a   :  { %v5291_v9 = vpop.xlane.xlu0 %5290 }
0x203b   :  { %7472 = vrsqrt.f32 %v5294_v20  ;;  %v5293_v45 = vmul.f32 0.03125, %v5291_v9 }
0x203d   :  { %v5295_v0 = vadd.f32 1e-05, %v5293_v45 }
0x203f   :  { %7474 = vrsqrt.f32 %v5295_v0 }
0x2045   :  { %v7473_v5 = vpop.eup %7472 }
0x2046   :  { %v5298_v47 = vmul.f32 %v7473_v5, %v5282_v23 }
0x2048   :  { %v5304_v55 = vmul.f32 %v5303_v48, %v5298_v47 }
0x2049   :  { %v7475_v51 = vpop.eup %7474 }
0x204a   :  { %v5299_v62 = vmul.f32 %v7475_v51, %v5283_v2  ;;  %v5310_v6 = vadd.f32 %v5309_v50, %v5304_v55 }
0x204c   :  { %v5305_v10 = vmul.f32 %v5303_v48, %v5299_v62  ;;  %6575 = vmatprep.mubr.msk.f32.mxu1 %vm67_vm0, %v5310_v6 }
0x204e   :  { %v5311_v58 = vadd.f32 %v5309_v50, %v5305_v10 }
0x2050   :  { %6576 = vmatmul.mubr.msk.f32.vlgmr.msra.gmra.mrb[54].mxu1 %vm67_vm0, %v5311_v58 }
0x2123   :  { %v6577_v54 = vpop.f32.mrb[54].mxu1 }
0x2124   :  { %v5410_v61 = vadd.f32 %v6577_v54, %v5791_v63  ;;  %v5404_v8 = vpop.f32.mrb[55].mxu1 }
0x2125   :  { %v5405_v53 = vadd.f32 %v5791_v63, %v5404_v8  ;;  %v5573_v63 = vrot.slane %v5798_v3, %v7820_v22 }
0x2126   :  { %v5414_v56 = vmax.f32 %v5410_v61, 0.0 }
0x2127   :  { %v5413_v13 = vmax.f32 %v5405_v53, 0.0  ;;  %v5579_v53 = vrot.slane %v5798_v3, %v7839_v30 }
0x2129   :  { %6594 = vmatprep.mubr.msk.f32.mxu0 %vm2690_vm7, %v5413_v13 }
0x212a   :  { %6595 = vmatmul.mubr.msk.f32.vlgmr.msra.gmra.mrb[50].mxu0 %vm2690_vm7, %v5414_v56 }
0x21fd   :  { %v6596_v59 = vpop.f32.mrb[50].mxu0 }
0x21fe   :  { %v5497_v14 = vadd.f32 %v6596_v59, %v5794_v1  ;;  %v5491_v11 = vpop.f32.mrb[51].mxu0 }
0x21ff   :  { %v5492_v41 = vadd.f32 %v5794_v1, %v5491_v11 }
0x2200   :  { %v5501_v16 = vadd.f32 %v5497_v14, %v5311_v58 }
0x2201   :  { %v5500_v17 = vadd.f32 %v5492_v41, %v5310_v6 }
0x2202   :  { %v5507_v25 = vsel %vm67_vm0, %v5501_v16, 0.0 }
0x2203   :  { %5508 = vadd.xlane.f32.xlu0 %v5507_v25  ;;  %v5504_v38 = vsel %vm67_vm0, %v5500_v17, 0.0 }
0x2204   :  { %5505 = vadd.xlane.f32.xlu1 %v5504_v38 }
0x2290   :  { %v5509_v32 = vpop.xlane.xlu0 %5508 }
0x2291   :  { %v5511_v33 = vmul.f32 0.03125, %v5509_v32  ;;  %v5506_v39 = vpop.xlane.xlu1 %5505 }
0x2292   :  { %v5510_v15 = vmul.f32 0.03125, %v5506_v39 }
0x2293   :  { %v5513_v42 = vsub.f32 %v5501_v16, %v5511_v33 }
0x2294   :  { %v5512_v2 = vsub.f32 %v5500_v17, %v5510_v15 }
0x2295   :  { %v5515_v23 = vmul.f32 %v5513_v42, %v5513_v42 }
0x2296   :  { %v5514_v26 = vmul.f32 %v5512_v2, %v5512_v2 }
0x2297   :  { %v5519_v29 = vsel %vm67_vm0, %v5515_v23, 0.0 }
0x2298   :  { %5520 = vadd.xlane.f32.xlu0 %v5519_v29  ;;  %v5516_v35 = vsel %vm67_vm0, %v5514_v26, 0.0 }
0x2299   :  { %5517 = vadd.xlane.f32.xlu1 %v5516_v35 }
0x2325   :  { %v5521_v7 = vpop.xlane.xlu0 %5520 }
0x2326   :  { %v5523_v28 = vmul.f32 0.03125, %v5521_v7  ;;  %v5518_v21 = vpop.xlane.xlu1 %5517 }
0x2327   :  { %v5522_v36 = vmul.f32 0.03125, %v5518_v21 }
0x2328   :  { %v5525_v46 = vadd.f32 1e-05, %v5523_v28 }
0x2329   :  { %v5524_v37 = vadd.f32 1e-05, %v5522_v36 }
0x232a   :  { %7476 = vrsqrt.f32 %v5525_v46 }
0x232b   :  { %7478 = vrsqrt.f32 %v5524_v37 }
0x2334   :  { %v7477_v40 = vpop.eup %7476 }
0x2335   :  { %v7479_v44 = vpop.eup %7478  ;;  %v5529_v60 = vmul.f32 %v7477_v40, %v5513_v42 }
0x2336   :  { %v5528_v24 = vmul.f32 %v7479_v44, %v5512_v2 }
0x2337   :  { %v5535_v34 = vmul.f32 %v5533_v18, %v5529_v60 }
0x2338   :  { %v5534_v27 = vmul.f32 %v5533_v18, %v5528_v24 }
0x2339   :  { %v5541_v43 = vadd.f32 %v5539_v31, %v5535_v34 }
0x233a   :  { %v5540_v4 = vadd.f32 %v5539_v31, %v5534_v27 }
0x233b   :  { %v5547_v19 = vsel %vm67_vm0, %v5541_v43, 0.0 }
0x233c   :  { %5548 = vadd.xlane.f32.xlu0 %v5547_v19  ;;  %v5544_v20 = vsel %vm67_vm0, %v5540_v4, 0.0 }
0x233d   :  { %5545 = vadd.xlane.f32.xlu1 %v5544_v20 }
0x23c9   :  { %v5549_v9 = vpop.xlane.xlu0 %5548 }
0x23ca   :  { %v5551_v45 = vmul.f32 0.03125, %v5549_v9  ;;  %v5546_v0 = vpop.xlane.xlu1 %5545 }
0x23cb   :  { %v5550_v49 = vmul.f32 0.03125, %v5546_v0 }
0x23cc   :  { %v5553_v48 = vsub.f32 %v5541_v43, %v5551_v45 }
0x23cd   :  { %v5552_v5 = vsub.f32 %v5540_v4, %v5550_v49 }
0x23ce   :  { %v5555_v47 = vmul.f32 %v5553_v48, %v5553_v48 }
0x23cf   :  { %v5554_v50 = vmul.f32 %v5552_v5, %v5552_v5 }
0x23d0   :  { %v5559_v55 = vsel %vm67_vm0, %v5555_v47, 0.0 }
0x23d1   :  { %5560 = vadd.xlane.f32.xlu0 %v5559_v55  ;;  %v5556_v51 = vsel %vm67_vm0, %v5554_v50, 0.0 }
0x23d2   :  { %5557 = vadd.xlane.f32.xlu1 %v5556_v51 }
0x245e   :  { %v5561_v62 = vpop.xlane.xlu0 %5560 }
0x245f   :  { %v5563_v6 = vmul.f32 0.03125, %v5561_v62  ;;  %v5558_v10 = vpop.xlane.xlu1 %5557 }
0x2460   :  { %v5562_v58 = vmul.f32 0.03125, %v5558_v10 }
0x2461   :  { %v5565_v12 = vadd.f32 1e-05, %v5563_v6 }
0x2462   :  { %v5564_v52 = vadd.f32 1e-05, %v5562_v58 }
0x2463   :  { %7480 = vrsqrt.f32 %v5565_v12 }
0x2464   :  { %7482 = vrsqrt.f32 %v5564_v52 }
0x246d   :  { %v7481_v54 = vpop.eup %7480 }
0x246e   :  { %v7483_v61 = vpop.eup %7482  ;;  %v5569_v8 = vmul.f32 %v7481_v54, %v5553_v48 }
0x246f   :  { %v5568_v13 = vmul.f32 %v7483_v61, %v5552_v5 }
0x2470   :  { %v5575_v56 = vmul.f32 %v5573_v63, %v5569_v8 }
0x2471   :  { %v5574_v1 = vmul.f32 %v5573_v63, %v5568_v13 }
0x2472   :  { %v5581_v59 = vadd.f32 %v5579_v53, %v5575_v56 }
0x2473   :  { %v5580_v14 = vadd.f32 %v5579_v53, %v5574_v1 }
0x2474   :  { %5583 = vst.msk [vmem:[#allocation2 + $0x8] sm:$0xff] %vm67_vm0, %v5581_v59 }
0x2475   :  { %5582 = vst.msk [vmem:[#allocation2] sm:$0xff] %vm67_vm0, %v5580_v14 }
0x2476   :  { %7501 = shalt.err (!%p7498_p4)
}
0x2477   :  { %s7502_s12 = scalar_lea.hbm %s8637_s8, 256 }
0x2478   :  { %p7503_p5 = scmp.ne.s32.totalorder %s8637_s8, %s7502_s12  ;;  %p7506_p6 = scmp.lt.u32.totalorder %s7502_s12, %s8637_s8 }
0x247a   :  { %p7508_p7 = pnand %p7506_p6, %p7503_p5 }
0x247c   :  { %7511 = shalt.err (!%p7508_p7)
}
0x247d   :  { %s7524_s17 = smov 128  }
0x247e   :  { %5595 = dma.vmem_to_hbm [thread:$0]  %s5590_s30, 256, %s8637_s8, [#allocation3], %s7524_s17, %s7524_s17, %s7520_s28  }
0x247f   :  { %7512 = dma.done.wait [#allocation3], 256  }
0x2480   :  { %7513 = vsyncadd [#allocation3], 4294967040 }
0x2481   :  { %5599 = vsyncpa [#allocation3], 1 }

</bundles_post_ra>
